<compile_context>
chip_gen: v7x
topology: tpu7x:2x2x1
jax: 0.10.0
libtpu: 0.0.40
codegen_flags: <defaults>
</compile_context>

<pallas_src>
import functools
import math

import jax
import jax.numpy as jnp
from jax.experimental import pallas as pl
from jax.experimental.pallas import tpu as pltpu

_LN_EPS = 1e-5
_GN_EPS = 1e-5


def _layernorm(x, gamma, beta):
    # x: (S, H); gamma/beta: (1, H). Biased variance, eps inside sqrt (torch).
    mean = jnp.mean(x, axis=-1, keepdims=True)
    var = jnp.mean(jnp.square(x - mean), axis=-1, keepdims=True)
    return (x - mean) * jax.lax.rsqrt(var + _LN_EPS) * gamma + beta


def _softmax_lastdim(s):
    m = jnp.max(s, axis=-1, keepdims=True)
    e = jnp.exp(s - m)
    return e / jnp.sum(e, axis=-1, keepdims=True)


def _mean_all(z):
    # Full 2-D mean as two single-axis reductions (robust lowering).
    s = jnp.sum(jnp.sum(z, axis=-1, keepdims=True), axis=0, keepdims=True)
    return s / float(z.shape[0] * z.shape[1])


def _diff_attn_kernel(x_ref, ln1_g_ref, ln1_b_ref, w_ref, b_ref, lam_ref,
                      gnw_ref, gnb_ref, ctx_ref, *, num_heads, head_dim,
                      use_group_norm):
    # x_ref:   (1, S, H)      w_ref: (5, nH, H, hd)   b_ref: (5, nH, 1, hd)
    # gnw/gnb: (nH, 1, hd)    lam_ref: (1, 1) in SMEM
    # ctx_ref: (1, nH, S, hd) per-head (group-normed) attention context.
    x = x_ref[0]
    ln1 = _layernorm(x, ln1_g_ref[...], ln1_b_ref[...])
    lam = lam_ref[0, 0]
    inv_scale = 1.0 / math.sqrt(head_dim)
    dn = (((1,), (1,)), ((), ()))  # contract last dims: q @ k.T

    for h in range(num_heads):
        def proj(i, _h=h):
            return (jnp.dot(ln1, w_ref[i, _h],
                            preferred_element_type=jnp.float32) + b_ref[i, _h])

        q1 = proj(0)
        q2 = proj(1)
        k1 = proj(2)
        k2 = proj(3)
        v = proj(4)

        s1 = jax.lax.dot_general(q1, k1, dn,
                                 preferred_element_type=jnp.float32) * inv_scale
        s2 = jax.lax.dot_general(q2, k2, dn,
                                 preferred_element_type=jnp.float32) * inv_scale
        probs = _softmax_lastdim(s1) - lam * _softmax_lastdim(s2)
        # TODO(synk): attention-probs dropout is inference-mode identity here.
        ctx_h = jnp.dot(probs, v, preferred_element_type=jnp.float32)  # (S, hd)

        if use_group_norm:
            m = _mean_all(ctx_h)
            var = _mean_all(jnp.square(ctx_h - m))
            ctx_h = (ctx_h - m) * jax.lax.rsqrt(var + _GN_EPS)
            ctx_h = ctx_h * gnw_ref[h] + gnb_ref[h]

        ctx_ref[0, h] = ctx_h


def _out_mlp_kernel(x_ref, ctx_ref, wo_ref, bo_ref, ln2_g_ref, ln2_b_ref,
                    w1_ref, b1_ref, w3_ref, b3_ref, out_ref):
    # x_ref/ctx_ref/out_ref: (1, S, H)
    x = x_ref[0]
    ctx = ctx_ref[0]
    attn_out = (jnp.dot(ctx, wo_ref[...], preferred_element_type=jnp.float32)
                + bo_ref[...])
    x1 = x + attn_out
    ln2 = _layernorm(x1, ln2_g_ref[...], ln2_b_ref[...])
    h = (jnp.dot(ln2, w1_ref[...], preferred_element_type=jnp.float32)
         + b1_ref[...])
    # NewGELU (tanh approximation, matches the PyTorch module exactly)
    g = 0.5 * h * (1.0 + jnp.tanh(math.sqrt(2.0 / math.pi)
                                  * (h + 0.044715 * h * h * h)))
    mlp = (jnp.dot(g, w3_ref[...], preferred_element_type=jnp.float32)
           + b3_ref[...])
    # TODO(synk): MLP hidden dropout is inference-mode identity here.
    out_ref[0] = x1 + mlp


def _const_spec(a):
    n = a.ndim
    return pl.BlockSpec(a.shape, lambda b, _n=n: (0,) * _n)


def make_block(config, params):
    H = config["hidden_size"]
    nH = config["num_attention_heads"]
    hd = H // nH
    S = (config["image_size"] // config["patch_size"]) ** 2 + 1
    I = config["intermediate_size"]
    use_gn = config.get("use_group_norm", True)
    assert config.get("use_differential_attention", False), \
        "Block requires use_differential_attention=True"
    assert H % nH == 0

    # ---- repack parameters into kernel-friendly layouts ----
    def heads_w(w):           # (H, H) -> (nH, H, hd)
        return w.reshape(H, nH, hd).transpose(1, 0, 2)

    def heads_b(b):           # (H,) -> (nH, 1, hd)
        return b.reshape(nH, 1, hd)

    wq1, wq2 = params["wq"][:, :H], params["wq"][:, H:]
    wk1, wk2 = params["wk"][:, :H], params["wk"][:, H:]
    w_heads = jnp.stack([heads_w(wq1), heads_w(wq2), heads_w(wk1),
                         heads_w(wk2), heads_w(params["wv"])])   # (5,nH,H,hd)
    bq1, bq2 = params["bq"][:H], params["bq"][H:]
    bk1, bk2 = params["bk"][:H], params["bk"][H:]
    b_heads = jnp.stack([heads_b(bq1), heads_b(bq2), heads_b(bk1),
                         heads_b(bk2), heads_b(params["bv"])])   # (5,nH,1,hd)
    gn_w = heads_b(params["gn_w"])
    gn_b = heads_b(params["gn_b"])
    lam = jnp.asarray(params["lambda"], jnp.float32).reshape(1, 1)
    ln1_g = params["ln1_g"].reshape(1, H)
    ln1_b = params["ln1_b"].reshape(1, H)
    ln2_g = params["ln2_g"].reshape(1, H)
    ln2_b = params["ln2_b"].reshape(1, H)
    bo = params["bo"].reshape(1, H)
    b1 = params["b1"].reshape(1, I)
    b3 = params["b3"].reshape(1, H)
    wo, w1, w3 = params["wo"], params["w1"], params["w3"]

    attn_kernel = functools.partial(_diff_attn_kernel, num_heads=nH,
                                    head_dim=hd, use_group_norm=use_gn)

    def forward(x, output_attentions=False):
        B = x.shape[0]
        assert x.shape == (B, S, H), f"expected (B,{S},{H}), got {x.shape}"

        ctx_heads = pl.pallas_call(
            attn_kernel,
            out_shape=jax.ShapeDtypeStruct((B, nH, S, hd), jnp.float32),
            grid=(B,),
            in_specs=[
                pl.BlockSpec((1, S, H), lambda b: (b, 0, 0)),
                _const_spec(ln1_g), _const_spec(ln1_b),
                _const_spec(w_heads), _const_spec(b_heads),
                pl.BlockSpec(memory_space=pltpu.MemorySpace.SMEM),  # lambda
                _const_spec(gn_w), _const_spec(gn_b),
            ],
            out_specs=pl.BlockSpec((1, nH, S, hd), lambda b: (b, 0, 0, 0)),
            compiler_params=pltpu.CompilerParams(
                dimension_semantics=("parallel",)),
        )(x, ln1_g, ln1_b, w_heads, b_heads, lam, gn_w, gn_b)

        if use_gn:
            # Faithful to the PyTorch code: GroupNorm channel layout followed
            # by `.transpose(1,2).contiguous().view(B, S, H)` (a pure memory
            # re-interpretation) — zero-FLOP layout plumbing done by XLA.
            ctx = jnp.transpose(ctx_heads, (0, 1, 3, 2)).reshape(B, S, H)
        else:
            ctx = jnp.transpose(ctx_heads, (0, 2, 1, 3)).reshape(B, S, H)

        out = pl.pallas_call(
            _out_mlp_kernel,
            out_shape=jax.ShapeDtypeStruct((B, S, H), jnp.float32),
            grid=(B,),
            in_specs=[
                pl.BlockSpec((1, S, H), lambda b: (b, 0, 0)),
                pl.BlockSpec((1, S, H), lambda b: (b, 0, 0)),
                _const_spec(wo), _const_spec(bo),
                _const_spec(ln2_g), _const_spec(ln2_b),
                _const_spec(w1), _const_spec(b1),
                _const_spec(w3), _const_spec(b3),
            ],
            out_specs=pl.BlockSpec((1, S, H), lambda b: (b, 0, 0)),
            compiler_params=pltpu.CompilerParams(
                dimension_semantics=("parallel",)),
        )(x, ctx, wo, bo, ln2_g, ln2_b, w1, b1, w3, b3)

        # TODO(synk): output_attentions=True would require a second
        # (B, nH, S, S) output of the diff attention probs; not materialized.
        return out, None

    return forward


# ----------------------------- pure-JAX reference ---------------------------
def _reference_block(x, params, config):
    H = config["hidden_size"]
    nH = config["num_attention_heads"]
    hd = H // nH
    use_gn = config.get("use_group_norm", True)
    B, S, _ = x.shape
    P = jax.lax.Precision.HIGHEST

    def ln(z, g, b):
        m = z.mean(-1, keepdims=True)
        v = ((z - m) ** 2).mean(-1, keepdims=True)
        return (z - m) / jnp.sqrt(v + _LN_EPS) * g + b

    h1 = ln(x, params["ln1_g"], params["ln1_b"])
    q = jnp.dot(h1, params["wq"], precision=P) + params["bq"]
    k = jnp.dot(h1, params["wk"], precision=P) + params["bk"]
    v = jnp.dot(h1, params["wv"], precision=P) + params["bv"]
    q1, q2 = q[..., :H], q[..., H:]
    k1, k2 = k[..., :H], k[..., H:]

    def split_heads(z):
        return z.reshape(B, S, nH, hd).transpose(0, 2, 1, 3)

    q1, q2, k1, k2, vh = map(split_heads, (q1, q2, k1, k2, v))
    s1 = jnp.einsum("bhqd,bhkd->bhqk", q1, k1, precision=P) / math.sqrt(hd)
    s2 = jnp.einsum("bhqd,bhkd->bhqk", q2, k2, precision=P) / math.sqrt(hd)
    probs = jax.nn.softmax(s1, -1) - params["lambda"] * jax.nn.softmax(s2, -1)
    ctx = jnp.einsum("bhqk,bhkd->bhqd", probs, vh, precision=P)

    if use_gn:
        cr = jnp.transpose(ctx, (0, 1, 3, 2)).reshape(B, nH * hd, S)
        grp = cr.reshape(B, nH, hd * S)
        gm = grp.mean(-1, keepdims=True)
        gv = ((grp - gm) ** 2).mean(-1, keepdims=True)
        grp = (grp - gm) / jnp.sqrt(gv + _GN_EPS)
        cn = (grp.reshape(B, nH * hd, S) * params["gn_w"][None, :, None]
              + params["gn_b"][None, :, None])
        ctx2 = jnp.transpose(cn, (0, 2, 1))                      # (B, S, H)
        ctx_final = jnp.transpose(ctx2, (0, 2, 1)).reshape(B, S, H)  # scramble
    else:
        ctx_final = jnp.transpose(ctx, (0, 2, 1, 3)).reshape(B, S, H)

    attn_out = jnp.dot(ctx_final, params["wo"], precision=P) + params["bo"]
    x1 = x + attn_out
    h2 = ln(x1, params["ln2_g"], params["ln2_b"])
    m1 = jnp.dot(h2, params["w1"], precision=P) + params["b1"]
    g = 0.5 * m1 * (1.0 + jnp.tanh(math.sqrt(2.0 / math.pi)
                                   * (m1 + 0.044715 * m1 ** 3)))
    mlp = jnp.dot(g, params["w3"], precision=P) + params["b3"]
    return x1 + mlp


if __name__ == "__main__":
    config = {
        "hidden_size": 32,
        "num_attention_heads": 4,
        "image_size": 16,
        "patch_size": 4,
        "intermediate_size": 64,
        "hidden_dropout_prob": 0.0,
        "attention_probs_dropout_prob": 0.0,
        "use_differential_attention": True,
        "use_group_norm": True,
    }
    H = config["hidden_size"]
    I = config["intermediate_size"]
    S = (config["image_size"] // config["patch_size"]) ** 2 + 1  # 17
    B = 2

    key = jax.random.PRNGKey(0)
    ks = jax.random.split(key, 20)

    def nrm(k, shape, scale):
        return scale * jax.random.normal(k, shape, jnp.float32)

    params = {
        "ln1_g": 1.0 + nrm(ks[0], (H,), 0.1), "ln1_b": nrm(ks[1], (H,), 0.1),
        "wq": nrm(ks[2], (H, 2 * H), 1.0 / math.sqrt(H)),
        "bq": nrm(ks[3], (2 * H,), 0.02),
        "wk": nrm(ks[4], (H, 2 * H), 1.0 / math.sqrt(H)),
        "bk": nrm(ks[5], (2 * H,), 0.02),
        "wv": nrm(ks[6], (H, H), 1.0 / math.sqrt(H)),
        "bv": nrm(ks[7], (H,), 0.02),
        "wo": nrm(ks[8], (H, H), 1.0 / math.sqrt(H)),
        "bo": nrm(ks[9], (H,), 0.02),
        "lambda": jnp.array(0.5, jnp.float32),
        "gn_w": 1.0 + nrm(ks[10], (H,), 0.1), "gn_b": nrm(ks[11], (H,), 0.1),
        "ln2_g": 1.0 + nrm(ks[12], (H,), 0.1), "ln2_b": nrm(ks[13], (H,), 0.1),
        "w1": nrm(ks[14], (H, I), 1.0 / math.sqrt(H)),
        "b1": nrm(ks[15], (I,), 0.02),
        "w3": nrm(ks[16], (I, H), 1.0 / math.sqrt(I)),
        "b3": nrm(ks[17], (H,), 0.02),
    }

    x = nrm(ks[18], (B, S, H), 1.0)

    forward = make_block(config, params)
    out, attn = forward(x)
    out = jax.block_until_ready(out)

    ref = _reference_block(x, params, config)
    assert out.shape == (B, S, H) and out.dtype == jnp.float32
    assert attn is None
    max_err = float(jnp.max(jnp.abs(out - ref)))
    assert jnp.allclose(out, ref, atol=2e-3, rtol=2e-3), \
        f"mismatch vs reference, max abs err = {max_err}"

    print("KERNEL_OK")
</pallas_src>

<mosaic_0001>
module attributes {stable_mosaic.version = 11 : i64} {
  func.func @_diff_attn_kernel(%arg0: i32, %arg1: memref<1x17x32xf32, #tpu.memory_space<vmem>>, %arg2: memref<1x32xf32, #tpu.memory_space<vmem>>, %arg3: memref<1x32xf32, #tpu.memory_space<vmem>>, %arg4: memref<5x4x32x8xf32, #tpu.memory_space<vmem>>, %arg5: memref<5x4x1x8xf32, #tpu.memory_space<vmem>>, %arg6: memref<1x1xf32, #tpu.memory_space<smem>>, %arg7: memref<4x1x8xf32, #tpu.memory_space<vmem>>, %arg8: memref<4x1x8xf32, #tpu.memory_space<vmem>>, %arg9: memref<1x4x17x8xf32, #tpu.memory_space<vmem>>) attributes {dimension_semantics = [#tpu.dimension_semantics<parallel>], iteration_bounds = array<i64: 2>, scalar_prefetch = 0 : i64, scratch_operands = 0 : i64, tpu.core_type = #tpu.core_type<tc>, window_params = [{transform_indices = @transform_0, window_bounds = array<i64: 1, 17, 32>}, {pipeline_mode = #tpu.pipeline_mode<synchronous>, transform_indices = @transform_1, window_bounds = array<i64: 1, 32>}, {pipeline_mode = #tpu.pipeline_mode<synchronous>, transform_indices = @transform_2, window_bounds = array<i64: 1, 32>}, {pipeline_mode = #tpu.pipeline_mode<synchronous>, transform_indices = @transform_3, window_bounds = array<i64: 5, 4, 32, 8>}, {pipeline_mode = #tpu.pipeline_mode<synchronous>, transform_indices = @transform_4, window_bounds = array<i64: 5, 4, 1, 8>}, {transform_indices = @transform_5, window_bounds = array<i64: 1, 1>}, {pipeline_mode = #tpu.pipeline_mode<synchronous>, transform_indices = @transform_6, window_bounds = array<i64: 4, 1, 8>}, {pipeline_mode = #tpu.pipeline_mode<synchronous>, transform_indices = @transform_7, window_bounds = array<i64: 4, 1, 8>}, {transform_indices = @transform_8, window_bounds = array<i64: 1, 4, 17, 8>}]} {
    %c0 = arith.constant 0 : index
    %c0_0 = arith.constant 0 : index
    %c0_1 = arith.constant 0 : index
    %0 = vector.load %arg1[%c0, %c0_0, %c0_1] : memref<1x17x32xf32, #tpu.memory_space<vmem>>, vector<1x17x32xf32>
    %1 = vector.shape_cast %0 : vector<1x17x32xf32> to vector<17x32xf32>
    %c0_2 = arith.constant 0 : index
    %c0_3 = arith.constant 0 : index
    %2 = vector.load %arg2[%c0_2, %c0_3] : memref<1x32xf32, #tpu.memory_space<vmem>>, vector<1x32xf32>
    %c0_4 = arith.constant 0 : index
    %c0_5 = arith.constant 0 : index
    %3 = vector.load %arg3[%c0_4, %c0_5] : memref<1x32xf32, #tpu.memory_space<vmem>>, vector<1x32xf32>
    %cst = arith.constant dense<0.000000e+00> : vector<17xf32>
    %4 = vector.multi_reduction <add>, %1, %cst [1] : vector<17x32xf32> to vector<17xf32>
    %5 = vector.shape_cast %4 : vector<17xf32> to vector<17x1xf32>
    %cst_6 = arith.constant 3.200000e+01 : f32
    %6 = vector.broadcast %cst_6 : f32 to vector<17x1xf32>
    %7 = arith.divf %5, %6 : vector<17x1xf32>
    %8 = vector.broadcast %7 : vector<17x1xf32> to vector<17x32xf32>
    %9 = arith.subf %1, %8 : vector<17x32xf32>
    %10 = arith.mulf %9, %9 : vector<17x32xf32>
    %cst_7 = arith.constant dense<0.000000e+00> : vector<17xf32>
    %11 = vector.multi_reduction <add>, %10, %cst_7 [1] : vector<17x32xf32> to vector<17xf32>
    %12 = vector.shape_cast %11 : vector<17xf32> to vector<17x1xf32>
    %cst_8 = arith.constant 3.200000e+01 : f32
    %13 = vector.broadcast %cst_8 : f32 to vector<17x1xf32>
    %14 = arith.divf %12, %13 : vector<17x1xf32>
    %15 = vector.broadcast %7 : vector<17x1xf32> to vector<17x32xf32>
    %16 = arith.subf %1, %15 : vector<17x32xf32>
    %cst_9 = arith.constant 9.99999974E-6 : f32
    %17 = vector.broadcast %cst_9 : f32 to vector<17x1xf32>
    %18 = arith.addf %14, %17 : vector<17x1xf32>
    %19 = math.rsqrt %18 : vector<17x1xf32>
    %20 = vector.broadcast %19 : vector<17x1xf32> to vector<17x32xf32>
    %21 = arith.mulf %16, %20 : vector<17x32xf32>
    %22 = vector.broadcast %2 : vector<1x32xf32> to vector<17x32xf32>
    %23 = arith.mulf %21, %22 : vector<17x32xf32>
    %24 = vector.broadcast %3 : vector<1x32xf32> to vector<17x32xf32>
    %25 = arith.addf %23, %24 : vector<17x32xf32>
    %c0_10 = arith.constant 0 : index
    %c0_11 = arith.constant 0 : index
    %26 = memref.load %arg6[%c0_10, %c0_11] : memref<1x1xf32, #tpu.memory_space<smem>>
    %c0_12 = arith.constant 0 : index
    %c0_13 = arith.constant 0 : index
    %c0_14 = arith.constant 0 : index
    %c0_15 = arith.constant 0 : index
    %27 = vector.load %arg4[%c0_12, %c0_13, %c0_14, %c0_15] : memref<5x4x32x8xf32, #tpu.memory_space<vmem>>, vector<1x1x32x8xf32>
    %28 = vector.shape_cast %27 : vector<1x1x32x8xf32> to vector<32x8xf32>
    %cst_16 = arith.constant dense<0.000000e+00> : vector<17x8xf32>
    %29 = tpu.matmul %25, %28, %cst_16 {dimension_numbers = #tpu.dot_dimension_numbers<[1], [0], [0], [1], [0, 0, 1, 1], [], []>} : vector<17x32xf32>, vector<32x8xf32>, vector<17x8xf32> -> vector<17x8xf32>
    %c0_17 = arith.constant 0 : index
    %c0_18 = arith.constant 0 : index
    %c0_19 = arith.constant 0 : index
    %c0_20 = arith.constant 0 : index
    %30 = vector.load %arg5[%c0_17, %c0_18, %c0_19, %c0_20] : memref<5x4x1x8xf32, #tpu.memory_space<vmem>>, vector<1x1x1x8xf32>
    %31 = vector.shape_cast %30 : vector<1x1x1x8xf32> to vector<1x8xf32>
    %32 = vector.broadcast %31 : vector<1x8xf32> to vector<17x8xf32>
    %33 = arith.addf %29, %32 : vector<17x8xf32>
    %c1 = arith.constant 1 : index
    %c0_21 = arith.constant 0 : index
    %c0_22 = arith.constant 0 : index
    %c0_23 = arith.constant 0 : index
    %34 = vector.load %arg4[%c1, %c0_21, %c0_22, %c0_23] : memref<5x4x32x8xf32, #tpu.memory_space<vmem>>, vector<1x1x32x8xf32>
    %35 = vector.shape_cast %34 : vector<1x1x32x8xf32> to vector<32x8xf32>
    %cst_24 = arith.constant dense<0.000000e+00> : vector<17x8xf32>
    %36 = tpu.matmul %25, %35, %cst_24 {dimension_numbers = #tpu.dot_dimension_numbers<[1], [0], [0], [1], [0, 0, 1, 1], [], []>} : vector<17x32xf32>, vector<32x8xf32>, vector<17x8xf32> -> vector<17x8xf32>
    %c1_25 = arith.constant 1 : index
    %c0_26 = arith.constant 0 : index
    %c0_27 = arith.constant 0 : index
    %c0_28 = arith.constant 0 : index
    %37 = vector.load %arg5[%c1_25, %c0_26, %c0_27, %c0_28] : memref<5x4x1x8xf32, #tpu.memory_space<vmem>>, vector<1x1x1x8xf32>
    %38 = vector.shape_cast %37 : vector<1x1x1x8xf32> to vector<1x8xf32>
    %39 = vector.broadcast %38 : vector<1x8xf32> to vector<17x8xf32>
    %40 = arith.addf %36, %39 : vector<17x8xf32>
    %c2 = arith.constant 2 : index
    %c0_29 = arith.constant 0 : index
    %c0_30 = arith.constant 0 : index
    %c0_31 = arith.constant 0 : index
    %41 = vector.load %arg4[%c2, %c0_29, %c0_30, %c0_31] : memref<5x4x32x8xf32, #tpu.memory_space<vmem>>, vector<1x1x32x8xf32>
    %42 = vector.shape_cast %41 : vector<1x1x32x8xf32> to vector<32x8xf32>
    %cst_32 = arith.constant dense<0.000000e+00> : vector<17x8xf32>
    %43 = tpu.matmul %25, %42, %cst_32 {dimension_numbers = #tpu.dot_dimension_numbers<[1], [0], [0], [1], [0, 0, 1, 1], [], []>} : vector<17x32xf32>, vector<32x8xf32>, vector<17x8xf32> -> vector<17x8xf32>
    %c2_33 = arith.constant 2 : index
    %c0_34 = arith.constant 0 : index
    %c0_35 = arith.constant 0 : index
    %c0_36 = arith.constant 0 : index
    %44 = vector.load %arg5[%c2_33, %c0_34, %c0_35, %c0_36] : memref<5x4x1x8xf32, #tpu.memory_space<vmem>>, vector<1x1x1x8xf32>
    %45 = vector.shape_cast %44 : vector<1x1x1x8xf32> to vector<1x8xf32>
    %46 = vector.broadcast %45 : vector<1x8xf32> to vector<17x8xf32>
    %47 = arith.addf %43, %46 : vector<17x8xf32>
    %c3 = arith.constant 3 : index
    %c0_37 = arith.constant 0 : index
    %c0_38 = arith.constant 0 : index
    %c0_39 = arith.constant 0 : index
    %48 = vector.load %arg4[%c3, %c0_37, %c0_38, %c0_39] : memref<5x4x32x8xf32, #tpu.memory_space<vmem>>, vector<1x1x32x8xf32>
    %49 = vector.shape_cast %48 : vector<1x1x32x8xf32> to vector<32x8xf32>
    %cst_40 = arith.constant dense<0.000000e+00> : vector<17x8xf32>
    %50 = tpu.matmul %25, %49, %cst_40 {dimension_numbers = #tpu.dot_dimension_numbers<[1], [0], [0], [1], [0, 0, 1, 1], [], []>} : vector<17x32xf32>, vector<32x8xf32>, vector<17x8xf32> -> vector<17x8xf32>
    %c3_41 = arith.constant 3 : index
    %c0_42 = arith.constant 0 : index
    %c0_43 = arith.constant 0 : index
    %c0_44 = arith.constant 0 : index
    %51 = vector.load %arg5[%c3_41, %c0_42, %c0_43, %c0_44] : memref<5x4x1x8xf32, #tpu.memory_space<vmem>>, vector<1x1x1x8xf32>
    %52 = vector.shape_cast %51 : vector<1x1x1x8xf32> to vector<1x8xf32>
    %53 = vector.broadcast %52 : vector<1x8xf32> to vector<17x8xf32>
    %54 = arith.addf %50, %53 : vector<17x8xf32>
    %c4 = arith.constant 4 : index
    %c0_45 = arith.constant 0 : index
    %c0_46 = arith.constant 0 : index
    %c0_47 = arith.constant 0 : index
    %55 = vector.load %arg4[%c4, %c0_45, %c0_46, %c0_47] : memref<5x4x32x8xf32, #tpu.memory_space<vmem>>, vector<1x1x32x8xf32>
    %56 = vector.shape_cast %55 : vector<1x1x32x8xf32> to vector<32x8xf32>
    %cst_48 = arith.constant dense<0.000000e+00> : vector<17x8xf32>
    %57 = tpu.matmul %25, %56, %cst_48 {dimension_numbers = #tpu.dot_dimension_numbers<[1], [0], [0], [1], [0, 0, 1, 1], [], []>} : vector<17x32xf32>, vector<32x8xf32>, vector<17x8xf32> -> vector<17x8xf32>
    %c4_49 = arith.constant 4 : index
    %c0_50 = arith.constant 0 : index
    %c0_51 = arith.constant 0 : index
    %c0_52 = arith.constant 0 : index
    %58 = vector.load %arg5[%c4_49, %c0_50, %c0_51, %c0_52] : memref<5x4x1x8xf32, #tpu.memory_space<vmem>>, vector<1x1x1x8xf32>
    %59 = vector.shape_cast %58 : vector<1x1x1x8xf32> to vector<1x8xf32>
    %60 = vector.broadcast %59 : vector<1x8xf32> to vector<17x8xf32>
    %61 = arith.addf %57, %60 : vector<17x8xf32>
    %cst_53 = arith.constant dense<0.000000e+00> : vector<17x17xf32>
    %62 = tpu.matmul %33, %47, %cst_53 {dimension_numbers = #tpu.dot_dimension_numbers<[1], [1], [0], [0], [0, 0, 1, 0], [], []>} : vector<17x8xf32>, vector<17x8xf32>, vector<17x17xf32> -> vector<17x17xf32>
    %cst_54 = arith.constant 0.353553385 : f32
    %63 = vector.broadcast %cst_54 : f32 to vector<17x17xf32>
    %64 = arith.mulf %62, %63 : vector<17x17xf32>
    %cst_55 = arith.constant dense<0.000000e+00> : vector<17x17xf32>
    %65 = tpu.matmul %40, %54, %cst_55 {dimension_numbers = #tpu.dot_dimension_numbers<[1], [1], [0], [0], [0, 0, 1, 0], [], []>} : vector<17x8xf32>, vector<17x8xf32>, vector<17x17xf32> -> vector<17x17xf32>
    %cst_56 = arith.constant 0.353553385 : f32
    %66 = vector.broadcast %cst_56 : f32 to vector<17x17xf32>
    %67 = arith.mulf %65, %66 : vector<17x17xf32>
    %cst_57 = arith.constant dense<0xFF800000> : vector<17xf32>
    %68 = vector.multi_reduction <maximumf>, %64, %cst_57 [1] : vector<17x17xf32> to vector<17xf32>
    %69 = vector.shape_cast %68 : vector<17xf32> to vector<17x1xf32>
    %70 = vector.broadcast %69 : vector<17x1xf32> to vector<17x17xf32>
    %71 = arith.subf %64, %70 : vector<17x17xf32>
    %72 = math.exp %71 : vector<17x17xf32>
    %cst_58 = arith.constant dense<0.000000e+00> : vector<17xf32>
    %73 = vector.multi_reduction <add>, %72, %cst_58 [1] : vector<17x17xf32> to vector<17xf32>
    %74 = vector.shape_cast %73 : vector<17xf32> to vector<17x1xf32>
    %75 = vector.broadcast %74 : vector<17x1xf32> to vector<17x17xf32>
    %76 = arith.divf %72, %75 : vector<17x17xf32>
    %cst_59 = arith.constant dense<0xFF800000> : vector<17xf32>
    %77 = vector.multi_reduction <maximumf>, %67, %cst_59 [1] : vector<17x17xf32> to vector<17xf32>
    %78 = vector.shape_cast %77 : vector<17xf32> to vector<17x1xf32>
    %79 = vector.broadcast %78 : vector<17x1xf32> to vector<17x17xf32>
    %80 = arith.subf %67, %79 : vector<17x17xf32>
    %81 = math.exp %80 : vector<17x17xf32>
    %cst_60 = arith.constant dense<0.000000e+00> : vector<17xf32>
    %82 = vector.multi_reduction <add>, %81, %cst_60 [1] : vector<17x17xf32> to vector<17xf32>
    %83 = vector.shape_cast %82 : vector<17xf32> to vector<17x1xf32>
    %84 = vector.broadcast %83 : vector<17x1xf32> to vector<17x17xf32>
    %85 = arith.divf %81, %84 : vector<17x17xf32>
    %86 = vector.broadcast %26 : f32 to vector<17x17xf32>
    %87 = arith.mulf %86, %85 : vector<17x17xf32>
    %88 = arith.subf %76, %87 : vector<17x17xf32>
    %cst_61 = arith.constant dense<0.000000e+00> : vector<17x8xf32>
    %89 = tpu.matmul %88, %61, %cst_61 {dimension_numbers = #tpu.dot_dimension_numbers<[1], [0], [0], [1], [0, 0, 1, 1], [], []>} : vector<17x17xf32>, vector<17x8xf32>, vector<17x8xf32> -> vector<17x8xf32>
    %cst_62 = arith.constant dense<0.000000e+00> : vector<17xf32>
    %90 = vector.multi_reduction <add>, %89, %cst_62 [1] : vector<17x8xf32> to vector<17xf32>
    %91 = vector.shape_cast %90 : vector<17xf32> to vector<17x1xf32>
    %cst_63 = arith.constant dense<0.000000e+00> : vector<1xf32>
    %92 = vector.multi_reduction <add>, %91, %cst_63 [0] : vector<17x1xf32> to vector<1xf32>
    %93 = vector.shape_cast %92 : vector<1xf32> to vector<1x1xf32>
    %cst_64 = arith.constant 1.360000e+02 : f32
    %94 = vector.broadcast %cst_64 : f32 to vector<1x1xf32>
    %95 = arith.divf %93, %94 : vector<1x1xf32>
    %96 = vector.broadcast %95 : vector<1x1xf32> to vector<17x8xf32>
    %97 = arith.subf %89, %96 : vector<17x8xf32>
    %98 = arith.mulf %97, %97 : vector<17x8xf32>
    %cst_65 = arith.constant dense<0.000000e+00> : vector<17xf32>
    %99 = vector.multi_reduction <add>, %98, %cst_65 [1] : vector<17x8xf32> to vector<17xf32>
    %100 = vector.shape_cast %99 : vector<17xf32> to vector<17x1xf32>
    %cst_66 = arith.constant dense<0.000000e+00> : vector<1xf32>
    %101 = vector.multi_reduction <add>, %100, %cst_66 [0] : vector<17x1xf32> to vector<1xf32>
    %102 = vector.shape_cast %101 : vector<1xf32> to vector<1x1xf32>
    %cst_67 = arith.constant 1.360000e+02 : f32
    %103 = vector.broadcast %cst_67 : f32 to vector<1x1xf32>
    %104 = arith.divf %102, %103 : vector<1x1xf32>
    %105 = vector.broadcast %95 : vector<1x1xf32> to vector<17x8xf32>
    %106 = arith.subf %89, %105 : vector<17x8xf32>
    %cst_68 = arith.constant 9.99999974E-6 : f32
    %107 = vector.broadcast %cst_68 : f32 to vector<1x1xf32>
    %108 = arith.addf %104, %107 : vector<1x1xf32>
    %109 = math.rsqrt %108 : vector<1x1xf32>
    %110 = vector.broadcast %109 : vector<1x1xf32> to vector<17x8xf32>
    %111 = arith.mulf %106, %110 : vector<17x8xf32>
    %c0_69 = arith.constant 0 : index
    %c0_70 = arith.constant 0 : index
    %c0_71 = arith.constant 0 : index
    %112 = vector.load %arg7[%c0_69, %c0_70, %c0_71] : memref<4x1x8xf32, #tpu.memory_space<vmem>>, vector<1x1x8xf32>
    %113 = vector.shape_cast %112 : vector<1x1x8xf32> to vector<1x8xf32>
    %114 = vector.broadcast %113 : vector<1x8xf32> to vector<17x8xf32>
    %115 = arith.mulf %111, %114 : vector<17x8xf32>
    %c0_72 = arith.constant 0 : index
    %c0_73 = arith.constant 0 : index
    %c0_74 = arith.constant 0 : index
    %116 = vector.load %arg8[%c0_72, %c0_73, %c0_74] : memref<4x1x8xf32, #tpu.memory_space<vmem>>, vector<1x1x8xf32>
    %117 = vector.shape_cast %116 : vector<1x1x8xf32> to vector<1x8xf32>
    %118 = vector.broadcast %117 : vector<1x8xf32> to vector<17x8xf32>
    %119 = arith.addf %115, %118 : vector<17x8xf32>
    %c0_75 = arith.constant 0 : index
    %c0_76 = arith.constant 0 : index
    %c0_77 = arith.constant 0 : index
    %c0_78 = arith.constant 0 : index
    %120 = vector.load %arg9[%c0_75, %c0_76, %c0_77, %c0_78] : memref<1x4x17x8xf32, #tpu.memory_space<vmem>>, vector<1x1x17x8xf32>
    %121 = vector.shape_cast %120 : vector<1x1x17x8xf32> to vector<17x8xf32>
    %122 = vector.shape_cast %119 : vector<17x8xf32> to vector<1x1x17x8xf32>
    tpu.vector_store %arg9[%c0_75, %c0_76, %c0_77, %c0_78], %122 {strides = array<i32>} : memref<1x4x17x8xf32, #tpu.memory_space<vmem>>, vector<1x1x17x8xf32>,
    %c0_79 = arith.constant 0 : index
    %c1_80 = arith.constant 1 : index
    %c0_81 = arith.constant 0 : index
    %c0_82 = arith.constant 0 : index
    %123 = vector.load %arg4[%c0_79, %c1_80, %c0_81, %c0_82] : memref<5x4x32x8xf32, #tpu.memory_space<vmem>>, vector<1x1x32x8xf32>
    %124 = vector.shape_cast %123 : vector<1x1x32x8xf32> to vector<32x8xf32>
    %cst_83 = arith.constant dense<0.000000e+00> : vector<17x8xf32>
    %125 = tpu.matmul %25, %124, %cst_83 {dimension_numbers = #tpu.dot_dimension_numbers<[1], [0], [0], [1], [0, 0, 1, 1], [], []>} : vector<17x32xf32>, vector<32x8xf32>, vector<17x8xf32> -> vector<17x8xf32>
    %c0_84 = arith.constant 0 : index
    %c1_85 = arith.constant 1 : index
    %c0_86 = arith.constant 0 : index
    %c0_87 = arith.constant 0 : index
    %126 = vector.load %arg5[%c0_84, %c1_85, %c0_86, %c0_87] : memref<5x4x1x8xf32, #tpu.memory_space<vmem>>, vector<1x1x1x8xf32>
    %127 = vector.shape_cast %126 : vector<1x1x1x8xf32> to vector<1x8xf32>
    %128 = vector.broadcast %127 : vector<1x8xf32> to vector<17x8xf32>
    %129 = arith.addf %125, %128 : vector<17x8xf32>
    %c1_88 = arith.constant 1 : index
    %c1_89 = arith.constant 1 : index
    %c0_90 = arith.constant 0 : index
    %c0_91 = arith.constant 0 : index
    %130 = vector.load %arg4[%c1_88, %c1_89, %c0_90, %c0_91] : memref<5x4x32x8xf32, #tpu.memory_space<vmem>>, vector<1x1x32x8xf32>
    %131 = vector.shape_cast %130 : vector<1x1x32x8xf32> to vector<32x8xf32>
    %cst_92 = arith.constant dense<0.000000e+00> : vector<17x8xf32>
    %132 = tpu.matmul %25, %131, %cst_92 {dimension_numbers = #tpu.dot_dimension_numbers<[1], [0], [0], [1], [0, 0, 1, 1], [], []>} : vector<17x32xf32>, vector<32x8xf32>, vector<17x8xf32> -> vector<17x8xf32>
    %c1_93 = arith.constant 1 : index
    %c1_94 = arith.constant 1 : index
    %c0_95 = arith.constant 0 : index
    %c0_96 = arith.constant 0 : index
    %133 = vector.load %arg5[%c1_93, %c1_94, %c0_95, %c0_96] : memref<5x4x1x8xf32, #tpu.memory_space<vmem>>, vector<1x1x1x8xf32>
    %134 = vector.shape_cast %133 : vector<1x1x1x8xf32> to vector<1x8xf32>
    %135 = vector.broadcast %134 : vector<1x8xf32> to vector<17x8xf32>
    %136 = arith.addf %132, %135 : vector<17x8xf32>
    %c2_97 = arith.constant 2 : index
    %c1_98 = arith.constant 1 : index
    %c0_99 = arith.constant 0 : index
    %c0_100 = arith.constant 0 : index
    %137 = vector.load %arg4[%c2_97, %c1_98, %c0_99, %c0_100] : memref<5x4x32x8xf32, #tpu.memory_space<vmem>>, vector<1x1x32x8xf32>
    %138 = vector.shape_cast %137 : vector<1x1x32x8xf32> to vector<32x8xf32>
    %cst_101 = arith.constant dense<0.000000e+00> : vector<17x8xf32>
    %139 = tpu.matmul %25, %138, %cst_101 {dimension_numbers = #tpu.dot_dimension_numbers<[1], [0], [0], [1], [0, 0, 1, 1], [], []>} : vector<17x32xf32>, vector<32x8xf32>, vector<17x8xf32> -> vector<17x8xf32>
    %c2_102 = arith.constant 2 : index
    %c1_103 = arith.constant 1 : index
    %c0_104 = arith.constant 0 : index
    %c0_105 = arith.constant 0 : index
    %140 = vector.load %arg5[%c2_102, %c1_103, %c0_104, %c0_105] : memref<5x4x1x8xf32, #tpu.memory_space<vmem>>, vector<1x1x1x8xf32>
    %141 = vector.shape_cast %140 : vector<1x1x1x8xf32> to vector<1x8xf32>
    %142 = vector.broadcast %141 : vector<1x8xf32> to vector<17x8xf32>
    %143 = arith.addf %139, %142 : vector<17x8xf32>
    %c3_106 = arith.constant 3 : index
    %c1_107 = arith.constant 1 : index
    %c0_108 = arith.constant 0 : index
    %c0_109 = arith.constant 0 : index
    %144 = vector.load %arg4[%c3_106, %c1_107, %c0_108, %c0_109] : memref<5x4x32x8xf32, #tpu.memory_space<vmem>>, vector<1x1x32x8xf32>
    %145 = vector.shape_cast %144 : vector<1x1x32x8xf32> to vector<32x8xf32>
    %cst_110 = arith.constant dense<0.000000e+00> : vector<17x8xf32>
    %146 = tpu.matmul %25, %145, %cst_110 {dimension_numbers = #tpu.dot_dimension_numbers<[1], [0], [0], [1], [0, 0, 1, 1], [], []>} : vector<17x32xf32>, vector<32x8xf32>, vector<17x8xf32> -> vector<17x8xf32>
    %c3_111 = arith.constant 3 : index
    %c1_112 = arith.constant 1 : index
    %c0_113 = arith.constant 0 : index
    %c0_114 = arith.constant 0 : index
    %147 = vector.load %arg5[%c3_111, %c1_112, %c0_113, %c0_114] : memref<5x4x1x8xf32, #tpu.memory_space<vmem>>, vector<1x1x1x8xf32>
    %148 = vector.shape_cast %147 : vector<1x1x1x8xf32> to vector<1x8xf32>
    %149 = vector.broadcast %148 : vector<1x8xf32> to vector<17x8xf32>
    %150 = arith.addf %146, %149 : vector<17x8xf32>
    %c4_115 = arith.constant 4 : index
    %c1_116 = arith.constant 1 : index
    %c0_117 = arith.constant 0 : index
    %c0_118 = arith.constant 0 : index
    %151 = vector.load %arg4[%c4_115, %c1_116, %c0_117, %c0_118] : memref<5x4x32x8xf32, #tpu.memory_space<vmem>>, vector<1x1x32x8xf32>
    %152 = vector.shape_cast %151 : vector<1x1x32x8xf32> to vector<32x8xf32>
    %cst_119 = arith.constant dense<0.000000e+00> : vector<17x8xf32>
    %153 = tpu.matmul %25, %152, %cst_119 {dimension_numbers = #tpu.dot_dimension_numbers<[1], [0], [0], [1], [0, 0, 1, 1], [], []>} : vector<17x32xf32>, vector<32x8xf32>, vector<17x8xf32> -> vector<17x8xf32>
    %c4_120 = arith.constant 4 : index
    %c1_121 = arith.constant 1 : index
    %c0_122 = arith.constant 0 : index
    %c0_123 = arith.constant 0 : index
    %154 = vector.load %arg5[%c4_120, %c1_121, %c0_122, %c0_123] : memref<5x4x1x8xf32, #tpu.memory_space<vmem>>, vector<1x1x1x8xf32>
    %155 = vector.shape_cast %154 : vector<1x1x1x8xf32> to vector<1x8xf32>
    %156 = vector.broadcast %155 : vector<1x8xf32> to vector<17x8xf32>
    %157 = arith.addf %153, %156 : vector<17x8xf32>
    %cst_124 = arith.constant dense<0.000000e+00> : vector<17x17xf32>
    %158 = tpu.matmul %129, %143, %cst_124 {dimension_numbers = #tpu.dot_dimension_numbers<[1], [1], [0], [0], [0, 0, 1, 0], [], []>} : vector<17x8xf32>, vector<17x8xf32>, vector<17x17xf32> -> vector<17x17xf32>
    %cst_125 = arith.constant 0.353553385 : f32
    %159 = vector.broadcast %cst_125 : f32 to vector<17x17xf32>
    %160 = arith.mulf %158, %159 : vector<17x17xf32>
    %cst_126 = arith.constant dense<0.000000e+00> : vector<17x17xf32>
    %161 = tpu.matmul %136, %150, %cst_126 {dimension_numbers = #tpu.dot_dimension_numbers<[1], [1], [0], [0], [0, 0, 1, 0], [], []>} : vector<17x8xf32>, vector<17x8xf32>, vector<17x17xf32> -> vector<17x17xf32>
    %cst_127 = arith.constant 0.353553385 : f32
    %162 = vector.broadcast %cst_127 : f32 to vector<17x17xf32>
    %163 = arith.mulf %161, %162 : vector<17x17xf32>
    %cst_128 = arith.constant dense<0xFF800000> : vector<17xf32>
    %164 = vector.multi_reduction <maximumf>, %160, %cst_128 [1] : vector<17x17xf32> to vector<17xf32>
    %165 = vector.shape_cast %164 : vector<17xf32> to vector<17x1xf32>
    %166 = vector.broadcast %165 : vector<17x1xf32> to vector<17x17xf32>
    %167 = arith.subf %160, %166 : vector<17x17xf32>
    %168 = math.exp %167 : vector<17x17xf32>
    %cst_129 = arith.constant dense<0.000000e+00> : vector<17xf32>
    %169 = vector.multi_reduction <add>, %168, %cst_129 [1] : vector<17x17xf32> to vector<17xf32>
    %170 = vector.shape_cast %169 : vector<17xf32> to vector<17x1xf32>
    %171 = vector.broadcast %170 : vector<17x1xf32> to vector<17x17xf32>
    %172 = arith.divf %168, %171 : vector<17x17xf32>
    %cst_130 = arith.constant dense<0xFF800000> : vector<17xf32>
    %173 = vector.multi_reduction <maximumf>, %163, %cst_130 [1] : vector<17x17xf32> to vector<17xf32>
    %174 = vector.shape_cast %173 : vector<17xf32> to vector<17x1xf32>
    %175 = vector.broadcast %174 : vector<17x1xf32> to vector<17x17xf32>
    %176 = arith.subf %163, %175 : vector<17x17xf32>
    %177 = math.exp %176 : vector<17x17xf32>
    %cst_131 = arith.constant dense<0.000000e+00> : vector<17xf32>
    %178 = vector.multi_reduction <add>, %177, %cst_131 [1] : vector<17x17xf32> to vector<17xf32>
    %179 = vector.shape_cast %178 : vector<17xf32> to vector<17x1xf32>
    %180 = vector.broadcast %179 : vector<17x1xf32> to vector<17x17xf32>
    %181 = arith.divf %177, %180 : vector<17x17xf32>
    %182 = vector.broadcast %26 : f32 to vector<17x17xf32>
    %183 = arith.mulf %182, %181 : vector<17x17xf32>
    %184 = arith.subf %172, %183 : vector<17x17xf32>
    %cst_132 = arith.constant dense<0.000000e+00> : vector<17x8xf32>
    %185 = tpu.matmul %184, %157, %cst_132 {dimension_numbers = #tpu.dot_dimension_numbers<[1], [0], [0], [1], [0, 0, 1, 1], [], []>} : vector<17x17xf32>, vector<17x8xf32>, vector<17x8xf32> -> vector<17x8xf32>
    %cst_133 = arith.constant dense<0.000000e+00> : vector<17xf32>
    %186 = vector.multi_reduction <add>, %185, %cst_133 [1] : vector<17x8xf32> to vector<17xf32>
    %187 = vector.shape_cast %186 : vector<17xf32> to vector<17x1xf32>
    %cst_134 = arith.constant dense<0.000000e+00> : vector<1xf32>
    %188 = vector.multi_reduction <add>, %187, %cst_134 [0] : vector<17x1xf32> to vector<1xf32>
    %189 = vector.shape_cast %188 : vector<1xf32> to vector<1x1xf32>
    %cst_135 = arith.constant 1.360000e+02 : f32
    %190 = vector.broadcast %cst_135 : f32 to vector<1x1xf32>
    %191 = arith.divf %189, %190 : vector<1x1xf32>
    %192 = vector.broadcast %191 : vector<1x1xf32> to vector<17x8xf32>
    %193 = arith.subf %185, %192 : vector<17x8xf32>
    %194 = arith.mulf %193, %193 : vector<17x8xf32>
    %cst_136 = arith.constant dense<0.000000e+00> : vector<17xf32>
    %195 = vector.multi_reduction <add>, %194, %cst_136 [1] : vector<17x8xf32> to vector<17xf32>
    %196 = vector.shape_cast %195 : vector<17xf32> to vector<17x1xf32>
    %cst_137 = arith.constant dense<0.000000e+00> : vector<1xf32>
    %197 = vector.multi_reduction <add>, %196, %cst_137 [0] : vector<17x1xf32> to vector<1xf32>
    %198 = vector.shape_cast %197 : vector<1xf32> to vector<1x1xf32>
    %cst_138 = arith.constant 1.360000e+02 : f32
    %199 = vector.broadcast %cst_138 : f32 to vector<1x1xf32>
    %200 = arith.divf %198, %199 : vector<1x1xf32>
    %201 = vector.broadcast %191 : vector<1x1xf32> to vector<17x8xf32>
    %202 = arith.subf %185, %201 : vector<17x8xf32>
    %cst_139 = arith.constant 9.99999974E-6 : f32
    %203 = vector.broadcast %cst_139 : f32 to vector<1x1xf32>
    %204 = arith.addf %200, %203 : vector<1x1xf32>
    %205 = math.rsqrt %204 : vector<1x1xf32>
    %206 = vector.broadcast %205 : vector<1x1xf32> to vector<17x8xf32>
    %207 = arith.mulf %202, %206 : vector<17x8xf32>
    %c1_140 = arith.constant 1 : index
    %c0_141 = arith.constant 0 : index
    %c0_142 = arith.constant 0 : index
    %208 = vector.load %arg7[%c1_140, %c0_141, %c0_142] : memref<4x1x8xf32, #tpu.memory_space<vmem>>, vector<1x1x8xf32>
    %209 = vector.shape_cast %208 : vector<1x1x8xf32> to vector<1x8xf32>
    %210 = vector.broadcast %209 : vector<1x8xf32> to vector<17x8xf32>
    %211 = arith.mulf %207, %210 : vector<17x8xf32>
    %c1_143 = arith.constant 1 : index
    %c0_144 = arith.constant 0 : index
    %c0_145 = arith.constant 0 : index
    %212 = vector.load %arg8[%c1_143, %c0_144, %c0_145] : memref<4x1x8xf32, #tpu.memory_space<vmem>>, vector<1x1x8xf32>
    %213 = vector.shape_cast %212 : vector<1x1x8xf32> to vector<1x8xf32>
    %214 = vector.broadcast %213 : vector<1x8xf32> to vector<17x8xf32>
    %215 = arith.addf %211, %214 : vector<17x8xf32>
    %c0_146 = arith.constant 0 : index
    %c1_147 = arith.constant 1 : index
    %c0_148 = arith.constant 0 : index
    %c0_149 = arith.constant 0 : index
    %216 = vector.load %arg9[%c0_146, %c1_147, %c0_148, %c0_149] : memref<1x4x17x8xf32, #tpu.memory_space<vmem>>, vector<1x1x17x8xf32>
    %217 = vector.shape_cast %216 : vector<1x1x17x8xf32> to vector<17x8xf32>
    %218 = vector.shape_cast %215 : vector<17x8xf32> to vector<1x1x17x8xf32>
    tpu.vector_store %arg9[%c0_146, %c1_147, %c0_148, %c0_149], %218 {strides = array<i32>} : memref<1x4x17x8xf32, #tpu.memory_space<vmem>>, vector<1x1x17x8xf32>,
    %c0_150 = arith.constant 0 : index
    %c2_151 = arith.constant 2 : index
    %c0_152 = arith.constant 0 : index
    %c0_153 = arith.constant 0 : index
    %219 = vector.load %arg4[%c0_150, %c2_151, %c0_152, %c0_153] : memref<5x4x32x8xf32, #tpu.memory_space<vmem>>, vector<1x1x32x8xf32>
    %220 = vector.shape_cast %219 : vector<1x1x32x8xf32> to vector<32x8xf32>
    %cst_154 = arith.constant dense<0.000000e+00> : vector<17x8xf32>
    %221 = tpu.matmul %25, %220, %cst_154 {dimension_numbers = #tpu.dot_dimension_numbers<[1], [0], [0], [1], [0, 0, 1, 1], [], []>} : vector<17x32xf32>, vector<32x8xf32>, vector<17x8xf32> -> vector<17x8xf32>
    %c0_155 = arith.constant 0 : index
    %c2_156 = arith.constant 2 : index
    %c0_157 = arith.constant 0 : index
    %c0_158 = arith.constant 0 : index
    %222 = vector.load %arg5[%c0_155, %c2_156, %c0_157, %c0_158] : memref<5x4x1x8xf32, #tpu.memory_space<vmem>>, vector<1x1x1x8xf32>
    %223 = vector.shape_cast %222 : vector<1x1x1x8xf32> to vector<1x8xf32>
    %224 = vector.broadcast %223 : vector<1x8xf32> to vector<17x8xf32>
    %225 = arith.addf %221, %224 : vector<17x8xf32>
    %c1_159 = arith.constant 1 : index
    %c2_160 = arith.constant 2 : index
    %c0_161 = arith.constant 0 : index
    %c0_162 = arith.constant 0 : index
    %226 = vector.load %arg4[%c1_159, %c2_160, %c0_161, %c0_162] : memref<5x4x32x8xf32, #tpu.memory_space<vmem>>, vector<1x1x32x8xf32>
    %227 = vector.shape_cast %226 : vector<1x1x32x8xf32> to vector<32x8xf32>
    %cst_163 = arith.constant dense<0.000000e+00> : vector<17x8xf32>
    %228 = tpu.matmul %25, %227, %cst_163 {dimension_numbers = #tpu.dot_dimension_numbers<[1], [0], [0], [1], [0, 0, 1, 1], [], []>} : vector<17x32xf32>, vector<32x8xf32>, vector<17x8xf32> -> vector<17x8xf32>
    %c1_164 = arith.constant 1 : index
    %c2_165 = arith.constant 2 : index
    %c0_166 = arith.constant 0 : index
    %c0_167 = arith.constant 0 : index
    %229 = vector.load %arg5[%c1_164, %c2_165, %c0_166, %c0_167] : memref<5x4x1x8xf32, #tpu.memory_space<vmem>>, vector<1x1x1x8xf32>
    %230 = vector.shape_cast %229 : vector<1x1x1x8xf32> to vector<1x8xf32>
    %231 = vector.broadcast %230 : vector<1x8xf32> to vector<17x8xf32>
    %232 = arith.addf %228, %231 : vector<17x8xf32>
    %c2_168 = arith.constant 2 : index
    %c2_169 = arith.constant 2 : index
    %c0_170 = arith.constant 0 : index
    %c0_171 = arith.constant 0 : index
    %233 = vector.load %arg4[%c2_168, %c2_169, %c0_170, %c0_171] : memref<5x4x32x8xf32, #tpu.memory_space<vmem>>, vector<1x1x32x8xf32>
    %234 = vector.shape_cast %233 : vector<1x1x32x8xf32> to vector<32x8xf32>
    %cst_172 = arith.constant dense<0.000000e+00> : vector<17x8xf32>
    %235 = tpu.matmul %25, %234, %cst_172 {dimension_numbers = #tpu.dot_dimension_numbers<[1], [0], [0], [1], [0, 0, 1, 1], [], []>} : vector<17x32xf32>, vector<32x8xf32>, vector<17x8xf32> -> vector<17x8xf32>
    %c2_173 = arith.constant 2 : index
    %c2_174 = arith.constant 2 : index
    %c0_175 = arith.constant 0 : index
    %c0_176 = arith.constant 0 : index
    %236 = vector.load %arg5[%c2_173, %c2_174, %c0_175, %c0_176] : memref<5x4x1x8xf32, #tpu.memory_space<vmem>>, vector<1x1x1x8xf32>
    %237 = vector.shape_cast %236 : vector<1x1x1x8xf32> to vector<1x8xf32>
    %238 = vector.broadcast %237 : vector<1x8xf32> to vector<17x8xf32>
    %239 = arith.addf %235, %238 : vector<17x8xf32>
    %c3_177 = arith.constant 3 : index
    %c2_178 = arith.constant 2 : index
    %c0_179 = arith.constant 0 : index
    %c0_180 = arith.constant 0 : index
    %240 = vector.load %arg4[%c3_177, %c2_178, %c0_179, %c0_180] : memref<5x4x32x8xf32, #tpu.memory_space<vmem>>, vector<1x1x32x8xf32>
    %241 = vector.shape_cast %240 : vector<1x1x32x8xf32> to vector<32x8xf32>
    %cst_181 = arith.constant dense<0.000000e+00> : vector<17x8xf32>
    %242 = tpu.matmul %25, %241, %cst_181 {dimension_numbers = #tpu.dot_dimension_numbers<[1], [0], [0], [1], [0, 0, 1, 1], [], []>} : vector<17x32xf32>, vector<32x8xf32>, vector<17x8xf32> -> vector<17x8xf32>
    %c3_182 = arith.constant 3 : index
    %c2_183 = arith.constant 2 : index
    %c0_184 = arith.constant 0 : index
    %c0_185 = arith.constant 0 : index
    %243 = vector.load %arg5[%c3_182, %c2_183, %c0_184, %c0_185] : memref<5x4x1x8xf32, #tpu.memory_space<vmem>>, vector<1x1x1x8xf32>
    %244 = vector.shape_cast %243 : vector<1x1x1x8xf32> to vector<1x8xf32>
    %245 = vector.broadcast %244 : vector<1x8xf32> to vector<17x8xf32>
    %246 = arith.addf %242, %245 : vector<17x8xf32>
    %c4_186 = arith.constant 4 : index
    %c2_187 = arith.constant 2 : index
    %c0_188 = arith.constant 0 : index
    %c0_189 = arith.constant 0 : index
    %247 = vector.load %arg4[%c4_186, %c2_187, %c0_188, %c0_189] : memref<5x4x32x8xf32, #tpu.memory_space<vmem>>, vector<1x1x32x8xf32>
    %248 = vector.shape_cast %247 : vector<1x1x32x8xf32> to vector<32x8xf32>
    %cst_190 = arith.constant dense<0.000000e+00> : vector<17x8xf32>
    %249 = tpu.matmul %25, %248, %cst_190 {dimension_numbers = #tpu.dot_dimension_numbers<[1], [0], [0], [1], [0, 0, 1, 1], [], []>} : vector<17x32xf32>, vector<32x8xf32>, vector<17x8xf32> -> vector<17x8xf32>
    %c4_191 = arith.constant 4 : index
    %c2_192 = arith.constant 2 : index
    %c0_193 = arith.constant 0 : index
    %c0_194 = arith.constant 0 : index
    %250 = vector.load %arg5[%c4_191, %c2_192, %c0_193, %c0_194] : memref<5x4x1x8xf32, #tpu.memory_space<vmem>>, vector<1x1x1x8xf32>
    %251 = vector.shape_cast %250 : vector<1x1x1x8xf32> to vector<1x8xf32>
    %252 = vector.broadcast %251 : vector<1x8xf32> to vector<17x8xf32>
    %253 = arith.addf %249, %252 : vector<17x8xf32>
    %cst_195 = arith.constant dense<0.000000e+00> : vector<17x17xf32>
    %254 = tpu.matmul %225, %239, %cst_195 {dimension_numbers = #tpu.dot_dimension_numbers<[1], [1], [0], [0], [0, 0, 1, 0], [], []>} : vector<17x8xf32>, vector<17x8xf32>, vector<17x17xf32> -> vector<17x17xf32>
    %cst_196 = arith.constant 0.353553385 : f32
    %255 = vector.broadcast %cst_196 : f32 to vector<17x17xf32>
    %256 = arith.mulf %254, %255 : vector<17x17xf32>
    %cst_197 = arith.constant dense<0.000000e+00> : vector<17x17xf32>
    %257 = tpu.matmul %232, %246, %cst_197 {dimension_numbers = #tpu.dot_dimension_numbers<[1], [1], [0], [0], [0, 0, 1, 0], [], []>} : vector<17x8xf32>, vector<17x8xf32>, vector<17x17xf32> -> vector<17x17xf32>
    %cst_198 = arith.constant 0.353553385 : f32
    %258 = vector.broadcast %cst_198 : f32 to vector<17x17xf32>
    %259 = arith.mulf %257, %258 : vector<17x17xf32>
    %cst_199 = arith.constant dense<0xFF800000> : vector<17xf32>
    %260 = vector.multi_reduction <maximumf>, %256, %cst_199 [1] : vector<17x17xf32> to vector<17xf32>
    %261 = vector.shape_cast %260 : vector<17xf32> to vector<17x1xf32>
    %262 = vector.broadcast %261 : vector<17x1xf32> to vector<17x17xf32>
    %263 = arith.subf %256, %262 : vector<17x17xf32>
    %264 = math.exp %263 : vector<17x17xf32>
    %cst_200 = arith.constant dense<0.000000e+00> : vector<17xf32>
    %265 = vector.multi_reduction <add>, %264, %cst_200 [1] : vector<17x17xf32> to vector<17xf32>
    %266 = vector.shape_cast %265 : vector<17xf32> to vector<17x1xf32>
    %267 = vector.broadcast %266 : vector<17x1xf32> to vector<17x17xf32>
    %268 = arith.divf %264, %267 : vector<17x17xf32>
    %cst_201 = arith.constant dense<0xFF800000> : vector<17xf32>
    %269 = vector.multi_reduction <maximumf>, %259, %cst_201 [1] : vector<17x17xf32> to vector<17xf32>
    %270 = vector.shape_cast %269 : vector<17xf32> to vector<17x1xf32>
    %271 = vector.broadcast %270 : vector<17x1xf32> to vector<17x17xf32>
    %272 = arith.subf %259, %271 : vector<17x17xf32>
    %273 = math.exp %272 : vector<17x17xf32>
    %cst_202 = arith.constant dense<0.000000e+00> : vector<17xf32>
    %274 = vector.multi_reduction <add>, %273, %cst_202 [1] : vector<17x17xf32> to vector<17xf32>
    %275 = vector.shape_cast %274 : vector<17xf32> to vector<17x1xf32>
    %276 = vector.broadcast %275 : vector<17x1xf32> to vector<17x17xf32>
    %277 = arith.divf %273, %276 : vector<17x17xf32>
    %278 = vector.broadcast %26 : f32 to vector<17x17xf32>
    %279 = arith.mulf %278, %277 : vector<17x17xf32>
    %280 = arith.subf %268, %279 : vector<17x17xf32>
    %cst_203 = arith.constant dense<0.000000e+00> : vector<17x8xf32>
    %281 = tpu.matmul %280, %253, %cst_203 {dimension_numbers = #tpu.dot_dimension_numbers<[1], [0], [0], [1], [0, 0, 1, 1], [], []>} : vector<17x17xf32>, vector<17x8xf32>, vector<17x8xf32> -> vector<17x8xf32>
    %cst_204 = arith.constant dense<0.000000e+00> : vector<17xf32>
    %282 = vector.multi_reduction <add>, %281, %cst_204 [1] : vector<17x8xf32> to vector<17xf32>
    %283 = vector.shape_cast %282 : vector<17xf32> to vector<17x1xf32>
    %cst_205 = arith.constant dense<0.000000e+00> : vector<1xf32>
    %284 = vector.multi_reduction <add>, %283, %cst_205 [0] : vector<17x1xf32> to vector<1xf32>
    %285 = vector.shape_cast %284 : vector<1xf32> to vector<1x1xf32>
    %cst_206 = arith.constant 1.360000e+02 : f32
    %286 = vector.broadcast %cst_206 : f32 to vector<1x1xf32>
    %287 = arith.divf %285, %286 : vector<1x1xf32>
    %288 = vector.broadcast %287 : vector<1x1xf32> to vector<17x8xf32>
    %289 = arith.subf %281, %288 : vector<17x8xf32>
    %290 = arith.mulf %289, %289 : vector<17x8xf32>
    %cst_207 = arith.constant dense<0.000000e+00> : vector<17xf32>
    %291 = vector.multi_reduction <add>, %290, %cst_207 [1] : vector<17x8xf32> to vector<17xf32>
    %292 = vector.shape_cast %291 : vector<17xf32> to vector<17x1xf32>
    %cst_208 = arith.constant dense<0.000000e+00> : vector<1xf32>
    %293 = vector.multi_reduction <add>, %292, %cst_208 [0] : vector<17x1xf32> to vector<1xf32>
    %294 = vector.shape_cast %293 : vector<1xf32> to vector<1x1xf32>
    %cst_209 = arith.constant 1.360000e+02 : f32
    %295 = vector.broadcast %cst_209 : f32 to vector<1x1xf32>
    %296 = arith.divf %294, %295 : vector<1x1xf32>
    %297 = vector.broadcast %287 : vector<1x1xf32> to vector<17x8xf32>
    %298 = arith.subf %281, %297 : vector<17x8xf32>
    %cst_210 = arith.constant 9.99999974E-6 : f32
    %299 = vector.broadcast %cst_210 : f32 to vector<1x1xf32>
    %300 = arith.addf %296, %299 : vector<1x1xf32>
    %301 = math.rsqrt %300 : vector<1x1xf32>
    %302 = vector.broadcast %301 : vector<1x1xf32> to vector<17x8xf32>
    %303 = arith.mulf %298, %302 : vector<17x8xf32>
    %c2_211 = arith.constant 2 : index
    %c0_212 = arith.constant 0 : index
    %c0_213 = arith.constant 0 : index
    %304 = vector.load %arg7[%c2_211, %c0_212, %c0_213] : memref<4x1x8xf32, #tpu.memory_space<vmem>>, vector<1x1x8xf32>
    %305 = vector.shape_cast %304 : vector<1x1x8xf32> to vector<1x8xf32>
    %306 = vector.broadcast %305 : vector<1x8xf32> to vector<17x8xf32>
    %307 = arith.mulf %303, %306 : vector<17x8xf32>
    %c2_214 = arith.constant 2 : index
    %c0_215 = arith.constant 0 : index
    %c0_216 = arith.constant 0 : index
    %308 = vector.load %arg8[%c2_214, %c0_215, %c0_216] : memref<4x1x8xf32, #tpu.memory_space<vmem>>, vector<1x1x8xf32>
    %309 = vector.shape_cast %308 : vector<1x1x8xf32> to vector<1x8xf32>
    %310 = vector.broadcast %309 : vector<1x8xf32> to vector<17x8xf32>
    %311 = arith.addf %307, %310 : vector<17x8xf32>
    %c0_217 = arith.constant 0 : index
    %c2_218 = arith.constant 2 : index
    %c0_219 = arith.constant 0 : index
    %c0_220 = arith.constant 0 : index
    %312 = vector.load %arg9[%c0_217, %c2_218, %c0_219, %c0_220] : memref<1x4x17x8xf32, #tpu.memory_space<vmem>>, vector<1x1x17x8xf32>
    %313 = vector.shape_cast %312 : vector<1x1x17x8xf32> to vector<17x8xf32>
    %314 = vector.shape_cast %311 : vector<17x8xf32> to vector<1x1x17x8xf32>
    tpu.vector_store %arg9[%c0_217, %c2_218, %c0_219, %c0_220], %314 {strides = array<i32>} : memref<1x4x17x8xf32, #tpu.memory_space<vmem>>, vector<1x1x17x8xf32>,
    %c0_221 = arith.constant 0 : index
    %c3_222 = arith.constant 3 : index
    %c0_223 = arith.constant 0 : index
    %c0_224 = arith.constant 0 : index
    %315 = vector.load %arg4[%c0_221, %c3_222, %c0_223, %c0_224] : memref<5x4x32x8xf32, #tpu.memory_space<vmem>>, vector<1x1x32x8xf32>
    %316 = vector.shape_cast %315 : vector<1x1x32x8xf32> to vector<32x8xf32>
    %cst_225 = arith.constant dense<0.000000e+00> : vector<17x8xf32>
    %317 = tpu.matmul %25, %316, %cst_225 {dimension_numbers = #tpu.dot_dimension_numbers<[1], [0], [0], [1], [0, 0, 1, 1], [], []>} : vector<17x32xf32>, vector<32x8xf32>, vector<17x8xf32> -> vector<17x8xf32>
    %c0_226 = arith.constant 0 : index
    %c3_227 = arith.constant 3 : index
    %c0_228 = arith.constant 0 : index
    %c0_229 = arith.constant 0 : index
    %318 = vector.load %arg5[%c0_226, %c3_227, %c0_228, %c0_229] : memref<5x4x1x8xf32, #tpu.memory_space<vmem>>, vector<1x1x1x8xf32>
    %319 = vector.shape_cast %318 : vector<1x1x1x8xf32> to vector<1x8xf32>
    %320 = vector.broadcast %319 : vector<1x8xf32> to vector<17x8xf32>
    %321 = arith.addf %317, %320 : vector<17x8xf32>
    %c1_230 = arith.constant 1 : index
    %c3_231 = arith.constant 3 : index
    %c0_232 = arith.constant 0 : index
    %c0_233 = arith.constant 0 : index
    %322 = vector.load %arg4[%c1_230, %c3_231, %c0_232, %c0_233] : memref<5x4x32x8xf32, #tpu.memory_space<vmem>>, vector<1x1x32x8xf32>
    %323 = vector.shape_cast %322 : vector<1x1x32x8xf32> to vector<32x8xf32>
    %cst_234 = arith.constant dense<0.000000e+00> : vector<17x8xf32>
    %324 = tpu.matmul %25, %323, %cst_234 {dimension_numbers = #tpu.dot_dimension_numbers<[1], [0], [0], [1], [0, 0, 1, 1], [], []>} : vector<17x32xf32>, vector<32x8xf32>, vector<17x8xf32> -> vector<17x8xf32>
    %c1_235 = arith.constant 1 : index
    %c3_236 = arith.constant 3 : index
    %c0_237 = arith.constant 0 : index
    %c0_238 = arith.constant 0 : index
    %325 = vector.load %arg5[%c1_235, %c3_236, %c0_237, %c0_238] : memref<5x4x1x8xf32, #tpu.memory_space<vmem>>, vector<1x1x1x8xf32>
    %326 = vector.shape_cast %325 : vector<1x1x1x8xf32> to vector<1x8xf32>
    %327 = vector.broadcast %326 : vector<1x8xf32> to vector<17x8xf32>
    %328 = arith.addf %324, %327 : vector<17x8xf32>
    %c2_239 = arith.constant 2 : index
    %c3_240 = arith.constant 3 : index
    %c0_241 = arith.constant 0 : index
    %c0_242 = arith.constant 0 : index
    %329 = vector.load %arg4[%c2_239, %c3_240, %c0_241, %c0_242] : memref<5x4x32x8xf32, #tpu.memory_space<vmem>>, vector<1x1x32x8xf32>
    %330 = vector.shape_cast %329 : vector<1x1x32x8xf32> to vector<32x8xf32>
    %cst_243 = arith.constant dense<0.000000e+00> : vector<17x8xf32>
    %331 = tpu.matmul %25, %330, %cst_243 {dimension_numbers = #tpu.dot_dimension_numbers<[1], [0], [0], [1], [0, 0, 1, 1], [], []>} : vector<17x32xf32>, vector<32x8xf32>, vector<17x8xf32> -> vector<17x8xf32>
    %c2_244 = arith.constant 2 : index
    %c3_245 = arith.constant 3 : index
    %c0_246 = arith.constant 0 : index
    %c0_247 = arith.constant 0 : index
    %332 = vector.load %arg5[%c2_244, %c3_245, %c0_246, %c0_247] : memref<5x4x1x8xf32, #tpu.memory_space<vmem>>, vector<1x1x1x8xf32>
    %333 = vector.shape_cast %332 : vector<1x1x1x8xf32> to vector<1x8xf32>
    %334 = vector.broadcast %333 : vector<1x8xf32> to vector<17x8xf32>
    %335 = arith.addf %331, %334 : vector<17x8xf32>
    %c3_248 = arith.constant 3 : index
    %c3_249 = arith.constant 3 : index
    %c0_250 = arith.constant 0 : index
    %c0_251 = arith.constant 0 : index
    %336 = vector.load %arg4[%c3_248, %c3_249, %c0_250, %c0_251] : memref<5x4x32x8xf32, #tpu.memory_space<vmem>>, vector<1x1x32x8xf32>
    %337 = vector.shape_cast %336 : vector<1x1x32x8xf32> to vector<32x8xf32>
    %cst_252 = arith.constant dense<0.000000e+00> : vector<17x8xf32>
    %338 = tpu.matmul %25, %337, %cst_252 {dimension_numbers = #tpu.dot_dimension_numbers<[1], [0], [0], [1], [0, 0, 1, 1], [], []>} : vector<17x32xf32>, vector<32x8xf32>, vector<17x8xf32> -> vector<17x8xf32>
    %c3_253 = arith.constant 3 : index
    %c3_254 = arith.constant 3 : index
    %c0_255 = arith.constant 0 : index
    %c0_256 = arith.constant 0 : index
    %339 = vector.load %arg5[%c3_253, %c3_254, %c0_255, %c0_256] : memref<5x4x1x8xf32, #tpu.memory_space<vmem>>, vector<1x1x1x8xf32>
    %340 = vector.shape_cast %339 : vector<1x1x1x8xf32> to vector<1x8xf32>
    %341 = vector.broadcast %340 : vector<1x8xf32> to vector<17x8xf32>
    %342 = arith.addf %338, %341 : vector<17x8xf32>
    %c4_257 = arith.constant 4 : index
    %c3_258 = arith.constant 3 : index
    %c0_259 = arith.constant 0 : index
    %c0_260 = arith.constant 0 : index
    %343 = vector.load %arg4[%c4_257, %c3_258, %c0_259, %c0_260] : memref<5x4x32x8xf32, #tpu.memory_space<vmem>>, vector<1x1x32x8xf32>
    %344 = vector.shape_cast %343 : vector<1x1x32x8xf32> to vector<32x8xf32>
    %cst_261 = arith.constant dense<0.000000e+00> : vector<17x8xf32>
    %345 = tpu.matmul %25, %344, %cst_261 {dimension_numbers = #tpu.dot_dimension_numbers<[1], [0], [0], [1], [0, 0, 1, 1], [], []>} : vector<17x32xf32>, vector<32x8xf32>, vector<17x8xf32> -> vector<17x8xf32>
    %c4_262 = arith.constant 4 : index
    %c3_263 = arith.constant 3 : index
    %c0_264 = arith.constant 0 : index
    %c0_265 = arith.constant 0 : index
    %346 = vector.load %arg5[%c4_262, %c3_263, %c0_264, %c0_265] : memref<5x4x1x8xf32, #tpu.memory_space<vmem>>, vector<1x1x1x8xf32>
    %347 = vector.shape_cast %346 : vector<1x1x1x8xf32> to vector<1x8xf32>
    %348 = vector.broadcast %347 : vector<1x8xf32> to vector<17x8xf32>
    %349 = arith.addf %345, %348 : vector<17x8xf32>
    %cst_266 = arith.constant dense<0.000000e+00> : vector<17x17xf32>
    %350 = tpu.matmul %321, %335, %cst_266 {dimension_numbers = #tpu.dot_dimension_numbers<[1], [1], [0], [0], [0, 0, 1, 0], [], []>} : vector<17x8xf32>, vector<17x8xf32>, vector<17x17xf32> -> vector<17x17xf32>
    %cst_267 = arith.constant 0.353553385 : f32
    %351 = vector.broadcast %cst_267 : f32 to vector<17x17xf32>
    %352 = arith.mulf %350, %351 : vector<17x17xf32>
    %cst_268 = arith.constant dense<0.000000e+00> : vector<17x17xf32>
    %353 = tpu.matmul %328, %342, %cst_268 {dimension_numbers = #tpu.dot_dimension_numbers<[1], [1], [0], [0], [0, 0, 1, 0], [], []>} : vector<17x8xf32>, vector<17x8xf32>, vector<17x17xf32> -> vector<17x17xf32>
    %cst_269 = arith.constant 0.353553385 : f32
    %354 = vector.broadcast %cst_269 : f32 to vector<17x17xf32>
    %355 = arith.mulf %353, %354 : vector<17x17xf32>
    %cst_270 = arith.constant dense<0xFF800000> : vector<17xf32>
    %356 = vector.multi_reduction <maximumf>, %352, %cst_270 [1] : vector<17x17xf32> to vector<17xf32>
    %357 = vector.shape_cast %356 : vector<17xf32> to vector<17x1xf32>
    %358 = vector.broadcast %357 : vector<17x1xf32> to vector<17x17xf32>
    %359 = arith.subf %352, %358 : vector<17x17xf32>
    %360 = math.exp %359 : vector<17x17xf32>
    %cst_271 = arith.constant dense<0.000000e+00> : vector<17xf32>
    %361 = vector.multi_reduction <add>, %360, %cst_271 [1] : vector<17x17xf32> to vector<17xf32>
    %362 = vector.shape_cast %361 : vector<17xf32> to vector<17x1xf32>
    %363 = vector.broadcast %362 : vector<17x1xf32> to vector<17x17xf32>
    %364 = arith.divf %360, %363 : vector<17x17xf32>
    %cst_272 = arith.constant dense<0xFF800000> : vector<17xf32>
    %365 = vector.multi_reduction <maximumf>, %355, %cst_272 [1] : vector<17x17xf32> to vector<17xf32>
    %366 = vector.shape_cast %365 : vector<17xf32> to vector<17x1xf32>
    %367 = vector.broadcast %366 : vector<17x1xf32> to vector<17x17xf32>
    %368 = arith.subf %355, %367 : vector<17x17xf32>
    %369 = math.exp %368 : vector<17x17xf32>
    %cst_273 = arith.constant dense<0.000000e+00> : vector<17xf32>
    %370 = vector.multi_reduction <add>, %369, %cst_273 [1] : vector<17x17xf32> to vector<17xf32>
    %371 = vector.shape_cast %370 : vector<17xf32> to vector<17x1xf32>
    %372 = vector.broadcast %371 : vector<17x1xf32> to vector<17x17xf32>
    %373 = arith.divf %369, %372 : vector<17x17xf32>
    %374 = vector.broadcast %26 : f32 to vector<17x17xf32>
    %375 = arith.mulf %374, %373 : vector<17x17xf32>
    %376 = arith.subf %364, %375 : vector<17x17xf32>
    %cst_274 = arith.constant dense<0.000000e+00> : vector<17x8xf32>
    %377 = tpu.matmul %376, %349, %cst_274 {dimension_numbers = #tpu.dot_dimension_numbers<[1], [0], [0], [1], [0, 0, 1, 1], [], []>} : vector<17x17xf32>, vector<17x8xf32>, vector<17x8xf32> -> vector<17x8xf32>
    %cst_275 = arith.constant dense<0.000000e+00> : vector<17xf32>
    %378 = vector.multi_reduction <add>, %377, %cst_275 [1] : vector<17x8xf32> to vector<17xf32>
    %379 = vector.shape_cast %378 : vector<17xf32> to vector<17x1xf32>
    %cst_276 = arith.constant dense<0.000000e+00> : vector<1xf32>
    %380 = vector.multi_reduction <add>, %379, %cst_276 [0] : vector<17x1xf32> to vector<1xf32>
    %381 = vector.shape_cast %380 : vector<1xf32> to vector<1x1xf32>
    %cst_277 = arith.constant 1.360000e+02 : f32
    %382 = vector.broadcast %cst_277 : f32 to vector<1x1xf32>
    %383 = arith.divf %381, %382 : vector<1x1xf32>
    %384 = vector.broadcast %383 : vector<1x1xf32> to vector<17x8xf32>
    %385 = arith.subf %377, %384 : vector<17x8xf32>
    %386 = arith.mulf %385, %385 : vector<17x8xf32>
    %cst_278 = arith.constant dense<0.000000e+00> : vector<17xf32>
    %387 = vector.multi_reduction <add>, %386, %cst_278 [1] : vector<17x8xf32> to vector<17xf32>
    %388 = vector.shape_cast %387 : vector<17xf32> to vector<17x1xf32>
    %cst_279 = arith.constant dense<0.000000e+00> : vector<1xf32>
    %389 = vector.multi_reduction <add>, %388, %cst_279 [0] : vector<17x1xf32> to vector<1xf32>
    %390 = vector.shape_cast %389 : vector<1xf32> to vector<1x1xf32>
    %cst_280 = arith.constant 1.360000e+02 : f32
    %391 = vector.broadcast %cst_280 : f32 to vector<1x1xf32>
    %392 = arith.divf %390, %391 : vector<1x1xf32>
    %393 = vector.broadcast %383 : vector<1x1xf32> to vector<17x8xf32>
    %394 = arith.subf %377, %393 : vector<17x8xf32>
    %cst_281 = arith.constant 9.99999974E-6 : f32
    %395 = vector.broadcast %cst_281 : f32 to vector<1x1xf32>
    %396 = arith.addf %392, %395 : vector<1x1xf32>
    %397 = math.rsqrt %396 : vector<1x1xf32>
    %398 = vector.broadcast %397 : vector<1x1xf32> to vector<17x8xf32>
    %399 = arith.mulf %394, %398 : vector<17x8xf32>
    %c3_282 = arith.constant 3 : index
    %c0_283 = arith.constant 0 : index
    %c0_284 = arith.constant 0 : index
    %400 = vector.load %arg7[%c3_282, %c0_283, %c0_284] : memref<4x1x8xf32, #tpu.memory_space<vmem>>, vector<1x1x8xf32>
    %401 = vector.shape_cast %400 : vector<1x1x8xf32> to vector<1x8xf32>
    %402 = vector.broadcast %401 : vector<1x8xf32> to vector<17x8xf32>
    %403 = arith.mulf %399, %402 : vector<17x8xf32>
    %c3_285 = arith.constant 3 : index
    %c0_286 = arith.constant 0 : index
    %c0_287 = arith.constant 0 : index
    %404 = vector.load %arg8[%c3_285, %c0_286, %c0_287] : memref<4x1x8xf32, #tpu.memory_space<vmem>>, vector<1x1x8xf32>
    %405 = vector.shape_cast %404 : vector<1x1x8xf32> to vector<1x8xf32>
    %406 = vector.broadcast %405 : vector<1x8xf32> to vector<17x8xf32>
    %407 = arith.addf %403, %406 : vector<17x8xf32>
    %c0_288 = arith.constant 0 : index
    %c3_289 = arith.constant 3 : index
    %c0_290 = arith.constant 0 : index
    %c0_291 = arith.constant 0 : index
    %408 = vector.load %arg9[%c0_288, %c3_289, %c0_290, %c0_291] : memref<1x4x17x8xf32, #tpu.memory_space<vmem>>, vector<1x1x17x8xf32>
    %409 = vector.shape_cast %408 : vector<1x1x17x8xf32> to vector<17x8xf32>
    %410 = vector.shape_cast %407 : vector<17x8xf32> to vector<1x1x17x8xf32>
    tpu.vector_store %arg9[%c0_288, %c3_289, %c0_290, %c0_291], %410 {strides = array<i32>} : memref<1x4x17x8xf32, #tpu.memory_space<vmem>>, vector<1x1x17x8xf32>,
    return
  }
  func.func @transform_0(%arg0: i32) -> (i32, i32, i32) {
    %c0_i32 = arith.constant 0 : i32
    %c0_i32_0 = arith.constant 0 : i32
    %c0_i32_1 = arith.constant 0 : i32
    return %arg0, %c0_i32, %c0_i32_0 : i32, i32, i32
  }
  func.func @transform_1(%arg0: i32) -> (i32, i32) {
    %c0_i32 = arith.constant 0 : i32
    %c0_i32_0 = arith.constant 0 : i32
    %c0_i32_1 = arith.constant 0 : i32
    return %c0_i32, %c0_i32_0 : i32, i32
  }
  func.func @transform_2(%arg0: i32) -> (i32, i32) {
    %c0_i32 = arith.constant 0 : i32
    %c0_i32_0 = arith.constant 0 : i32
    %c0_i32_1 = arith.constant 0 : i32
    return %c0_i32, %c0_i32_0 : i32, i32
  }
  func.func @transform_3(%arg0: i32) -> (i32, i32, i32, i32) {
    %c0_i32 = arith.constant 0 : i32
    %c0_i32_0 = arith.constant 0 : i32
    %c0_i32_1 = arith.constant 0 : i32
    %c0_i32_2 = arith.constant 0 : i32
    %c0_i32_3 = arith.constant 0 : i32
    return %c0_i32, %c0_i32_0, %c0_i32_1, %c0_i32_2 : i32, i32, i32, i32
  }
  func.func @transform_4(%arg0: i32) -> (i32, i32, i32, i32) {
    %c0_i32 = arith.constant 0 : i32
    %c0_i32_0 = arith.constant 0 : i32
    %c0_i32_1 = arith.constant 0 : i32
    %c0_i32_2 = arith.constant 0 : i32
    %c0_i32_3 = arith.constant 0 : i32
    return %c0_i32, %c0_i32_0, %c0_i32_1, %c0_i32_2 : i32, i32, i32, i32
  }
  func.func @transform_5(%arg0: i32) -> (i32, i32) {
    %c0_i32 = arith.constant 0 : i32
    %c0_i32_0 = arith.constant 0 : i32
    %c0_i32_1 = arith.constant 0 : i32
    return %c0_i32, %c0_i32_0 : i32, i32
  }
  func.func @transform_6(%arg0: i32) -> (i32, i32, i32) {
    %c0_i32 = arith.constant 0 : i32
    %c0_i32_0 = arith.constant 0 : i32
    %c0_i32_1 = arith.constant 0 : i32
    %c0_i32_2 = arith.constant 0 : i32
    return %c0_i32, %c0_i32_0, %c0_i32_1 : i32, i32, i32
  }
  func.func @transform_7(%arg0: i32) -> (i32, i32, i32) {
    %c0_i32 = arith.constant 0 : i32
    %c0_i32_0 = arith.constant 0 : i32
    %c0_i32_1 = arith.constant 0 : i32
    %c0_i32_2 = arith.constant 0 : i32
    return %c0_i32, %c0_i32_0, %c0_i32_1 : i32, i32, i32
  }
  func.func @transform_8(%arg0: i32) -> (i32, i32, i32, i32) {
    %c0_i32 = arith.constant 0 : i32
    %c0_i32_0 = arith.constant 0 : i32
    %c0_i32_1 = arith.constant 0 : i32
    %c0_i32_2 = arith.constant 0 : i32
    return %arg0, %c0_i32, %c0_i32_0, %c0_i32_1 : i32, i32, i32, i32
  }
}

</mosaic_0001>

<bundles_post_ra>
// kernel: tpu_custom_call.1
= control target key start
LH: loop header
LB: loop body
LE: loop exit
PB: predicated region body
PF: predicated region fallthrough
CT: control target
= control target key end

     0   :  { %s5414_s29 = smov 0   ;;  %s6644_s0 = inlined_call_operand.vmem [shape: f32[2,17,32], index: 0, kind: input, shape index: {}]   ;;  %s6645_s1 = inlined_call_operand.vmem [shape: f32[1,32], index: 1, kind: input, shape index: {}]   ;;  %s6646_s2 = inlined_call_operand.vmem [shape: f32[1,32], index: 2, kind: input, shape index: {}]   ;;  %s6647_s3 = inlined_call_operand.vmem [shape: f32[5,4,32,8], index: 3, kind: input, shape index: {}]   ;;  %s6648_s4 = inlined_call_operand.vmem [shape: f32[5,4,1,8], index: 4, kind: input, shape index: {}]   ;;  %s6649_s5 = inlined_call_operand.<no memory space> [shape: f32[1,1], index: 5, kind: input, shape index: {}]   ;;  %s6650_s6 = inlined_call_operand.vmem [shape: f32[4,1,8], index: 6, kind: input, shape index: {}]   ;;  %s6651_s7 = inlined_call_operand.vmem [shape: f32[4,1,8], index: 7, kind: input, shape index: {}]   ;;  %s6652_s8 = inlined_call_operand.vmem [shape: f32[2,4,17,8], index: 8, kind: output, shape index: {}]  }
   0x1   :  { %13 = sst [smem:[#allocation2]] %s6649_s5 }
   0x2 LB: > { %s4063_s30 = sadd.s32 4294967295, %s5361_s29   ;;  %p4067_p0 = scmp.ge.s32.totalorder %s5361_s29, 1  ;;  %s5361_s29 = sphi %s5414_s29, %s19_s29  }
   0x3   : > { %p263_p1 = scmp.lt.s32.totalorder %s5361_s29, 3 }
   0x5   : > { %p264_p2 = pnand %p4067_p0, %p263_p1 }
   0x6   : > { %p297_p3 = scmp.lt.s32.totalorder (!%p264_p2), %s4063_s30, 1  ;;  %vm312_vm0 = vcmask (!%p264_p2), 261120   ;;  %vm319_vm1 = vcmask (!%p264_p2), 253952   ;;  %v373_v21 = vld [vmem:[%s6647_s3] sm:$0xff] (!%p264_p2)  ;;  %v374_v22 = vld [vmem:[%s6647_s3 + $0x8] sm:$0xff] (!%p264_p2)  ;;  %v5363_v26 = vmov (!%p264_p2), 0.0|0.0  }
   0x7   : > { %267 = sbr.rel (%p264_p2) target bundleno = 4044 (0xfcc), region = 52  ;;  %v4076_v23 = vld [vmem:[%s6647_s3 + $0x80] sm:$0xff] (!%p264_p2)  ;;  %v5069_v24 = vpack.c.bf16 (!%p264_p2), %v374_v22, %v373_v21  ;;  %v4077_v25 = vld [vmem:[%s6647_s3 + $0x88] sm:$0xff] (!%p264_p2)  ;;  %5068 = vmatprep.subr.bf16.mxu0 (!%p264_p2), %v5363_v26  ;;  %5074 = vmatprep.subr.bf16.mxu1 (!%p264_p2), %v5363_v26  ;;  %v375_v28 = vld [vmem:[%s6647_s3 + $0x10] sm:$0xff] (!%p264_p2)  ;;  %vm5364_vm2 = vmmov (!%p264_p2), 0   ;;  %v5365_v34 = vmov (!%p264_p2), 0.0  }
   0x8   : > { %v5075_v27 = vpack.c.bf16 (!%p264_p2), %v4077_v25, %v4076_v23  ;;  %v376_v29 = vld [vmem:[%s6647_s3 + $0x18] sm:$0xff] (!%p264_p2)  ;;  %v4078_v30 = vld [vmem:[%s6647_s3 + $0x90] sm:$0xff] (!%p264_p2)  ;;  %4556 = vmatprep.mubr.msk.f32.mxu0 (!%p264_p2), %vm5364_vm2, %v5365_v34  ;;  %4573 = vmatprep.mubr.msk.f32.mxu1 (!%p264_p2), %vm5364_vm2, %v5365_v34  ;;  %v4070_v45 = vld [vmem:[%s6645_s1] ss:$0 sm:$0xff] (!%p264_p2)  ;;  %vm845_vm3 = vcmask (!%p264_p2), 64512   ;;  %vm1132_vm5 = vcmask (!%p264_p2), 1040384  }
   0x9   : > { %5070 = vmatpush3.bf16.msra.mxu0 (!%p264_p2), %v5069_v24  ;;  %v5072_v31 = vpack.c.bf16 (!%p264_p2), %v376_v29, %v375_v28  ;;  %v4079_v32 = vld [vmem:[%s6647_s3 + $0x98] sm:$0xff] (!%p264_p2)  ;;  %v4071_v46 = vld [vmem:[%s6646_s2] ss:$0 sm:$0xff] (!%p264_p2)  ;;  %v4095_v49 = vld [vmem:[%s6647_s3 + $0x188] sm:$0xff] (!%p264_p2)  ;;  %vm1048_vm6 = vcmask (!%p264_p2), 138240   ;;  %vm1055_vm7 = vcmask (!%p264_p2), 131072  }
   0xa   : > { %5076 = vmatpush3.bf16.msra.mxu1 (!%p264_p2), %v5075_v27  ;;  %5071 = vmatprep.subr.bf16.mxu0 (!%p264_p2), %v5363_v26  ;;  %v5078_v33 = vpack.c.bf16 (!%p264_p2), %v4079_v32, %v4078_v30  ;;  %v4094_v48 = vld [vmem:[%s6647_s3 + $0x180] sm:$0xff] (!%p264_p2)  ;;  %v4086_v51 = vld [vmem:[%s6647_s3 + $0x108] sm:$0xff] (!%p264_p2)  ;;  %v4087_v60 = vld [vmem:[%s6647_s3 + $0x110] sm:$0xff] (!%p264_p2)  ;;  %s372_s10 = sld [smem:[#allocation2]] (!%p264_p2)  ;;  %vm1222_vm8 = vcmask (!%p264_p2), 57344  }
   0xb   : > { %5077 = vmatprep.subr.bf16.mxu1 (!%p264_p2), %v5363_v26  ;;  %v4085_v50 = vld [vmem:[%s6647_s3 + $0x100] sm:$0xff] (!%p264_p2)  ;;  %v5087_v56 = vpack.c.bf16 (!%p264_p2), %v4095_v49, %v4094_v48  ;;  %v4088_v61 = vld [vmem:[%s6647_s3 + $0x118] sm:$0xff] (!%p264_p2)  ;;  %v4096_v62 = vld [vmem:[%s6647_s3 + $0x190] sm:$0xff] (!%p264_p2) }
   0xc   : > { %v5081_v57 = vpack.c.bf16 (!%p264_p2), %v4086_v51, %v4085_v50  ;;  %v4097_v63 = vld [vmem:[%s6647_s3 + $0x198] sm:$0xff] (!%p264_p2)  ;;  %v4090_v29 = vld [vmem:[%s6648_s4 + $0x8] ss:$0 sm:$0xff] (!%p264_p2)  ;;  %v4099_v30 = vld [vmem:[%s6648_s4 + $0xc] ss:$0 sm:$0xff] (!%p264_p2) }
   0xd   : > { %5073 = vmatpush3.bf16.msra.mxu0 (!%p264_p2), %v5072_v31  ;;  %vm5603_vm4 = vmpackc.low (!%p264_p2), %vm845_vm3, %vm845_vm3  ;;  %v4108_v49 = vld [vmem:[%s6648_s4 + $0x10] ss:$0 sm:$0xff] (!%p264_p2)  ;;  %v4072_v50 = vld [vmem:[%s6648_s4] ss:$0 sm:$0xff] (!%p264_p2) }
   0xe   : > { %s6656_s30 = smov (!%p297_p3, %s4063_s30), 1  ;;  %5079 = vmatpush3.bf16.msra.mxu1 %v5078_v33  ;;  %5080 = vmatprep.subr.bf16.mxu0 %v5363_v26  ;;  %v4081_v51 = vld [vmem:[%s6648_s4 + $0x4] ss:$0 sm:$0xff] }
   0xf   : > { %s5232_s5 = smul.u32 24, %s6656_s30  ;;  %5086 = vmatprep.subr.bf16.mxu1 %v5363_v26 }
  0x10   : > { %s5233_s28 = smul.u32 96, %s6656_s30 }
  0x11   : > { %s301_s11 = scalar_lea.vmem %s6644_s0, %s5232_s5 }
  0x12   : > { %v307_v0 = vld [vmem:[%s301_s11] sm:$0xff]  ;;  %v309_v1 = vld [vmem:[%s301_s11 + $0x10] sm:$0x1]  ;;  %v308_v2 = vld [vmem:[%s301_s11 + $0x8] sm:$0xff]  ;;  %s6597_s17 = scalar_lea.vmem %s6652_s8, %s5233_s28 }
  0x13   : > { %v313_v3 = vsel %vm312_vm0, %v307_v0, 0.0  ;;  %v320_v4 = vsel %vm319_vm1, %v309_v1, 0.0  ;;  %v316_v5 = vsel %vm312_vm0, %v308_v2, 0.0 }
  0x14   : > { %314 = vadd.xlane.f32.xlu0 %v313_v3  ;;  %321 = vadd.xlane.f32.xlu1 %v320_v4  ;;  %v5090_v4 = vpack.c.bf16 %v4097_v63, %v4096_v62 }
  0x18   : > { %317 = vadd.xlane.f32.xlu0 %v316_v5 }
  0xa1   : > { %v315_v6 = vpop.xlane.xlu0 %314  ;;  %v322_v7 = vpop.xlane.xlu1 %321 }
  0xa2   : > { %v324_v8 = vmul.f32 0.03125, %v315_v6  ;;  %v326_v9 = vmul.f32 0.03125, %v322_v7  ;;  %v4103_v6 = vld [vmem:[%s6647_s3 + $0x200] sm:$0xff]  ;;  %v4104_v7 = vld [vmem:[%s6647_s3 + $0x208] sm:$0xff] }
  0xa4   : > { %v327_v10 = vsub.f32 %v307_v0, %v324_v8  ;;  %v5431_v11 = vsub.f32 %v309_v1, %v326_v9  ;;  %v5084_v1 = vpack.c.bf16 %v4088_v61, %v4087_v60  ;;  %v5093_v8 = vpack.c.bf16 %v4104_v7, %v4103_v6  ;;  %v4105_v9 = vld [vmem:[%s6647_s3 + $0x210] sm:$0xff] }
  0xa5   : > { %v318_v12 = vpop.xlane.xlu0 %317 }
  0xa6   : > { %v325_v13 = vmul.f32 0.03125, %v318_v12  ;;  %v330_v14 = vmul.f32 %v327_v10, %v327_v10  ;;  %v332_v15 = vmul.f32 %v5431_v11, %v5431_v11 }
  0xa8   : > { %v328_v16 = vsub.f32 %v308_v2, %v325_v13  ;;  %v333_v17 = vsel %vm312_vm0, %v330_v14, 0.0  ;;  %v339_v18 = vsel %vm319_vm1, %v332_v15, 0.0 }
  0xa9   : > { %334 = vadd.xlane.f32.xlu1 %v333_v17 }
  0xaa   : > { %v331_v19 = vmul.f32 %v328_v16, %v328_v16 }
  0xac   : > { %v336_v20 = vsel %vm312_vm0, %v331_v19, 0.0 }
  0xad   : > { %340 = vadd.xlane.f32.xlu1 %v339_v18  ;;  %337 = vadd.xlane.f32.xlu0 %v336_v20 }
 0x136   : > { %v335_v35 = vpop.xlane.xlu1 %334 }
 0x137   : > { %v342_v36 = vmul.f32 0.03125, %v335_v35 }
 0x139   : > { %v345_v37 = vadd.f32 1e-05, %v342_v36 }
 0x13a   : > { %v341_v38 = vpop.xlane.xlu1 %340  ;;  %v338_v39 = vpop.xlane.xlu0 %337 }
 0x13b   : > { %5245 = vrsqrt.f32 %v345_v37  ;;  %v344_v40 = vmul.f32 0.03125, %v341_v38  ;;  %v343_v41 = vmul.f32 0.03125, %v338_v39 }
 0x13d   : > { %v347_v42 = vadd.f32 1e-05, %v344_v40  ;;  %v346_v43 = vadd.f32 1e-05, %v343_v41 }
 0x13f   : > { %5247 = vrsqrt.f32 %v347_v42 }
 0x140   : > { %5249 = vrsqrt.f32 %v346_v43 }
 0x145   : > { %v5246_v44 = vpop.eup %5245 }
 0x146   : > { %v351_v47 = vmul.f32 %v5246_v44, %v327_v10  ;;  %v4106_v10 = vld [vmem:[%s6647_s3 + $0x218] sm:$0xff] }
 0x148   : > { %v360_v52 = vmul.f32 %v4070_v45, %v351_v47 }
 0x149   : > { %v5248_v53 = vpop.eup %5247 }
 0x14a   : > { %v5250_v54 = vpop.eup %5249  ;;  %v5490_v55 = vadd.f32 %v4071_v46, %v360_v52  ;;  %v353_v58 = vmul.f32 %v5248_v53, %v5431_v11  ;;  %v5096_v11 = vpack.c.bf16 %v4106_v10, %v4105_v9 }
 0x14b   : > { %v352_v59 = vmul.f32 %v5250_v54, %v328_v16 }
 0x14c   : > { %4557 = vmatmul.mubr.msk.f32.vlgmr.msra.gmra.mrb[0].mxu0 %vm312_vm0, %v5490_v55  ;;  %4574 = vmatmul.mubr.msk.f32.vlgmr.msra.gmra.mrb[0].mxu1 %vm312_vm0, %v5490_v55  ;;  %v362_v2 = vmul.f32 %v4070_v45, %v353_v58 }
 0x14d   : > { %v361_v0 = vmul.f32 %v4070_v45, %v352_v59  ;;  %4559 = vmatprep.mubr.msk.f32.mxu0 %vm5364_vm2, %v5365_v34  ;;  %4576 = vmatprep.mubr.msk.f32.mxu1 %vm5364_vm2, %v5365_v34 }
 0x14e   : > { %5088 = vmatpush3.bf16.msra.mxu1 %v5087_v56  ;;  %5082 = vmatpush3.bf16.msra.mxu0 %v5081_v57  ;;  %v5525_v5 = vadd.f32 %v4071_v46, %v362_v2  ;;  %v4130_v56 = vld [vmem:[%s6647_s3 + $0x20] sm:$0xff]  ;;  %v4131_v57 = vld [vmem:[%s6647_s3 + $0x28] sm:$0xff]  ;;  %v4132_v2 = vld [vmem:[%s6647_s3 + $0x30] sm:$0xff] }
 0x14f   : > { %v5513_v3 = vadd.f32 %v4071_v46, %v361_v0  ;;  %5083 = vmatprep.subr.bf16.mxu0 %v5363_v26  ;;  %5089 = vmatprep.subr.bf16.mxu1 %v5363_v26  ;;  %v5110_v0 = vpack.c.bf16 %v4131_v57, %v4130_v56 }
 0x151   : > { %4560 = vmatmul.mubr.msk.f32.gmra.mrb[2].mxu0 %vm312_vm0, %v5513_v3  ;;  %4577 = vmatmul.mubr.msk.f32.gmra.mrb[2].mxu1 %vm312_vm0, %v5513_v3 }
 0x152   : > { %4562 = vmatprep.mubr.msk.f32.mxu0 %vm5364_vm2, %v5365_v34  ;;  %4579 = vmatprep.mubr.msk.f32.mxu1 %vm5364_vm2, %v5365_v34 }
 0x153   : > { %5085 = vmatpush3.bf16.msra.mxu0 %v5084_v1  ;;  %5091 = vmatpush3.bf16.msra.mxu1 %v5090_v4  ;;  %v4133_v4 = vld [vmem:[%s6647_s3 + $0x38] sm:$0xff] }
 0x154   : > { %5092 = vmatprep.subr.bf16.mxu0 %v5363_v26  ;;  %5098 = vmatprep.subr.bf16.mxu1 %v5363_v26  ;;  %v5113_v10 = vpack.c.bf16 %v4133_v4, %v4132_v2 }
 0x155   : > { %4563 = vmatmul.mubr.msk.f32.gmra.mrb[4].mxu0 %vm312_vm0, %v5525_v5  ;;  %4580 = vmatmul.mubr.msk.f32.gmra.mrb[4].mxu1 %vm312_vm0, %v5525_v5 }
 0x156   : > { %4590 = vmatprep.mubr.msk.f32.mxu0 %vm5364_vm2, %v5365_v34  ;;  %4607 = vmatprep.mubr.msk.f32.mxu1 %vm5364_vm2, %v5365_v34 }
 0x159   : > { %4591 = vmatmul.mubr.msk.f32.vlgmr.msra.gmra.mrb[6].mxu0 %vm312_vm0, %v5490_v55  ;;  %4608 = vmatmul.mubr.msk.f32.vlgmr.msra.gmra.mrb[6].mxu1 %vm312_vm0, %v5490_v55 }
 0x15a   : > { %4593 = vmatprep.mubr.msk.f32.mxu0 %vm5364_vm2, %v5365_v34  ;;  %4610 = vmatprep.mubr.msk.f32.mxu1 %vm5364_vm2, %v5365_v34 }
 0x15b   : > { %5094 = vmatpush3.bf16.msra.mxu0 %v5093_v8 }
 0x15c   : > { %5095 = vmatprep.subr.bf16.mxu0 %v5363_v26 }
 0x15d   : > { %4594 = vmatmul.mubr.msk.f32.gmra.mrb[8].mxu0 %vm312_vm0, %v5513_v3  ;;  %4611 = vmatmul.mubr.msk.f32.gmra.mrb[8].mxu1 %vm312_vm0, %v5513_v3 }
 0x15e   : > { %4596 = vmatprep.mubr.msk.f32.mxu0 %vm5364_vm2, %v5365_v34  ;;  %4613 = vmatprep.mubr.msk.f32.mxu1 %vm5364_vm2, %v5365_v34 }
 0x15f   : > { %5097 = vmatpush3.bf16.msra.mxu0 %v5096_v11 }
 0x160   : > { %5102 = vmatprep.subr.bf16.mxu0 %v5363_v26 }
 0x161   : > { %4597 = vmatmul.mubr.msk.f32.gmra.mrb[10].mxu0 %vm312_vm0, %v5525_v5  ;;  %4614 = vmatmul.mubr.msk.f32.gmra.mrb[10].mxu1 %vm312_vm0, %v5525_v5 }
 0x162   : > { %4624 = vmatprep.mubr.msk.f32.mxu0 %vm5364_vm2, %v5365_v34  ;;  %4639 = vmatprep.mubr.msk.f32.mxu1 %vm5364_vm2, %v5365_v34 }
 0x165   : > { %4625 = vmatmul.mubr.msk.f32.vlgmr.msra.gmra.mrb[12].mxu0 %vm312_vm0, %v5490_v55 }
 0x166   : > { %4627 = vmatprep.mubr.msk.f32.mxu0 %vm5364_vm2, %v5365_v34 }
 0x169   : > { %4628 = vmatmul.mubr.msk.f32.gmra.mrb[14].mxu0 %vm312_vm0, %v5513_v3 }
 0x16a   : > { %4630 = vmatprep.mubr.msk.f32.mxu0 %vm5364_vm2, %v5365_v34 }
 0x16d   : > { %4631 = vmatmul.mubr.msk.f32.gmra.mrb[16].mxu0 %vm312_vm0, %v5525_v5 }
 0x16e   : > { %4654 = vmatprep.mubr.msk.f32.mxu0 %vm5364_vm2, %v5365_v34 }
 0x21f   : > { %v459_v12 = vpop.f32.mrb[0].mxu0  ;;  %v552_v13 = vpop.f32.mrb[0].mxu1 }
 0x220   : > { %v4558_v14 = vpop.f32.mrb[1].mxu0  ;;  %v4575_v15 = vpop.f32.mrb[1].mxu1  ;;  %v460_v61 = vadd.f32 %v4072_v50, %v459_v12  ;;  %v553_v62 = vadd.f32 %v4081_v51, %v552_v13  ;;  %v4148_v13 = vld [vmem:[%s6647_s3 + $0x120] sm:$0xff] }
 0x221   : > { %v4149_v14 = vld [vmem:[%s6647_s3 + $0x128] sm:$0xff] }
 0x222   : > { %v5122_v15 = vpack.c.bf16 %v4149_v14, %v4148_v13 }
 0x224   : > { %v5587_v16 = vpop.f32.mrb[2].mxu0  ;;  %v5589_v17 = vpop.f32.mrb[2].mxu1 }
 0x225   : > { %v4561_v18 = vpop.f32.mrb[3].mxu0  ;;  %v4578_v19 = vpop.f32.mrb[3].mxu1  ;;  %v465_v7 = vadd.f32 %v4072_v50, %v5587_v16  ;;  %v558_v8 = vadd.f32 %v4081_v51, %v5589_v17  ;;  %v4150_v16 = vld [vmem:[%s6647_s3 + $0x130] sm:$0xff]  ;;  %v4151_v17 = vld [vmem:[%s6647_s3 + $0x138] sm:$0xff] }
 0x226   : > { %v5125_v18 = vpack.c.bf16 %v4151_v17, %v4150_v16  ;;  %v4166_v19 = vld [vmem:[%s6647_s3 + $0x220] sm:$0xff] }
 0x228   : > { %v5591_v20 = vpop.f32.mrb[4].mxu0  ;;  %v5593_v21 = vpop.f32.mrb[4].mxu1 }
 0x229   : > { %v4564_v22 = vpop.f32.mrb[5].mxu0  ;;  %v4581_v23 = vpop.f32.mrb[5].mxu1  ;;  %v470_v11 = vadd.f32 %v4072_v50, %v5591_v20  ;;  %v563_v12 = vadd.f32 %v4081_v51, %v5593_v21  ;;  %v4167_v20 = vld [vmem:[%s6647_s3 + $0x228] sm:$0xff] }
 0x22a   : > { %v5134_v21 = vpack.c.bf16 %v4167_v20, %v4166_v19  ;;  %v4168_v22 = vld [vmem:[%s6647_s3 + $0x230] sm:$0xff]  ;;  %v4169_v23 = vld [vmem:[%s6647_s3 + $0x238] sm:$0xff] }
 0x22c   : > { %v645_v24 = vpop.f32.mrb[6].mxu0  ;;  %v738_v25 = vpop.f32.mrb[6].mxu1 }
 0x22d   : > { %v4592_v27 = vpop.f32.mrb[7].mxu0  ;;  %v4609_v28 = vpop.f32.mrb[7].mxu1  ;;  %v646_v33 = vadd.f32 %v4090_v29, %v645_v24  ;;  %v739_v35 = vadd.f32 %v4099_v30, %v738_v25  ;;  %v5137_v24 = vpack.c.bf16 %v4169_v23, %v4168_v22 }
 0x230   : > { %v650_v31 = vpop.f32.mrb[8].mxu0  ;;  %v743_v32 = vpop.f32.mrb[8].mxu1 }
 0x231   : > { %v651_v36 = vadd.f32 %v4090_v29, %v650_v31  ;;  %v744_v37 = vadd.f32 %v4099_v30, %v743_v32  ;;  %v4595_v38 = vpop.f32.mrb[9].mxu0  ;;  %v4612_v39 = vpop.f32.mrb[9].mxu1 }
 0x233   : > { %v5099_v41 = vpack.c.bf16 %v651_v36, %v646_v33  ;;  %v5103_v42 = vpack.c.bf16 %v744_v37, %v739_v35 }
 0x234   : > { %v655_v43 = vpop.f32.mrb[10].mxu0  ;;  %v748_v44 = vpop.f32.mrb[10].mxu1 }
 0x235   : > { %v4598_v45 = vpop.f32.mrb[11].mxu0  ;;  %v4615_v46 = vpop.f32.mrb[11].mxu1  ;;  %5101 = vmatpush3.bf16.xpose.msk.msra.mxu1 %vm5603_vm4, %v5099_v41  ;;  %5105 = vmatpush3.bf16.xpose.msk.msra.mxu0 %vm5603_vm4, %v5103_v42  ;;  %v656_v52 = vadd.f32 %v4090_v29, %v655_v43  ;;  %v749_v53 = vadd.f32 %v4099_v30, %v748_v44 }
 0x236   : > { %4637 = vmatprep.subr.mxu1 %v5365_v34  ;;  %4652 = vmatprep.subr.mxu0 %v5365_v34 }
 0x238   : > { %v831_v47 = vpop.f32.mrb[12].mxu0 }
 0x239   : > { %v4626_v48 = vpop.f32.mrb[13].mxu0  ;;  %v832_v58 = vadd.f32 %v4108_v49, %v831_v47 }
 0x23c   : > { %v836_v54 = vpop.f32.mrb[14].mxu0 }
 0x23d   : > { %v837_v59 = vadd.f32 %v4108_v49, %v836_v54  ;;  %v4629_v60 = vpop.f32.mrb[15].mxu0  ;;  %4638 = vmatpush3.xpose.msk.msra.mxu1 %vm845_vm3, %v656_v52  ;;  %4653 = vmatpush3.xpose.msk.msra.mxu0 %vm845_vm3, %v749_v53 }
 0x23e   : > { %5106 = vmatprep.subr.bf16.mxu1 %v5363_v26  ;;  %5109 = vmatprep.subr.bf16.mxu0 %v5363_v26 }
 0x23f   : > { %v5107_v63 = vpack.c.bf16 %v837_v59, %v832_v58 }
 0x240   : > { %v841_v1 = vpop.f32.mrb[16].mxu0  ;;  %4640 = vmatmul.mubr.msk.f32.vlgmr.msra.gmra.mrb[12].mxu1 %vm845_vm3, %v460_v61  ;;  %4655 = vmatmul.mubr.msk.f32.vlgmr.msra.gmra.mrb[18].mxu0 %vm845_vm3, %v553_v62  ;;  %v5744_v61 = vld [vmem:[%s6648_s4 + $0x9] ss:$0 sm:$0xff] }
 0x241   : > { %v4632_v6 = vpop.f32.mrb[17].mxu0  ;;  %5108 = vmatpush3.bf16.msra.mxu1 %v5107_v63  ;;  %4642 = vmatprep.mubr.msk.f32.mxu1 %vm5364_vm2, %v5365_v34  ;;  %v842_v9 = vadd.f32 %v4108_v49, %v841_v1 }
 0x242   : > { %4657 = vmatprep.mubr.msk.f32.mxu0 %vm5364_vm2, %v5365_v34  ;;  %4667 = vmatprep.subr.mxu1 %v5365_v34 }
 0x243   : > { %5111 = vmatpush3.bf16.msra.mxu0 %v5110_v0 }
 0x244   : > { %4643 = vmatmul.mubr.msk.f32.gmra.mrb[14].mxu1 %vm845_vm3, %v465_v7  ;;  %4658 = vmatmul.mubr.msk.f32.gmra.mrb[20].mxu0 %vm845_vm3, %v558_v8 }
 0x245   : > { %4668 = vmatpush3.msk.msra.mxu1 %vm1132_vm5, %v842_v9  ;;  %4645 = vmatprep.mubr.msk.f32.mxu1 %vm5364_vm2, %v5365_v34  ;;  %v5759_v9 = vld [vmem:[%s6648_s4 + $0x11] ss:$0 sm:$0xff] }
 0x246   : > { %4660 = vmatprep.mubr.msk.f32.mxu0 %vm5364_vm2, %v5365_v34  ;;  %5112 = vmatprep.subr.bf16.mxu0 %v5363_v26 }
 0x247   : > { %5114 = vmatpush3.bf16.msra.mxu0 %v5113_v10  ;;  %5115 = vmatprep.subr.bf16.mxu1 %v5363_v26 }
 0x248   : > { %4646 = vmatmul.mubr.msk.f32.gmra.mrb[16].mxu1 %vm845_vm3, %v470_v11  ;;  %4661 = vmatmul.mubr.msk.f32.gmra.mrb[22].mxu0 %vm845_vm3, %v563_v12 }
 0x249   : > { %4686 = vmatprep.mubr.msk.f32.mxu0 %vm5364_vm2, %v5365_v34  ;;  %5121 = vmatprep.subr.bf16.mxu0 %v5363_v26 }
 0x24a   : > { %4669 = vmatprep.mubr.msk.f32.mxu1 %vm5364_vm2, %v5365_v34 }
 0x24c   : > { %4687 = vmatmul.mubr.msk.f32.vlgmr.msra.gmra.mrb[24].mxu0 %vm312_vm0, %v5490_v55 }
 0x24d   : > { %4689 = vmatprep.mubr.msk.f32.mxu0 %vm5364_vm2, %v5365_v34  ;;  %5123 = vmatpush3.bf16.msra.mxu0 %v5122_v15 }
 0x24e   : > { %5124 = vmatprep.subr.bf16.mxu0 %v5363_v26 }
 0x250   : > { %4690 = vmatmul.mubr.msk.f32.gmra.mrb[26].mxu0 %vm312_vm0, %v5513_v3 }
 0x251   : > { %4692 = vmatprep.mubr.msk.f32.mxu0 %vm5364_vm2, %v5365_v34  ;;  %5126 = vmatpush3.bf16.msra.mxu0 %v5125_v18 }
 0x252   : > { %5133 = vmatprep.subr.bf16.mxu0 %v5363_v26 }
 0x254   : > { %4693 = vmatmul.mubr.msk.f32.gmra.mrb[28].mxu0 %vm312_vm0, %v5525_v5 }
 0x255   : > { %4720 = vmatprep.mubr.msk.f32.mxu0 %vm5364_vm2, %v5365_v34 }
 0x258   : > { %4721 = vmatmul.mubr.msk.f32.vlgmr.msra.gmra.mrb[30].mxu0 %vm312_vm0, %v5490_v55 }
 0x259   : > { %4723 = vmatprep.mubr.msk.f32.mxu0 %vm5364_vm2, %v5365_v34  ;;  %5135 = vmatpush3.bf16.msra.mxu0 %v5134_v21 }
 0x25a   : > { %5136 = vmatprep.subr.bf16.mxu0 %v5363_v26 }
 0x25c   : > { %4724 = vmatmul.mubr.msk.f32.gmra.mrb[32].mxu0 %vm312_vm0, %v5513_v3 }
 0x25d   : > { %4726 = vmatprep.mubr.msk.f32.mxu0 %vm5364_vm2, %v5365_v34  ;;  %5138 = vmatpush3.bf16.msra.mxu0 %v5137_v24 }
 0x25e   : > { %5143 = vmatprep.subr.bf16.mxu0 %v5363_v26 }
 0x260   : > { %4727 = vmatmul.mubr.msk.f32.gmra.mrb[34].mxu0 %vm312_vm0, %v5525_v5 }
 0x261   : > { %4754 = vmatprep.mubr.msk.f32.mxu0 %vm5364_vm2, %v5365_v34 }
 0x264   : > { %4755 = vmatmul.mubr.msk.f32.vlgmr.msra.gmra.mrb[36].mxu0 %vm312_vm0, %v5490_v55 }
 0x265   : > { %4757 = vmatprep.mubr.msk.f32.mxu0 %vm5364_vm2, %v5365_v34 }
 0x268   : > { %4758 = vmatmul.mubr.msk.f32.gmra.mrb[38].mxu0 %vm312_vm0, %v5513_v3 }
 0x269   : > { %4760 = vmatprep.mubr.msk.f32.mxu0 %vm5364_vm2, %v5365_v34 }
 0x26c   : > { %4761 = vmatmul.mubr.msk.f32.gmra.mrb[40].mxu0 %vm312_vm0, %v5525_v5 }
 0x26d   : > { %4784 = vmatprep.mubr.msk.f32.mxu0 %vm5364_vm2, %v5365_v34 }
 0x313   : > { %v930_v25 = vpop.f32.mrb[12].mxu1  ;;  %v1031_v27 = vpop.f32.mrb[18].mxu0 }
 0x314   : > { %v944_v28 = vmul.f32 0.35355338, %v930_v25  ;;  %v1045_v29 = vmul.f32 0.35355338, %v1031_v27  ;;  %v4641_v30 = vpop.f32.mrb[13].mxu1  ;;  %v4656_v31 = vpop.f32.mrb[19].mxu0 }
 0x316   : > { %v1049_v32 = vsel %vm1048_vm6, %v944_v28, -inf  ;;  %v1083_v33 = vsel %vm1048_vm6, %v1045_v29, -inf }
 0x317   : > { %1050 = vmax.xlane.f32.xlu1 %v1049_v32  ;;  %v935_v35 = vpop.f32.mrb[14].mxu1  ;;  %1084 = vmax.xlane.f32.xlu0 %v1083_v33  ;;  %v1036_v36 = vpop.f32.mrb[20].mxu0 }
 0x318   : > { %v945_v37 = vmul.f32 0.35355338, %v935_v35  ;;  %v1046_v38 = vmul.f32 0.35355338, %v1036_v36  ;;  %v4644_v39 = vpop.f32.mrb[15].mxu1  ;;  %v4659_v41 = vpop.f32.mrb[21].mxu0 }
 0x31a   : > { %v1052_v42 = vsel %vm1048_vm6, %v945_v37, -inf  ;;  %v1086_v43 = vsel %vm1048_vm6, %v1046_v38, -inf }
 0x31b   : > { %1053 = vmax.xlane.f32.xlu1 %v1052_v42  ;;  %v940_v44 = vpop.f32.mrb[16].mxu1  ;;  %1087 = vmax.xlane.f32.xlu0 %v1086_v43  ;;  %v1041_v45 = vpop.f32.mrb[22].mxu0 }
 0x31c   : > { %v946_v46 = vmul.f32 0.35355338, %v940_v44  ;;  %v1047_v47 = vmul.f32 0.35355338, %v1041_v45  ;;  %v4647_v48 = vpop.f32.mrb[17].mxu1  ;;  %v4662_v49 = vpop.f32.mrb[23].mxu0 }
 0x31e   : > { %v1056_v50 = vsel %vm1055_vm7, %v946_v46, -inf  ;;  %v1089_v51 = vsel %vm1055_vm7, %v1047_v47, -inf }
 0x31f   : > { %1057 = vmax.xlane.f32.xlu1 %v1056_v50  ;;  %1090 = vmax.xlane.f32.xlu0 %v1089_v51  ;;  %v5735_v52 = vpop.f32.mrb[24].mxu0 }
 0x320   : > { %v4688_v53 = vpop.f32.mrb[25].mxu0 }
 0x323   : > { %v5737_v54 = vpop.f32.mrb[26].mxu0 }
 0x324   : > { %v4691_v56 = vpop.f32.mrb[27].mxu0 }
 0x327   : > { %v5739_v57 = vpop.f32.mrb[28].mxu0 }
 0x328   : > { %v4694_v58 = vpop.f32.mrb[29].mxu0 }
 0x32b   : > { %v1555_v59 = vpop.f32.mrb[30].mxu0 }
 0x32c   : > { %v4722_v60 = vpop.f32.mrb[31].mxu0  ;;  %v5747_v63 = vadd.f32 %v5744_v61, %v1555_v59 }
 0x32f   : > { %v1560_v62 = vpop.f32.mrb[32].mxu0 }
 0x330   : > { %v5750_v0 = vadd.f32 %v5744_v61, %v1560_v62  ;;  %v4725_v1 = vpop.f32.mrb[33].mxu0 }
 0x331   : > { %v5777_v1 = vstv %s372_s10 }
 0x332   : > { %v5140_v2 = vpack.c.bf16 %v5750_v0, %v5747_v63 }
 0x333   : > { %v5754_v4 = vpop.f32.mrb[34].mxu0 }
 0x334   : > { %v4728_v6 = vpop.f32.mrb[35].mxu0 }
 0x337   : > { %v1741_v7 = vpop.f32.mrb[36].mxu0 }
 0x338   : > { %v4756_v8 = vpop.f32.mrb[37].mxu0  ;;  %v5762_v11 = vadd.f32 %v5759_v9, %v1741_v7  ;;  %v4139_v7 = vld [vmem:[%s6647_s3 + $0xa0] sm:$0xff] }
 0x339   : > { %v4140_v8 = vld [vmem:[%s6647_s3 + $0xa8] sm:$0xff] }
 0x33b   : > { %v1746_v10 = vpop.f32.mrb[38].mxu0 }
 0x33c   : > { %v5765_v12 = vadd.f32 %v5759_v9, %v1746_v10  ;;  %v4759_v13 = vpop.f32.mrb[39].mxu0 }
 0x33e   : > { %v5148_v14 = vpack.c.bf16 %v5765_v12, %v5762_v11 }
 0x33f   : > { %v5769_v15 = vpop.f32.mrb[40].mxu0 }
 0x340   : > { %v4762_v16 = vpop.f32.mrb[41].mxu0  ;;  %v1752_v0 = vadd.f32 %v5759_v9, %v5769_v15 }
 0x3a4   : > { %v1051_v17 = vpop.xlane.xlu1 %1050  ;;  %v1085_v18 = vpop.xlane.xlu0 %1084 }
 0x3a5   : > { %v1059_v19 = vsub.f32 %v944_v28, %v1051_v17  ;;  %v1092_v20 = vsub.f32 %v1045_v29, %v1085_v18  ;;  %v5116_v18 = vpack.c.bf16 %v4140_v8, %v4139_v7  ;;  %v4144_v8 = vld [vmem:[%s6648_s4 + $0x5] ss:$0 sm:$0xff] }
 0x3a7   : > { %v1062_v21 = vmul.f32 1.442695, %v1059_v19  ;;  %v1095_v22 = vmul.f32 1.442695, %v1092_v20 }
 0x3a8   : > { %v1054_v23 = vpop.xlane.xlu1 %1053  ;;  %v1088_v24 = vpop.xlane.xlu0 %1087 }
 0x3a9   : > { %5251 = vpow2.f32 %v1062_v21  ;;  %v1060_v25 = vsub.f32 %v945_v37, %v1054_v23  ;;  %v1093_v27 = vsub.f32 %v1046_v38, %v1088_v24  ;;  %v4141_v21 = vld [vmem:[%s6647_s3 + $0xb0] sm:$0xff] }
 0x3aa   : > { %5253 = vpow2.f32 %v1095_v22  ;;  %v4142_v22 = vld [vmem:[%s6647_s3 + $0xb8] sm:$0xff] }
 0x3ab   : > { %v1064_v30 = vmul.f32 1.442695, %v1060_v25  ;;  %v1097_v31 = vmul.f32 1.442695, %v1093_v27 }
 0x3ac   : > { %v1058_v32 = vpop.xlane.xlu1 %1057  ;;  %v1091_v33 = vpop.xlane.xlu0 %1090 }
 0x3ad   : > { %5255 = vpow2.f32 %v1064_v30  ;;  %v1061_v35 = vsub.f32 %v946_v46, %v1058_v32  ;;  %v1094_v36 = vsub.f32 %v1047_v47, %v1091_v33  ;;  %v5119_v30 = vpack.c.bf16 %v4142_v22, %v4141_v21 }
 0x3ae   : > { %5257 = vpow2.f32 %v1097_v31 }
 0x3af   : > { %v1066_v39 = vmul.f32 1.442695, %v1061_v35  ;;  %v1099_v41 = vmul.f32 1.442695, %v1094_v36 }
 0x3b1   : > { %5259 = vpow2.f32 %v1066_v39  ;;  %v4157_v39 = vld [vmem:[%s6647_s3 + $0x1a0] sm:$0xff] }
 0x3b2   : > { %5261 = vpow2.f32 %v1099_v41  ;;  %v4158_v41 = vld [vmem:[%s6647_s3 + $0x1a8] sm:$0xff] }
 0x3b3   : > { %v5252_v28 = vpop.eup %5251 }
 0x3b4   : > { %v5254_v29 = vpop.eup %5253  ;;  %v1068_v42 = vsel %vm1048_vm6, %v5252_v28, 0.0 }
 0x3b5   : > { %1069 = vadd.xlane.f32.xlu1 %v1068_v42  ;;  %v1101_v37 = vsel %vm1048_vm6, %v5254_v29, 0.0  ;;  %v4160_v42 = vld [vmem:[%s6647_s3 + $0x1b8] sm:$0xff] }
 0x3b6   : > { %1102 = vadd.xlane.f32.xlu0 %v1101_v37 }
 0x3b7   : > { %v5256_v38 = vpop.eup %5255 }
 0x3b8   : > { %v5258_v43 = vpop.eup %5257  ;;  %v1071_v44 = vsel %vm1048_vm6, %v5256_v38, 0.0 }
 0x3b9   : > { %1072 = vadd.xlane.f32.xlu1 %v1071_v44  ;;  %v1104_v45 = vsel %vm1048_vm6, %v5258_v43, 0.0 }
 0x3ba   : > { %1105 = vadd.xlane.f32.xlu0 %v1104_v45 }
 0x3bb   : > { %v5260_v46 = vpop.eup %5259 }
 0x3bc   : > { %v5262_v47 = vpop.eup %5261  ;;  %v1074_v48 = vsel %vm1055_vm7, %v5260_v46, 0.0 }
 0x3bd   : > { %1075 = vadd.xlane.f32.xlu1 %v1074_v48  ;;  %v1107_v49 = vsel %vm1055_vm7, %v5262_v47, 0.0 }
 0x3be   : > { %1108 = vadd.xlane.f32.xlu0 %v1107_v49  ;;  %v4162_v49 = vld [vmem:[%s6648_s4 + $0xd] ss:$0 sm:$0xff] }
 0x442   : > { %v1070_v50 = vpop.xlane.xlu1 %1069 }
 0x443   : > { %5263 = vrcp.f32 %v1070_v50  ;;  %v1103_v51 = vpop.xlane.xlu0 %1102 }
 0x444   : > { %5265 = vrcp.f32 %v1103_v51 }
 0x446   : > { %v1073_v53 = vpop.xlane.xlu1 %1072 }
 0x447   : > { %5267 = vrcp.f32 %v1073_v53  ;;  %v1106_v56 = vpop.xlane.xlu0 %1105 }
 0x448   : > { %5269 = vrcp.f32 %v1106_v56 }
 0x44a   : > { %v1076_v58 = vpop.xlane.xlu1 %1075 }
 0x44b   : > { %5271 = vrcp.f32 %v1076_v58  ;;  %v1109_v59 = vpop.xlane.xlu0 %1108 }
 0x44c   : > { %5273 = vrcp.f32 %v1109_v59 }
 0x44d   : > { %v5264_v60 = vpop.eup %5263 }
 0x44e   : > { %v5266_v62 = vpop.eup %5265  ;;  %v1078_v13 = vmul.f32 %v5264_v60, %v5252_v28  ;;  %v5128_v28 = vpack.c.bf16 %v4158_v41, %v4157_v39  ;;  %v4216_v39 = vld [vmem:[%s6647_s3 + $0x140] sm:$0xff]  ;;  %v4217_v41 = vld [vmem:[%s6647_s3 + $0x148] sm:$0xff] }
 0x44f   : > { %v1111_v6 = vmul.f32 %v5266_v62, %v5254_v29  ;;  %v4159_v29 = vld [vmem:[%s6647_s3 + $0x1b0] sm:$0xff] }
 0x450   : > { %v5131_v37 = vpack.c.bf16 %v4160_v42, %v4159_v29  ;;  %v4218_v29 = vld [vmem:[%s6647_s3 + $0x150] sm:$0xff]  ;;  %v4219_v42 = vld [vmem:[%s6647_s3 + $0x158] sm:$0xff] }
 0x451   : > { %v5268_v10 = vpop.eup %5267  ;;  %v1117_v16 = vmul.f32 %v5777_v1, %v1111_v6 }
 0x452   : > { %v5270_v17 = vpop.eup %5269  ;;  %v1080_v24 = vmul.f32 %v5268_v10, %v5256_v38  ;;  %v4135_v38 = vld [vmem:[%s6648_s4 + $0x1] ss:$0 sm:$0xff] }
 0x453   : > { %v1120_v19 = vsub.f32 %v1078_v13, %v1117_v16  ;;  %v1113_v20 = vmul.f32 %v5270_v17, %v5258_v43  ;;  %v1566_v43 = vadd.f32 %v5744_v61, %v5754_v4  ;;  %v1370_v63 = vadd.f32 %v4135_v38, %v5735_v52  ;;  %v4198_v13 = vld [vmem:[%s6647_s3 + $0x40] sm:$0xff]  ;;  %v4199_v16 = vld [vmem:[%s6647_s3 + $0x48] sm:$0xff] }
 0x454   : > { %v1375_v61 = vadd.f32 %v4135_v38, %v5737_v54  ;;  %v1380_v52 = vadd.f32 %v4135_v38, %v5739_v57  ;;  %v5151_v22 = vpack.c.bf16 %v4199_v16, %v4198_v13  ;;  %v4234_v38 = vld [vmem:[%s6647_s3 + $0x240] sm:$0xff] }
 0x455   : > { %v5272_v23 = vpop.eup %5271  ;;  %4670 = vmatmul.mubr.msk.f32.vlgmr.msra.gmra.mrb[18].mxu1 %vm1048_vm6, %v1120_v19  ;;  %v1118_v25 = vmul.f32 %v5777_v1, %v1113_v20 }
 0x456   : > { %v5274_v27 = vpop.eup %5273  ;;  %4672 = vmatprep.mubr.msk.f32.mxu1 %vm5364_vm2, %v5365_v34  ;;  %5117 = vmatpush3.bf16.msra.mxu1 %v5116_v18  ;;  %v1082_v33 = vmul.f32 %v5272_v23, %v5260_v46  ;;  %v4200_v23 = vld [vmem:[%s6647_s3 + $0x50] sm:$0xff] }
 0x457   : > { %v1121_v31 = vsub.f32 %v1080_v24, %v1118_v25  ;;  %5118 = vmatprep.subr.bf16.mxu1 %v5363_v26  ;;  %v1115_v32 = vmul.f32 %v5274_v27, %v5262_v47  ;;  %v4201_v24 = vld [vmem:[%s6647_s3 + $0x58] sm:$0xff] }
 0x459   : > { %4673 = vmatmul.mubr.msk.f32.gmra.mrb[20].mxu1 %vm1048_vm6, %v1121_v31  ;;  %v1119_v35 = vmul.f32 %v5777_v1, %v1115_v32 }
 0x45a   : > { %4675 = vmatprep.mubr.msk.f32.mxu1 %vm5364_vm2, %v5365_v34  ;;  %5120 = vmatpush3.bf16.msra.mxu1 %v5119_v30 }
 0x45b   : > { %v1122_v36 = vsub.f32 %v1082_v33, %v1119_v35  ;;  %5127 = vmatprep.subr.bf16.mxu1 %v5363_v26  ;;  %v5154_v33 = vpack.c.bf16 %v4201_v24, %v4200_v23 }
 0x45d   : > { %4676 = vmatmul.mubr.msk.f32.gmra.mrb[22].mxu1 %vm1048_vm6, %v1122_v36 }
 0x45e   : > { %4703 = vmatprep.mubr.msk.f32.mxu1 %vm5364_vm2, %v5365_v34 }
 0x461   : > { %4704 = vmatmul.mubr.msk.f32.vlgmr.msra.gmra.mrb[24].mxu1 %vm312_vm0, %v5490_v55 }
 0x462   : > { %5129 = vmatpush3.bf16.msra.mxu1 %v5128_v28  ;;  %4706 = vmatprep.mubr.msk.f32.mxu1 %vm5364_vm2, %v5365_v34  ;;  %v5163_v28 = vpack.c.bf16 %v4217_v41, %v4216_v39 }
 0x463   : > { %5130 = vmatprep.subr.bf16.mxu1 %v5363_v26 }
 0x465   : > { %4707 = vmatmul.mubr.msk.f32.gmra.mrb[26].mxu1 %vm312_vm0, %v5513_v3 }
 0x466   : > { %5132 = vmatpush3.bf16.msra.mxu1 %v5131_v37  ;;  %4709 = vmatprep.mubr.msk.f32.mxu1 %vm5364_vm2, %v5365_v34  ;;  %v5166_v37 = vpack.c.bf16 %v4219_v42, %v4218_v29  ;;  %v6030_v29 = vld [vmem:[%s6648_s4 + $0x12] ss:$0 sm:$0xff] }
 0x467   : > { %5139 = vmatprep.subr.bf16.mxu1 %v5363_v26 }
 0x469   : > { %4710 = vmatmul.mubr.msk.f32.gmra.mrb[28].mxu1 %vm312_vm0, %v5525_v5 }
 0x46a   : > { %4737 = vmatprep.mubr.msk.f32.mxu1 %vm5364_vm2, %v5365_v34 }
 0x46d   : > { %4738 = vmatmul.mubr.msk.f32.vlgmr.msra.gmra.mrb[30].mxu1 %vm312_vm0, %v5490_v55 }
 0x46e   : > { %4740 = vmatprep.mubr.msk.f32.mxu1 %vm5364_vm2, %v5365_v34 }
 0x46f   : > { %5142 = vmatpush3.bf16.xpose.msk.msra.mxu1 %vm5603_vm4, %v5140_v2 }
 0x470   : > { %4767 = vmatprep.subr.mxu1 %v5365_v34 }
 0x471   : > { %4741 = vmatmul.mubr.msk.f32.gmra.mrb[32].mxu1 %vm312_vm0, %v5513_v3 }
 0x472   : > { %4743 = vmatprep.mubr.msk.f32.mxu1 %vm5364_vm2, %v5365_v34 }
 0x475   : > { %4744 = vmatmul.mubr.msk.f32.gmra.mrb[34].mxu1 %vm312_vm0, %v5525_v5 }
 0x476   : > { %4769 = vmatprep.mubr.msk.f32.mxu1 %vm5364_vm2, %v5365_v34 }
 0x477   : > { %4768 = vmatpush3.xpose.msk.msra.mxu1 %vm845_vm3, %v1566_v43  ;;  %v4235_v43 = vld [vmem:[%s6647_s3 + $0x248] sm:$0xff] }
 0x478   : > { %5147 = vmatprep.subr.bf16.mxu1 %v5363_v26 }
 0x47a   : > { %4770 = vmatmul.mubr.msk.f32.vlgmr.msra.gmra.mrb[36].mxu1 %vm845_vm3, %v1370_v63  ;;  %v5175_v63 = vpack.c.bf16 %v4235_v43, %v4234_v38 }
 0x47b   : > { %5149 = vmatpush3.bf16.msra.mxu1 %v5148_v14  ;;  %4772 = vmatprep.mubr.msk.f32.mxu1 %vm5364_vm2, %v5365_v34 }
 0x47c   : > { %4797 = vmatprep.subr.mxu1 %v5365_v34 }
 0x47e   : > { %4773 = vmatmul.mubr.msk.f32.gmra.mrb[38].mxu1 %vm845_vm3, %v1375_v61  ;;  %v4236_v61 = vld [vmem:[%s6647_s3 + $0x250] sm:$0xff] }
 0x47f   : > { %4798 = vmatpush3.msk.msra.mxu1 %vm1132_vm5, %v1752_v0  ;;  %4775 = vmatprep.mubr.msk.f32.mxu1 %vm5364_vm2, %v5365_v34  ;;  %v4237_v0 = vld [vmem:[%s6647_s3 + $0x258] sm:$0xff] }
 0x480   : > { %5156 = vmatprep.subr.bf16.mxu1 %v5363_v26 }
 0x482   : > { %4776 = vmatmul.mubr.msk.f32.gmra.mrb[40].mxu1 %vm845_vm3, %v1380_v52  ;;  %v5178_v52 = vpack.c.bf16 %v4237_v0, %v4236_v61 }
 0x483   : > { %4799 = vmatprep.mubr.msk.f32.mxu1 %vm5364_vm2, %v5365_v34 }
 0x528   : > { %v5876_v54 = vpop.f32.mrb[18].mxu1 }
 0x529   : > { %v4671_v2 = vpop.f32.mrb[19].mxu1 }
 0x52c   : > { %v5878_v4 = vpop.f32.mrb[20].mxu1 }
 0x52d   : > { %v4674_v9 = vpop.f32.mrb[21].mxu1 }
 0x530   : > { %v5880_v11 = vpop.f32.mrb[22].mxu1 }
 0x531   : > { %v4677_v12 = vpop.f32.mrb[23].mxu1 }
 0x534   : > { %v1462_v14 = vpop.f32.mrb[24].mxu1 }
 0x535   : > { %v4705_v15 = vpop.f32.mrb[25].mxu1  ;;  %v1463_v19 = vadd.f32 %v4144_v8, %v1462_v14 }
 0x538   : > { %v1467_v44 = vpop.f32.mrb[26].mxu1 }
 0x539   : > { %v4708_v57 = vpop.f32.mrb[27].mxu1  ;;  %v1468_v30 = vadd.f32 %v4144_v8, %v1467_v44 }
 0x53c   : > { %v1472_v45 = vpop.f32.mrb[28].mxu1 }
 0x53d   : > { %v4711_v46 = vpop.f32.mrb[29].mxu1  ;;  %v1473_v36 = vadd.f32 %v4144_v8, %v1472_v45 }
 0x540   : > { %v1648_v47 = vpop.f32.mrb[30].mxu1 }
 0x541   : > { %v4739_v48 = vpop.f32.mrb[31].mxu1  ;;  %v1649_v51 = vadd.f32 %v4162_v49, %v1648_v47 }
 0x544   : > { %v1653_v50 = vpop.f32.mrb[32].mxu1 }
 0x545   : > { %v1654_v53 = vadd.f32 %v4162_v49, %v1653_v50  ;;  %v4742_v56 = vpop.f32.mrb[33].mxu1 }
 0x547   : > { %v5144_v58 = vpack.c.bf16 %v1654_v53, %v1649_v51 }
 0x548   : > { %v1658_v59 = vpop.f32.mrb[34].mxu1 }
 0x549   : > { %v4745_v60 = vpop.f32.mrb[35].mxu1  ;;  %5146 = vmatpush3.bf16.xpose.msk.msra.mxu0 %vm5603_vm4, %v5144_v58  ;;  %v1659_v10 = vadd.f32 %v4162_v49, %v1658_v59 }
 0x54a   : > { %4782 = vmatprep.subr.mxu0 %v5365_v34 }
 0x54d   : > { %v1839_v62 = vpop.f32.mrb[36].mxu1 }
 0x54e   : > { %v5888_v6 = vmul.f32 0.35355338, %v1839_v62  ;;  %v4771_v7 = vpop.f32.mrb[37].mxu1 }
 0x550   : > { %v1957_v17 = vsel %vm1048_vm6, %v5888_v6, -inf }
 0x551   : > { %1958 = vmax.xlane.f32.xlu1 %v1957_v17  ;;  %v1844_v18 = vpop.f32.mrb[38].mxu1  ;;  %4783 = vmatpush3.xpose.msk.msra.mxu0 %vm845_vm3, %v1659_v10 }
 0x552   : > { %v5902_v20 = vmul.f32 0.35355338, %v1844_v18  ;;  %v4774_v21 = vpop.f32.mrb[39].mxu1  ;;  %5150 = vmatprep.subr.bf16.mxu0 %v5363_v26 }
 0x554   : > { %4785 = vmatmul.mubr.msk.f32.vlgmr.msra.gmra.mrb[42].mxu0 %vm845_vm3, %v1463_v19  ;;  %v1960_v25 = vsel %vm1048_vm6, %v5902_v20, -inf }
 0x555   : > { %1961 = vmax.xlane.f32.xlu1 %v1960_v25  ;;  %v1849_v27 = vpop.f32.mrb[40].mxu1  ;;  %4787 = vmatprep.mubr.msk.f32.mxu0 %vm5364_vm2, %v5365_v34 }
 0x556   : > { %v1855_v31 = vmul.f32 0.35355338, %v1849_v27  ;;  %v4777_v32 = vpop.f32.mrb[41].mxu1  ;;  %5152 = vmatpush3.bf16.msra.mxu0 %v5151_v22  ;;  %v6015_v27 = vld [vmem:[%s6648_s4 + $0xa] ss:$0 sm:$0xff] }
 0x557   : > { %5153 = vmatprep.subr.bf16.mxu0 %v5363_v26 }
 0x558   : > { %4788 = vmatmul.mubr.msk.f32.gmra.mrb[44].mxu0 %vm845_vm3, %v1468_v30  ;;  %v1963_v35 = vsel %vm1055_vm7, %v1855_v31, -inf }
 0x559   : > { %1964 = vmax.xlane.f32.xlu1 %v1963_v35  ;;  %4790 = vmatprep.mubr.msk.f32.mxu0 %vm5364_vm2, %v5365_v34 }
 0x55a   : > { %5155 = vmatpush3.bf16.msra.mxu0 %v5154_v33 }
 0x55b   : > { %5162 = vmatprep.subr.bf16.mxu0 %v5363_v26 }
 0x55c   : > { %4791 = vmatmul.mubr.msk.f32.gmra.mrb[46].mxu0 %vm845_vm3, %v1473_v36 }
 0x55d   : > { %4816 = vmatprep.mubr.msk.f32.mxu0 %vm5364_vm2, %v5365_v34 }
 0x560   : > { %4817 = vmatmul.mubr.msk.f32.vlgmr.msra.gmra.mrb[48].mxu0 %vm312_vm0, %v5490_v55 }
 0x561   : > { %4819 = vmatprep.mubr.msk.f32.mxu0 %vm5364_vm2, %v5365_v34  ;;  %5164 = vmatpush3.bf16.msra.mxu0 %v5163_v28 }
 0x562   : > { %5165 = vmatprep.subr.bf16.mxu0 %v5363_v26 }
 0x564   : > { %4820 = vmatmul.mubr.msk.f32.gmra.mrb[50].mxu0 %vm312_vm0, %v5513_v3 }
 0x565   : > { %4822 = vmatprep.mubr.msk.f32.mxu0 %vm5364_vm2, %v5365_v34  ;;  %5167 = vmatpush3.bf16.msra.mxu0 %v5166_v37 }
 0x566   : > { %5174 = vmatprep.subr.bf16.mxu0 %v5363_v26 }
 0x568   : > { %4823 = vmatmul.mubr.msk.f32.gmra.mrb[52].mxu0 %vm312_vm0, %v5525_v5 }
 0x569   : > { %4850 = vmatprep.mubr.msk.f32.mxu0 %vm5364_vm2, %v5365_v34 }
 0x56c   : > { %4851 = vmatmul.mubr.msk.f32.vlgmr.msra.gmra.mrb[54].mxu0 %vm312_vm0, %v5490_v55 }
 0x56d   : > { %4853 = vmatprep.mubr.msk.f32.mxu0 %vm5364_vm2, %v5365_v34  ;;  %5176 = vmatpush3.bf16.msra.mxu0 %v5175_v63 }
 0x56e   : > { %5177 = vmatprep.subr.bf16.mxu0 %v5363_v26 }
 0x570   : > { %4854 = vmatmul.mubr.msk.f32.gmra.mrb[56].mxu0 %vm312_vm0, %v5513_v3 }
 0x571   : > { %4856 = vmatprep.mubr.msk.f32.mxu0 %vm5364_vm2, %v5365_v34  ;;  %5179 = vmatpush3.bf16.msra.mxu0 %v5178_v52 }
 0x572   : > { %5184 = vmatprep.subr.bf16.mxu0 %v5363_v26 }
 0x574   : > { %4857 = vmatmul.mubr.msk.f32.gmra.mrb[58].mxu0 %vm312_vm0, %v5525_v5 }
 0x575   : > { %4884 = vmatprep.mubr.msk.f32.mxu0 %vm5364_vm2, %v5365_v34 }
 0x578   : > { %4885 = vmatmul.mubr.msk.f32.vlgmr.msra.gmra.mrb[60].mxu0 %vm312_vm0, %v5490_v55 }
 0x579   : > { %4887 = vmatprep.mubr.msk.f32.mxu0 %vm5364_vm2, %v5365_v34 }
 0x57c   : > { %4888 = vmatmul.mubr.msk.f32.gmra.mrb[62].mxu0 %vm312_vm0, %v5513_v3 }
 0x57d   : > { %4890 = vmatprep.mubr.msk.f32.mxu0 %vm5364_vm2, %v5365_v34 }
 0x580   : > { %4891 = vmatmul.mubr.msk.f32.gmra.mrb[64].mxu0 %vm312_vm0, %v5525_v5 }
 0x581   : > { %4914 = vmatprep.mubr.msk.f32.mxu0 %vm5364_vm2, %v5365_v34 }
 0x5de   : > { %v1959_v2 = vpop.xlane.xlu1 %1958 }
 0x5df   : > { %v1966_v9 = vsub.f32 %v5888_v6, %v1959_v2 }
 0x5e1   : > { %v1969_v12 = vmul.f32 1.442695, %v1966_v9 }
 0x5e2   : > { %v1962_v14 = vpop.xlane.xlu1 %1961 }
 0x5e3   : > { %5275 = vpow2.f32 %v1969_v12  ;;  %v1967_v15 = vsub.f32 %v5902_v20, %v1962_v14 }
 0x5e5   : > { %v1971_v44 = vmul.f32 1.442695, %v1967_v15 }
 0x5e6   : > { %v1965_v57 = vpop.xlane.xlu1 %1964 }
 0x5e7   : > { %5277 = vpow2.f32 %v1971_v44  ;;  %v1968_v45 = vsub.f32 %v1855_v31, %v1965_v57 }
 0x5e9   : > { %v1973_v46 = vmul.f32 1.442695, %v1968_v45 }
 0x5eb   : > { %5279 = vpow2.f32 %v1973_v46 }
 0x5ed   : > { %v5991_v47 = vpop.eup %5275 }
 0x5ee   : > { %v1975_v48 = vsel %vm1048_vm6, %v5991_v47, 0.0 }
 0x5ef   : > { %1976 = vadd.xlane.f32.xlu1 %v1975_v48 }
 0x5f1   : > { %v5995_v49 = vpop.eup %5277 }
 0x5f2   : > { %v1978_v50 = vsel %vm1048_vm6, %v5995_v49, 0.0 }
 0x5f3   : > { %1979 = vadd.xlane.f32.xlu1 %v1978_v50 }
 0x5f5   : > { %v5999_v51 = vpop.eup %5279 }
 0x5f6   : > { %v1981_v53 = vsel %vm1055_vm7, %v5999_v51, 0.0 }
 0x5f7   : > { %1982 = vadd.xlane.f32.xlu1 %v1981_v53 }
 0x627   : > { %v1940_v56 = vpop.f32.mrb[42].mxu0 }
 0x628   : > { %v1954_v58 = vmul.f32 0.35355338, %v1940_v56  ;;  %v4786_v59 = vpop.f32.mrb[43].mxu0 }
 0x62a   : > { %v1990_v60 = vsel %vm1048_vm6, %v1954_v58, -inf }
 0x62b   : > { %1991 = vmax.xlane.f32.xlu0 %v1990_v60  ;;  %v1945_v62 = vpop.f32.mrb[44].mxu0 }
 0x62c   : > { %v1955_v6 = vmul.f32 0.35355338, %v1945_v62  ;;  %v4789_v7 = vpop.f32.mrb[45].mxu0 }
 0x62e   : > { %v1993_v8 = vsel %vm1048_vm6, %v1955_v6, -inf }
 0x62f   : > { %1994 = vmax.xlane.f32.xlu0 %v1993_v8  ;;  %v1950_v10 = vpop.f32.mrb[46].mxu0 }
 0x630   : > { %v1956_v13 = vmul.f32 0.35355338, %v1950_v10  ;;  %v4792_v16 = vpop.f32.mrb[47].mxu0 }
 0x632   : > { %v1996_v17 = vsel %vm1055_vm7, %v1956_v13, -inf }
 0x633   : > { %1997 = vmax.xlane.f32.xlu0 %v1996_v17  ;;  %v6006_v18 = vpop.f32.mrb[48].mxu0  ;;  %v4207_v17 = vld [vmem:[%s6647_s3 + $0xc0] sm:$0xff] }
 0x634   : > { %v4818_v19 = vpop.f32.mrb[49].mxu0 }
 0x635   : > { %v4208_v19 = vld [vmem:[%s6647_s3 + $0xc8] sm:$0xff] }
 0x637   : > { %v6008_v20 = vpop.f32.mrb[50].mxu0 }
 0x638   : > { %v4821_v21 = vpop.f32.mrb[51].mxu0 }
 0x63b   : > { %v6010_v22 = vpop.f32.mrb[52].mxu0 }
 0x63c   : > { %v4824_v23 = vpop.f32.mrb[53].mxu0 }
 0x63f   : > { %v2461_v24 = vpop.f32.mrb[54].mxu0 }
 0x640   : > { %v4852_v25 = vpop.f32.mrb[55].mxu0  ;;  %v6018_v31 = vadd.f32 %v6015_v27, %v2461_v24 }
 0x643   : > { %v2466_v30 = vpop.f32.mrb[56].mxu0 }
 0x644   : > { %v6021_v32 = vadd.f32 %v6015_v27, %v2466_v30  ;;  %v4855_v33 = vpop.f32.mrb[57].mxu0  ;;  %v5157_v30 = vpack.c.bf16 %v4208_v19, %v4207_v17 }
 0x646   : > { %v5181_v35 = vpack.c.bf16 %v6021_v32, %v6018_v31 }
 0x647   : > { %v6025_v36 = vpop.f32.mrb[58].mxu0 }
 0x648   : > { %v4858_v39 = vpop.f32.mrb[59].mxu0 }
 0x64b   : > { %v2647_v41 = vpop.f32.mrb[60].mxu0 }
 0x64c   : > { %v4886_v28 = vpop.f32.mrb[61].mxu0  ;;  %v6033_v37 = vadd.f32 %v6030_v29, %v2647_v41  ;;  %v4209_v41 = vld [vmem:[%s6647_s3 + $0xd0] sm:$0xff] }
 0x64d   : > { %v4210_v28 = vld [vmem:[%s6647_s3 + $0xd8] sm:$0xff] }
 0x64f   : > { %v2652_v42 = vpop.f32.mrb[62].mxu0 }
 0x650   : > { %v6036_v38 = vadd.f32 %v6030_v29, %v2652_v42  ;;  %v4889_v43 = vpop.f32.mrb[63].mxu0 }
 0x652   : > { %v5189_v63 = vpack.c.bf16 %v6036_v38, %v6033_v37 }
 0x653   : > { %v6040_v61 = vpop.f32.mrb[64].mxu0 }
 0x654   : > { %v4892_v0 = vpop.f32.mrb[65].mxu0  ;;  %v2658_v32 = vadd.f32 %v6030_v29, %v6040_v61 }
 0x67c   : > { %v1977_v59 = vpop.xlane.xlu1 %1976 }
 0x680   : > { %v1980_v60 = vpop.xlane.xlu1 %1979 }
 0x684   : > { %v1983_v7 = vpop.xlane.xlu1 %1982 }
 0x6b8   : > { %v1992_v52 = vpop.xlane.xlu0 %1991 }
 0x6b9   : > { %v1999_v2 = vsub.f32 %v1954_v58, %v1992_v52  ;;  %v5160_v52 = vpack.c.bf16 %v4210_v28, %v4209_v41 }
 0x6bb   : > { %v2002_v9 = vmul.f32 1.442695, %v1999_v2 }
 0x6bc   : > { %v1995_v12 = vpop.xlane.xlu0 %1994 }
 0x6bd   : > { %5281 = vpow2.f32 %v2002_v9  ;;  %v2000_v14 = vsub.f32 %v1955_v6, %v1995_v12 }
 0x6bf   : > { %v2004_v15 = vmul.f32 1.442695, %v2000_v14 }
 0x6c0   : > { %v1998_v44 = vpop.xlane.xlu0 %1997 }
 0x6c1   : > { %5283 = vpow2.f32 %v2004_v15  ;;  %v2001_v57 = vsub.f32 %v1956_v13, %v1998_v44  ;;  %v4225_v15 = vld [vmem:[%s6647_s3 + $0x1c0] sm:$0xff]  ;;  %v4226_v44 = vld [vmem:[%s6647_s3 + $0x1c8] sm:$0xff] }
 0x6c3   : > { %v2006_v45 = vmul.f32 1.442695, %v2001_v57  ;;  %v4227_v57 = vld [vmem:[%s6647_s3 + $0x1d0] sm:$0xff] }
 0x6c5   : > { %5285 = vpow2.f32 %v2006_v45  ;;  %v4228_v45 = vld [vmem:[%s6647_s3 + $0x1d8] sm:$0xff] }
 0x6c6   : > { %5287 = vrcp.f32 %v1977_v59 }
 0x6c7   : > { %v5282_v46 = vpop.eup %5281 }
 0x6c8   : > { %v2008_v48 = vsel %vm1048_vm6, %v5282_v46, 0.0 }
 0x6c9   : > { %2009 = vadd.xlane.f32.xlu0 %v2008_v48  ;;  %v4203_v48 = vld [vmem:[%s6648_s4 + $0x2] ss:$0 sm:$0xff] }
 0x6ca   : > { %v2276_v31 = vadd.f32 %v4203_v48, %v6006_v18  ;;  %v2286_v18 = vadd.f32 %v4203_v48, %v6010_v22 }
 0x6cb   : > { %v5284_v50 = vpop.eup %5283 }
 0x6cc   : > { %v2011_v53 = vsel %vm1048_vm6, %v5284_v50, 0.0 }
 0x6cd   : > { %2012 = vadd.xlane.f32.xlu0 %v2011_v53 }
 0x6cf   : > { %v5286_v56 = vpop.eup %5285 }
 0x6d0   : > { %v2014_v58 = vsel %vm1055_vm7, %v5286_v56, 0.0  ;;  %v5288_v10 = vpop.eup %5287 }
 0x6d1   : > { %2015 = vadd.xlane.f32.xlu0 %v2014_v58  ;;  %v1985_v23 = vmul.f32 %v5288_v10, %v5991_v47 }
 0x756   : > { %v2010_v62 = vpop.xlane.xlu0 %2009 }
 0x757   : > { %5289 = vrcp.f32 %v2010_v62  ;;  %v4230_v62 = vld [vmem:[%s6648_s4 + $0xe] ss:$0 sm:$0xff] }
 0x758   : > { %5291 = vrcp.f32 %v1980_v60 }
 0x75a   : > { %v2013_v6 = vpop.xlane.xlu0 %2012 }
 0x75b   : > { %5293 = vrcp.f32 %v2013_v6 }
 0x75c   : > { %5295 = vrcp.f32 %v1983_v7 }
 0x75e   : > { %v2016_v8 = vpop.xlane.xlu0 %2015 }
 0x75f   : > { %5297 = vrcp.f32 %v2016_v8 }
 0x761   : > { %v5290_v13 = vpop.eup %5289 }
 0x762   : > { %v2018_v16 = vmul.f32 %v5290_v13, %v5282_v46  ;;  %v5292_v21 = vpop.eup %5291  ;;  %v5172_v46 = vpack.c.bf16 %v4228_v45, %v4227_v57  ;;  %v4284_v57 = vld [vmem:[%s6647_s3 + $0x160] sm:$0xff]  ;;  %v4285_v45 = vld [vmem:[%s6647_s3 + $0x168] sm:$0xff] }
 0x763   : > { %v1987_v43 = vmul.f32 %v5292_v21, %v5995_v49 }
 0x764   : > { %v2023_v24 = vmul.f32 %v2018_v16, %v5777_v1 }
 0x765   : > { %v5294_v25 = vpop.eup %5293 }
 0x766   : > { %v2026_v33 = vsub.f32 %v1985_v23, %v2023_v24  ;;  %v2020_v39 = vmul.f32 %v5294_v25, %v5284_v50  ;;  %v5296_v42 = vpop.eup %5295  ;;  %v2472_v50 = vadd.f32 %v6015_v27, %v6025_v36  ;;  %v2281_v27 = vadd.f32 %v4203_v48, %v6008_v20  ;;  %v4212_v24 = vld [vmem:[%s6648_s4 + $0x6] ss:$0 sm:$0xff]  ;;  %v4286_v48 = vld [vmem:[%s6647_s3 + $0x170] sm:$0xff] }
 0x767   : > { %v1989_v12 = vmul.f32 %v5296_v42, %v5999_v51  ;;  %v5169_v51 = vpack.c.bf16 %v4226_v44, %v4225_v15 }
 0x768   : > { %4800 = vmatmul.mubr.msk.f32.vlgmr.msra.gmra.mrb[42].mxu1 %vm1048_vm6, %v2026_v33  ;;  %v2024_v47 = vmul.f32 %v2020_v39, %v5777_v1  ;;  %v4267_v33 = vld [vmem:[%s6647_s3 + $0x68] sm:$0xff] }
 0x769   : > { %v5298_v0 = vpop.eup %5297  ;;  %4802 = vmatprep.mubr.msk.f32.mxu1 %vm5364_vm2, %v5365_v34  ;;  %5158 = vmatpush3.bf16.msra.mxu1 %v5157_v30  ;;  %v4266_v30 = vld [vmem:[%s6647_s3 + $0x60] sm:$0xff] }
 0x76a   : > { %v2027_v2 = vsub.f32 %v1987_v43, %v2024_v47  ;;  %5159 = vmatprep.subr.bf16.mxu1 %v5363_v26  ;;  %v2022_v9 = vmul.f32 %v5298_v0, %v5286_v56  ;;  %v5192_v47 = vpack.c.bf16 %v4267_v33, %v4266_v30  ;;  %v4268_v0 = vld [vmem:[%s6647_s3 + $0x70] sm:$0xff] }
 0x76c   : > { %4803 = vmatmul.mubr.msk.f32.gmra.mrb[44].mxu1 %vm1048_vm6, %v2027_v2  ;;  %v2025_v14 = vmul.f32 %v2022_v9, %v5777_v1 }
 0x76d   : > { %4805 = vmatprep.mubr.msk.f32.mxu1 %vm5364_vm2, %v5365_v34  ;;  %5161 = vmatpush3.bf16.msra.mxu1 %v5160_v52  ;;  %v4269_v52 = vld [vmem:[%s6647_s3 + $0x78] sm:$0xff] }
 0x76e   : > { %v2028_v49 = vsub.f32 %v1989_v12, %v2025_v14  ;;  %5168 = vmatprep.subr.bf16.mxu1 %v5363_v26  ;;  %v5195_v15 = vpack.c.bf16 %v4269_v52, %v4268_v0 }
 0x770   : > { %4806 = vmatmul.mubr.msk.f32.gmra.mrb[46].mxu1 %vm1048_vm6, %v2028_v49 }
 0x771   : > { %4833 = vmatprep.mubr.msk.f32.mxu1 %vm5364_vm2, %v5365_v34 }
 0x774   : > { %4834 = vmatmul.mubr.msk.f32.vlgmr.msra.gmra.mrb[48].mxu1 %vm312_vm0, %v5490_v55 }
 0x775   : > { %5170 = vmatpush3.bf16.msra.mxu1 %v5169_v51  ;;  %4836 = vmatprep.mubr.msk.f32.mxu1 %vm5364_vm2, %v5365_v34 }
 0x776   : > { %5171 = vmatprep.subr.bf16.mxu1 %v5363_v26 }
 0x778   : > { %4837 = vmatmul.mubr.msk.f32.gmra.mrb[50].mxu1 %vm312_vm0, %v5513_v3 }
 0x779   : > { %5173 = vmatpush3.bf16.msra.mxu1 %v5172_v46  ;;  %4839 = vmatprep.mubr.msk.f32.mxu1 %vm5364_vm2, %v5365_v34  ;;  %v5204_v46 = vpack.c.bf16 %v4285_v45, %v4284_v57 }
 0x77a   : > { %5180 = vmatprep.subr.bf16.mxu1 %v5363_v26 }
 0x77c   : > { %4840 = vmatmul.mubr.msk.f32.gmra.mrb[52].mxu1 %vm312_vm0, %v5525_v5 }
 0x77d   : > { %4867 = vmatprep.mubr.msk.f32.mxu1 %vm5364_vm2, %v5365_v34 }
 0x780   : > { %4868 = vmatmul.mubr.msk.f32.vlgmr.msra.gmra.mrb[54].mxu1 %vm312_vm0, %v5490_v55 }
 0x781   : > { %4870 = vmatprep.mubr.msk.f32.mxu1 %vm5364_vm2, %v5365_v34 }
 0x782   : > { %5183 = vmatpush3.bf16.xpose.msk.msra.mxu1 %vm5603_vm4, %v5181_v35 }
 0x783   : > { %4897 = vmatprep.subr.mxu1 %v5365_v34 }
 0x784   : > { %4871 = vmatmul.mubr.msk.f32.gmra.mrb[56].mxu1 %vm312_vm0, %v5513_v3 }
 0x785   : > { %4873 = vmatprep.mubr.msk.f32.mxu1 %vm5364_vm2, %v5365_v34 }
 0x788   : > { %4874 = vmatmul.mubr.msk.f32.gmra.mrb[58].mxu1 %vm312_vm0, %v5525_v5 }
 0x789   : > { %4899 = vmatprep.mubr.msk.f32.mxu1 %vm5364_vm2, %v5365_v34 }
 0x78a   : > { %4898 = vmatpush3.xpose.msk.msra.mxu1 %vm845_vm3, %v2472_v50  ;;  %v4287_v50 = vld [vmem:[%s6647_s3 + $0x178] sm:$0xff] }
 0x78b   : > { %5188 = vmatprep.subr.bf16.mxu1 %v5363_v26 }
 0x78d   : > { %4900 = vmatmul.mubr.msk.f32.vlgmr.msra.gmra.mrb[60].mxu1 %vm845_vm3, %v2276_v31  ;;  %v5207_v31 = vpack.c.bf16 %v4287_v50, %v4286_v48 }
 0x78e   : > { %5190 = vmatpush3.bf16.msra.mxu1 %v5189_v63  ;;  %4902 = vmatprep.mubr.msk.f32.mxu1 %vm5364_vm2, %v5365_v34 }
 0x78f   : > { %4927 = vmatprep.subr.mxu1 %v5365_v34 }
 0x791   : > { %4903 = vmatmul.mubr.msk.f32.gmra.mrb[62].mxu1 %vm845_vm3, %v2281_v27  ;;  %v4302_v27 = vld [vmem:[%s6647_s3 + $0x260] sm:$0xff] }
 0x792   : > { %4928 = vmatpush3.msk.msra.mxu1 %vm1132_vm5, %v2658_v32  ;;  %4905 = vmatprep.mubr.msk.f32.mxu1 %vm5364_vm2, %v5365_v34  ;;  %v4303_v32 = vld [vmem:[%s6647_s3 + $0x268] sm:$0xff] }
 0x793   : > { %5197 = vmatprep.subr.bf16.mxu1 %v5363_v26 }
 0x795   : > { %4906 = vmatmul.mubr.msk.f32.gmra.mrb[64].mxu1 %vm845_vm3, %v2286_v18  ;;  %v5216_v18 = vpack.c.bf16 %v4303_v32, %v4302_v27  ;;  %v6299_v27 = vld [vmem:[%s6648_s4 + $0x13] ss:$0 sm:$0xff] }
 0x796   : > { %4929 = vmatprep.mubr.msk.f32.mxu1 %vm5364_vm2, %v5365_v34 }
 0x83b   : > { %v6145_v20 = vpop.f32.mrb[42].mxu1 }
 0x83c   : > { %v4801_v35 = vpop.f32.mrb[43].mxu1 }
 0x83d   : > { %v4304_v35 = vld [vmem:[%s6647_s3 + $0x270] sm:$0xff] }
 0x83f   : > { %v6147_v36 = vpop.f32.mrb[44].mxu1 }
 0x840   : > { %v4804_v29 = vpop.f32.mrb[45].mxu1 }
 0x841   : > { %v4305_v29 = vld [vmem:[%s6647_s3 + $0x278] sm:$0xff] }
 0x843   : > { %v6149_v37 = vpop.f32.mrb[46].mxu1 }
 0x844   : > { %v4807_v38 = vpop.f32.mrb[47].mxu1 }
 0x845   : > { %v5219_v38 = vpack.c.bf16 %v4305_v29, %v4304_v35 }
 0x847   : > { %v2368_v63 = vpop.f32.mrb[48].mxu1 }
 0x848   : > { %v4835_v61 = vpop.f32.mrb[49].mxu1  ;;  %v2369_v28 = vadd.f32 %v4212_v24, %v2368_v63 }
 0x84b   : > { %v2373_v53 = vpop.f32.mrb[50].mxu1 }
 0x84c   : > { %v4838_v22 = vpop.f32.mrb[51].mxu1  ;;  %v2374_v12 = vadd.f32 %v4212_v24, %v2373_v53 }
 0x84f   : > { %v2378_v56 = vpop.f32.mrb[52].mxu1 }
 0x850   : > { %v4841_v58 = vpop.f32.mrb[53].mxu1  ;;  %v2379_v51 = vadd.f32 %v4212_v24, %v2378_v56 }
 0x853   : > { %v2554_v59 = vpop.f32.mrb[54].mxu1 }
 0x854   : > { %v4869_v60 = vpop.f32.mrb[55].mxu1  ;;  %v2555_v7 = vadd.f32 %v4230_v62, %v2554_v59 }
 0x857   : > { %v2559_v6 = vpop.f32.mrb[56].mxu1 }
 0x858   : > { %v2560_v8 = vadd.f32 %v4230_v62, %v2559_v6  ;;  %v4872_v10 = vpop.f32.mrb[57].mxu1 }
 0x85a   : > { %v5185_v13 = vpack.c.bf16 %v2560_v8, %v2555_v7 }
 0x85b   : > { %v2564_v16 = vpop.f32.mrb[58].mxu1 }
 0x85c   : > { %v4875_v17 = vpop.f32.mrb[59].mxu1  ;;  %5187 = vmatpush3.bf16.xpose.msk.msra.mxu0 %vm5603_vm4, %v5185_v13  ;;  %v2565_v25 = vadd.f32 %v4230_v62, %v2564_v16 }
 0x85d   : > { %4912 = vmatprep.subr.mxu0 %v5365_v34 }
 0x860   : > { %v2745_v19 = vpop.f32.mrb[60].mxu1 }
 0x861   : > { %v6157_v21 = vmul.f32 0.35355338, %v2745_v19  ;;  %v4901_v23 = vpop.f32.mrb[61].mxu1 }
 0x863   : > { %v2863_v39 = vsel %vm1048_vm6, %v6157_v21, -inf }
 0x864   : > { %2864 = vmax.xlane.f32.xlu1 %v2863_v39  ;;  %v2750_v41 = vpop.f32.mrb[62].mxu1  ;;  %4913 = vmatpush3.xpose.msk.msra.mxu0 %vm845_vm3, %v2565_v25 }
 0x865   : > { %v6171_v42 = vmul.f32 0.35355338, %v2750_v41  ;;  %v4904_v43 = vpop.f32.mrb[63].mxu1  ;;  %5191 = vmatprep.subr.bf16.mxu0 %v5363_v26 }
 0x867   : > { %4915 = vmatmul.mubr.msk.f32.vlgmr.msra.gmra.mrb[66].mxu0 %vm845_vm3, %v2369_v28  ;;  %v2866_v2 = vsel %vm1048_vm6, %v6171_v42, -inf }
 0x868   : > { %2867 = vmax.xlane.f32.xlu1 %v2866_v2  ;;  %v2755_v9 = vpop.f32.mrb[64].mxu1  ;;  %4917 = vmatprep.mubr.msk.f32.mxu0 %vm5364_vm2, %v5365_v34 }
 0x869   : > { %v2761_v14 = vmul.f32 0.35355338, %v2755_v9  ;;  %v4907_v49 = vpop.f32.mrb[65].mxu1  ;;  %5193 = vmatpush3.bf16.msra.mxu0 %v5192_v47 }
 0x86a   : > { %5194 = vmatprep.subr.bf16.mxu0 %v5363_v26  ;;  %v6284_v49 = vld [vmem:[%s6648_s4 + $0xb] ss:$0 sm:$0xff] }
 0x86b   : > { %4918 = vmatmul.mubr.msk.f32.gmra.mrb[68].mxu0 %vm845_vm3, %v2374_v12  ;;  %v2869_v44 = vsel %vm1055_vm7, %v2761_v14, -inf }
 0x86c   : > { %2870 = vmax.xlane.f32.xlu1 %v2869_v44  ;;  %4920 = vmatprep.mubr.msk.f32.mxu0 %vm5364_vm2, %v5365_v34 }
 0x86d   : > { %5196 = vmatpush3.bf16.msra.mxu0 %v5195_v15 }
 0x86e   : > { %5203 = vmatprep.subr.bf16.mxu0 %v5363_v26 }
 0x86f   : > { %4921 = vmatmul.mubr.msk.f32.gmra.mrb[70].mxu0 %vm845_vm3, %v2379_v51 }
 0x870   : > { %4946 = vmatprep.mubr.msk.f32.mxu0 %vm5364_vm2, %v5365_v34 }
 0x873   : > { %4947 = vmatmul.mubr.msk.f32.vlgmr.msra.gmra.mrb[72].mxu0 %vm312_vm0, %v5490_v55 }
 0x874   : > { %4949 = vmatprep.mubr.msk.f32.mxu0 %vm5364_vm2, %v5365_v34  ;;  %5205 = vmatpush3.bf16.msra.mxu0 %v5204_v46 }
 0x875   : > { %5206 = vmatprep.subr.bf16.mxu0 %v5363_v26 }
 0x877   : > { %4950 = vmatmul.mubr.msk.f32.gmra.mrb[74].mxu0 %vm312_vm0, %v5513_v3 }
 0x878   : > { %4952 = vmatprep.mubr.msk.f32.mxu0 %vm5364_vm2, %v5365_v34  ;;  %5208 = vmatpush3.bf16.msra.mxu0 %v5207_v31 }
 0x879   : > { %5215 = vmatprep.subr.bf16.mxu0 %v5363_v26 }
 0x87b   : > { %4953 = vmatmul.mubr.msk.f32.gmra.mrb[76].mxu0 %vm312_vm0, %v5525_v5 }
 0x87c   : > { %4980 = vmatprep.mubr.msk.f32.mxu0 %vm5364_vm2, %v5365_v34 }
 0x87f   : > { %4981 = vmatmul.mubr.msk.f32.vlgmr.msra.gmra.mrb[78].mxu0 %vm312_vm0, %v5490_v55 }
 0x880   : > { %4983 = vmatprep.mubr.msk.f32.mxu0 %vm5364_vm2, %v5365_v34  ;;  %5217 = vmatpush3.bf16.msra.mxu0 %v5216_v18 }
 0x881   : > { %5218 = vmatprep.subr.bf16.mxu0 %v5363_v26 }
 0x883   : > { %4984 = vmatmul.mubr.msk.f32.gmra.mrb[80].mxu0 %vm312_vm0, %v5513_v3 }
 0x884   : > { %4986 = vmatprep.mubr.msk.f32.mxu0 %vm5364_vm2, %v5365_v34  ;;  %5220 = vmatpush3.bf16.msra.mxu0 %v5219_v38 }
 0x885   : > { %5225 = vmatprep.subr.bf16.mxu0 %v5363_v26 }
 0x887   : > { %4987 = vmatmul.mubr.msk.f32.gmra.mrb[82].mxu0 %vm312_vm0, %v5525_v5 }
 0x888   : > { %5014 = vmatprep.mubr.msk.f32.mxu0 %vm5364_vm2, %v5365_v34 }
 0x88b   : > { %5015 = vmatmul.mubr.msk.f32.vlgmr.msra.gmra.mrb[84].mxu0 %vm312_vm0, %v5490_v55 }
 0x88c   : > { %5017 = vmatprep.mubr.msk.f32.mxu0 %vm5364_vm2, %v5365_v34 }
 0x88f   : > { %5018 = vmatmul.mubr.msk.f32.gmra.mrb[86].mxu0 %vm312_vm0, %v5513_v3 }
 0x890   : > { %5020 = vmatprep.mubr.msk.f32.mxu0 %vm5364_vm2, %v5365_v34 }
 0x893   : > { %5021 = vmatmul.mubr.msk.f32.gmra.mrb[88].mxu0 %vm312_vm0, %v5525_v5 }
 0x894   : > { %5044 = vmatprep.mubr.msk.f32.mxu0 %vm5364_vm2, %v5365_v34 }
 0x8f1   : > { %v2865_v63 = vpop.xlane.xlu1 %2864 }
 0x8f2   : > { %v2872_v61 = vsub.f32 %v6157_v21, %v2865_v63 }
 0x8f4   : > { %v2875_v53 = vmul.f32 1.442695, %v2872_v61 }
 0x8f5   : > { %v2868_v22 = vpop.xlane.xlu1 %2867 }
 0x8f6   : > { %5299 = vpow2.f32 %v2875_v53  ;;  %v2873_v56 = vsub.f32 %v6171_v42, %v2868_v22 }
 0x8f8   : > { %v2877_v58 = vmul.f32 1.442695, %v2873_v56 }
 0x8f9   : > { %v2871_v59 = vpop.xlane.xlu1 %2870 }
 0x8fa   : > { %5301 = vpow2.f32 %v2877_v58  ;;  %v2874_v60 = vsub.f32 %v2761_v14, %v2871_v59 }
 0x8fc   : > { %v2879_v62 = vmul.f32 1.442695, %v2874_v60 }
 0x8fe   : > { %5303 = vpow2.f32 %v2879_v62 }
 0x900   : > { %v6260_v6 = vpop.eup %5299 }
 0x901   : > { %v2881_v7 = vsel %vm1048_vm6, %v6260_v6, 0.0 }
 0x902   : > { %2882 = vadd.xlane.f32.xlu1 %v2881_v7 }
 0x904   : > { %v6264_v8 = vpop.eup %5301 }
 0x905   : > { %v2884_v10 = vsel %vm1048_vm6, %v6264_v8, 0.0 }
 0x906   : > { %2885 = vadd.xlane.f32.xlu1 %v2884_v10 }
 0x908   : > { %v6268_v13 = vpop.eup %5303 }
 0x909   : > { %v2887_v16 = vsel %vm1055_vm7, %v6268_v13, 0.0 }
 0x90a   : > { %2888 = vadd.xlane.f32.xlu1 %v2887_v16 }
 0x93a   : > { %v2846_v17 = vpop.f32.mrb[66].mxu0 }
 0x93b   : > { %v2860_v19 = vmul.f32 0.35355338, %v2846_v17  ;;  %v4916_v21 = vpop.f32.mrb[67].mxu0 }
 0x93d   : > { %v2896_v23 = vsel %vm1048_vm6, %v2860_v19, -inf }
 0x93e   : > { %2897 = vmax.xlane.f32.xlu0 %v2896_v23  ;;  %v2851_v24 = vpop.f32.mrb[68].mxu0 }
 0x93f   : > { %v2861_v25 = vmul.f32 0.35355338, %v2851_v24  ;;  %v4919_v30 = vpop.f32.mrb[69].mxu0 }
 0x941   : > { %v2899_v33 = vsel %vm1048_vm6, %v2861_v25, -inf }
 0x942   : > { %2900 = vmax.xlane.f32.xlu0 %v2899_v33  ;;  %v2856_v39 = vpop.f32.mrb[70].mxu0 }
 0x943   : > { %v2862_v41 = vmul.f32 0.35355338, %v2856_v39  ;;  %v4922_v28 = vpop.f32.mrb[71].mxu0 }
 0x945   : > { %v2902_v42 = vsel %vm1055_vm7, %v2862_v41, -inf }
 0x946   : > { %2903 = vmax.xlane.f32.xlu0 %v2902_v42  ;;  %v6275_v43 = vpop.f32.mrb[72].mxu0 }
 0x947   : > { %v4948_v47 = vpop.f32.mrb[73].mxu0 }
 0x94a   : > { %v6277_v0 = vpop.f32.mrb[74].mxu0 }
 0x94b   : > { %v4951_v52 = vpop.f32.mrb[75].mxu0 }
 0x94e   : > { %v6279_v2 = vpop.f32.mrb[76].mxu0 }
 0x94f   : > { %v4954_v9 = vpop.f32.mrb[77].mxu0 }
 0x950   : > { %v4275_v9 = vld [vmem:[%s6647_s3 + $0xe0] sm:$0xff] }
 0x952   : > { %v3367_v12 = vpop.f32.mrb[78].mxu0 }
 0x953   : > { %v4982_v14 = vpop.f32.mrb[79].mxu0  ;;  %v6287_v44 = vadd.f32 %v6284_v49, %v3367_v12  ;;  %v4276_v12 = vld [vmem:[%s6647_s3 + $0xe8] sm:$0xff] }
 0x956   : > { %v3372_v15 = vpop.f32.mrb[80].mxu0 }
 0x957   : > { %v6290_v51 = vadd.f32 %v6284_v49, %v3372_v15  ;;  %v4985_v57 = vpop.f32.mrb[81].mxu0 }
 0x959   : > { %v5222_v45 = vpack.c.bf16 %v6290_v51, %v6287_v44 }
 0x95a   : > { %v6294_v46 = vpop.f32.mrb[82].mxu0 }
 0x95b   : > { %v4988_v48 = vpop.f32.mrb[83].mxu0 }
 0x95e   : > { %v3553_v50 = vpop.f32.mrb[84].mxu0 }
 0x95f   : > { %v5016_v31 = vpop.f32.mrb[85].mxu0  ;;  %v6302_v18 = vadd.f32 %v6299_v27, %v3553_v50  ;;  %v5198_v50 = vpack.c.bf16 %v4276_v12, %v4275_v9 }
 0x962   : > { %v3558_v32 = vpop.f32.mrb[86].mxu0 }
 0x963   : > { %v6305_v35 = vadd.f32 %v6299_v27, %v3558_v32  ;;  %v5019_v29 = vpop.f32.mrb[87].mxu0 }
 0x964   : > { %v4277_v29 = vld [vmem:[%s6647_s3 + $0xf0] sm:$0xff] }
 0x965   : > { %v5230_v38 = vpack.c.bf16 %v6305_v35, %v6302_v18 }
 0x966   : > { %v6309_v63 = vpop.f32.mrb[88].mxu0 }
 0x967   : > { %v5022_v61 = vpop.f32.mrb[89].mxu0 }
 0x968   : > { %v4278_v61 = vld [vmem:[%s6647_s3 + $0xf8] sm:$0xff] }
 0x98f   : > { %v2883_v30 = vpop.xlane.xlu1 %2882 }
 0x9cb   : > { %v2898_v53 = vpop.xlane.xlu0 %2897 }
 0x9cc   : > { %v2905_v22 = vsub.f32 %v2860_v19, %v2898_v53 }
 0x9ce   : > { %v2908_v56 = vmul.f32 1.442695, %v2905_v22 }
 0x9cf   : > { %v2901_v58 = vpop.xlane.xlu0 %2900 }
 0x9d0   : > { %5305 = vpow2.f32 %v2908_v56  ;;  %v2906_v59 = vsub.f32 %v2861_v25, %v2901_v58  ;;  %v2886_v25 = vpop.xlane.xlu1 %2885  ;;  %v5201_v58 = vpack.c.bf16 %v4278_v61, %v4277_v29 }
 0x9d2   : > { %v2910_v60 = vmul.f32 1.442695, %v2906_v59 }
 0x9d3   : > { %v2904_v62 = vpop.xlane.xlu0 %2903 }
 0x9d4   : > { %5307 = vpow2.f32 %v2910_v60  ;;  %v2907_v7 = vsub.f32 %v2862_v41, %v2904_v62  ;;  %v2889_v41 = vpop.xlane.xlu1 %2888 }
 0x9d6   : > { %v2912_v10 = vmul.f32 1.442695, %v2907_v7 }
 0x9d8   : > { %5309 = vpow2.f32 %v2912_v10  ;;  %v4293_v10 = vld [vmem:[%s6647_s3 + $0x1e0] sm:$0xff] }
 0x9d9   : > { %5311 = vrcp.f32 %v2883_v30 }
 0x9da   : > { %v5306_v16 = vpop.eup %5305 }
 0x9db   : > { %v2914_v17 = vsel %vm1048_vm6, %v5306_v16, 0.0 }
 0x9dc   : > { %2915 = vadd.xlane.f32.xlu0 %v2914_v17  ;;  %v4295_v17 = vld [vmem:[%s6647_s3 + $0x1f0] sm:$0xff] }
 0x9de   : > { %v5308_v21 = vpop.eup %5307 }
 0x9df   : > { %v2917_v23 = vsel %vm1048_vm6, %v5308_v21, 0.0 }
 0x9e0   : > { %2918 = vadd.xlane.f32.xlu0 %v2917_v23 }
 0x9e2   : > { %v5310_v24 = vpop.eup %5309 }
 0x9e3   : > { %v2920_v19 = vsel %vm1055_vm7, %v5310_v24, 0.0  ;;  %v5312_v42 = vpop.eup %5311 }
 0x9e4   : > { %2921 = vadd.xlane.f32.xlu0 %v2920_v19  ;;  %v2891_v15 = vmul.f32 %v5312_v42, %v6260_v6 }
 0xa69   : > { %v2916_v33 = vpop.xlane.xlu0 %2915 }
 0xa6a   : > { %5313 = vrcp.f32 %v2916_v33 }
 0xa6b   : > { %5315 = vrcp.f32 %v2886_v25  ;;  %v4298_v25 = vld [vmem:[%s6648_s4 + $0xf] ss:$0 sm:$0xff] }
 0xa6d   : > { %v2919_v39 = vpop.xlane.xlu0 %2918 }
 0xa6e   : > { %5317 = vrcp.f32 %v2919_v39 }
 0xa6f   : > { %5319 = vrcp.f32 %v2889_v41 }
 0xa71   : > { %v2922_v28 = vpop.xlane.xlu0 %2921 }
 0xa72   : > { %5321 = vrcp.f32 %v2922_v28 }
 0xa74   : > { %v5314_v47 = vpop.eup %5313 }
 0xa75   : > { %v2924_v52 = vmul.f32 %v5314_v47, %v5306_v16  ;;  %v5316_v14 = vpop.eup %5315  ;;  %v4294_v16 = vld [vmem:[%s6647_s3 + $0x1e8] sm:$0xff] }
 0xa76   : > { %v2893_v22 = vmul.f32 %v5316_v14, %v6264_v8 }
 0xa77   : > { %v2929_v57 = vmul.f32 %v2924_v52, %v5777_v1 }
 0xa78   : > { %v5318_v48 = vpop.eup %5317 }
 0xa79   : > { %v2932_v31 = vsub.f32 %v2891_v15, %v2929_v57  ;;  %v2926_v32 = vmul.f32 %v5318_v48, %v5308_v21  ;;  %v5320_v53 = vpop.eup %5319  ;;  %v4296_v21 = vld [vmem:[%s6647_s3 + $0x1f8] sm:$0xff]  ;;  %v4280_v15 = vld [vmem:[%s6648_s4 + $0x7] ss:$0 sm:$0xff] }
 0xa7a   : > { %v2895_v62 = vmul.f32 %v5320_v53, %v6268_v13  ;;  %v5210_v13 = vpack.c.bf16 %v4294_v16, %v4293_v10  ;;  %v5213_v23 = vpack.c.bf16 %v4296_v21, %v4295_v17 }
 0xa7b   : > { %4930 = vmatmul.mubr.msk.f32.vlgmr.msra.gmra.mrb[66].mxu1 %vm1048_vm6, %v2932_v31  ;;  %v2930_v6 = vmul.f32 %v2926_v32, %v5777_v1 }
 0xa7c   : > { %v5322_v56 = vpop.eup %5321  ;;  %4932 = vmatprep.mubr.msk.f32.mxu1 %vm5364_vm2, %v5365_v34  ;;  %5199 = vmatpush3.bf16.msra.mxu1 %v5198_v50 }
 0xa7d   : > { %v2933_v59 = vsub.f32 %v2893_v22, %v2930_v6  ;;  %5200 = vmatprep.subr.bf16.mxu1 %v5363_v26  ;;  %v2928_v60 = vmul.f32 %v5322_v56, %v5310_v24  ;;  %v3378_v24 = vadd.f32 %v6284_v49, %v6294_v46  ;;  %v3564_v49 = vadd.f32 %v6299_v27, %v6309_v63 }
 0xa7f   : > { %4933 = vmatmul.mubr.msk.f32.gmra.mrb[68].mxu1 %vm1048_vm6, %v2933_v59  ;;  %v2931_v7 = vmul.f32 %v2928_v60, %v5777_v1 }
 0xa80   : > { %4935 = vmatprep.mubr.msk.f32.mxu1 %vm5364_vm2, %v5365_v34  ;;  %5202 = vmatpush3.bf16.msra.mxu1 %v5201_v58 }
 0xa81   : > { %v2934_v8 = vsub.f32 %v2895_v62, %v2931_v7  ;;  %5209 = vmatprep.subr.bf16.mxu1 %v5363_v26 }
 0xa83   : > { %4936 = vmatmul.mubr.msk.f32.gmra.mrb[70].mxu1 %vm1048_vm6, %v2934_v8 }
 0xa84   : > { %4963 = vmatprep.mubr.msk.f32.mxu1 %vm5364_vm2, %v5365_v34 }
 0xa87   : > { %4964 = vmatmul.mubr.msk.f32.vlgmr.msra.gmra.mrb[72].mxu1 %vm312_vm0, %v5490_v55 }
 0xa88   : > { %5211 = vmatpush3.bf16.msra.mxu1 %v5210_v13  ;;  %4966 = vmatprep.mubr.msk.f32.mxu1 %vm5364_vm2, %v5365_v34 }
 0xa89   : > { %5212 = vmatprep.subr.bf16.mxu1 %v5363_v26 }
 0xa8b   : > { %4967 = vmatmul.mubr.msk.f32.gmra.mrb[74].mxu1 %vm312_vm0, %v5513_v3 }
 0xa8c   : > { %5214 = vmatpush3.bf16.msra.mxu1 %v5213_v23  ;;  %4969 = vmatprep.mubr.msk.f32.mxu1 %vm5364_vm2, %v5365_v34 }
 0xa8d   : > { %5221 = vmatprep.subr.bf16.mxu1 %v5363_v26 }
 0xa8f   : > { %4970 = vmatmul.mubr.msk.f32.gmra.mrb[76].mxu1 %vm312_vm0, %v5525_v5 }
 0xa90   : > { %4997 = vmatprep.mubr.msk.f32.mxu1 %vm5364_vm2, %v5365_v34 }
 0xa93   : > { %4998 = vmatmul.mubr.msk.f32.vlgmr.msra.gmra.mrb[78].mxu1 %vm312_vm0, %v5490_v55  ;;  %v4271_v55 = vld [vmem:[%s6648_s4 + $0x3] ss:$0 sm:$0xff] }
 0xa94   : > { %5000 = vmatprep.mubr.msk.f32.mxu1 %vm5364_vm2, %v5365_v34 }
 0xa95   : > { %5224 = vmatpush3.bf16.xpose.msk.msra.mxu1 %vm5603_vm4, %v5222_v45 }
 0xa96   : > { %5027 = vmatprep.subr.mxu1 %v5365_v34 }
 0xa97   : > { %5001 = vmatmul.mubr.msk.f32.gmra.mrb[80].mxu1 %vm312_vm0, %v5513_v3  ;;  %v3182_v3 = vadd.f32 %v4271_v55, %v6275_v43 }
 0xa98   : > { %5003 = vmatprep.mubr.msk.f32.mxu1 %vm5364_vm2, %v5365_v34 }
 0xa9b   : > { %5004 = vmatmul.mubr.msk.f32.gmra.mrb[82].mxu1 %vm312_vm0, %v5525_v5  ;;  %v3187_v5 = vadd.f32 %v4271_v55, %v6277_v0 }
 0xa9c   : > { %5029 = vmatprep.mubr.msk.f32.mxu1 %vm5364_vm2, %v5365_v34 }
 0xa9d   : > { %5028 = vmatpush3.xpose.msk.msra.mxu1 %vm845_vm3, %v3378_v24 }
 0xa9e   : > { %5229 = vmatprep.subr.bf16.mxu1 %v5363_v26  ;;  %v3192_v26 = vadd.f32 %v4271_v55, %v6279_v2 }
 0xaa0   : > { %5030 = vmatmul.mubr.msk.f32.vlgmr.msra.gmra.mrb[84].mxu1 %vm845_vm3, %v3182_v3 }
 0xaa1   : > { %5231 = vmatpush3.bf16.msra.mxu1 %v5230_v38  ;;  %5032 = vmatprep.mubr.msk.f32.mxu1 %vm5364_vm2, %v5365_v34 }
 0xaa2   : > { %5057 = vmatprep.subr.mxu1 %v5365_v34 }
 0xaa4   : > { %5033 = vmatmul.mubr.msk.f32.gmra.mrb[86].mxu1 %vm845_vm3, %v3187_v5 }
 0xaa5   : > { %5058 = vmatpush3.msk.msra.mxu1 %vm1132_vm5, %v3564_v49  ;;  %5035 = vmatprep.mubr.msk.f32.mxu1 %vm5364_vm2, %v5365_v34  ;;  %v1219_v49 = vsel %vm845_vm3, %v5878_v4, 0.0 }
 0xaa8   : > { %5036 = vmatmul.mubr.msk.f32.gmra.mrb[88].mxu1 %vm845_vm3, %v3192_v26  ;;  %v2124_v26 = vsel %vm845_vm3, %v6147_v36, 0.0 }
 0xaa9   : > { %5059 = vmatprep.mubr.msk.f32.mxu1 %vm5364_vm2, %v5365_v34 }
 0xb4e   : > { %v6413_v43 = vpop.f32.mrb[66].mxu1 }
 0xb4f   : > { %v4931_v0 = vpop.f32.mrb[67].mxu1 }
 0xb52   : > { %v6415_v44 = vpop.f32.mrb[68].mxu1 }
 0xb53   : > { %v4934_v51 = vpop.f32.mrb[69].mxu1  ;;  %v3030_v0 = vsel %vm845_vm3, %v6415_v44, 0.0 }
 0xb54   : > { %v2127_v51 = vsel %vm1222_vm8, %v6149_v37, 0.0 }
 0xb56   : > { %v6417_v45 = vpop.f32.mrb[70].mxu1 }
 0xb57   : > { %v4937_v46 = vpop.f32.mrb[71].mxu1 }
 0xb5a   : > { %v3274_v27 = vpop.f32.mrb[72].mxu1 }
 0xb5b   : > { %v4965_v18 = vpop.f32.mrb[73].mxu1  ;;  %v3275_v31 = vadd.f32 %v4280_v15, %v3274_v27 }
 0xb5e   : > { %v3279_v35 = vpop.f32.mrb[74].mxu1 }
 0xb5f   : > { %v4968_v38 = vpop.f32.mrb[75].mxu1  ;;  %v3280_v53 = vadd.f32 %v4280_v15, %v3279_v35 }
 0xb62   : > { %v3284_v63 = vpop.f32.mrb[76].mxu1 }
 0xb63   : > { %v4971_v2 = vpop.f32.mrb[77].mxu1  ;;  %v3285_v58 = vadd.f32 %v4280_v15, %v3284_v63 }
 0xb66   : > { %v3460_v19 = vpop.f32.mrb[78].mxu1 }
 0xb67   : > { %v4999_v30 = vpop.f32.mrb[79].mxu1  ;;  %v3461_v39 = vadd.f32 %v4298_v25, %v3460_v19 }
 0xb6a   : > { %v3465_v33 = vpop.f32.mrb[80].mxu1 }
 0xb6b   : > { %v3466_v41 = vadd.f32 %v4298_v25, %v3465_v33  ;;  %v5002_v28 = vpop.f32.mrb[81].mxu1 }
 0xb6d   : > { %v5226_v42 = vpack.c.bf16 %v3466_v41, %v3461_v39 }
 0xb6e   : > { %v3470_v47 = vpop.f32.mrb[82].mxu1 }
 0xb6f   : > { %v5005_v52 = vpop.f32.mrb[83].mxu1  ;;  %5228 = vmatpush3.bf16.xpose.msk.msra.mxu0 %vm5603_vm4, %v5226_v42  ;;  %v3471_v57 = vadd.f32 %v4298_v25, %v3470_v47 }
 0xb70   : > { %5042 = vmatprep.subr.mxu0 %v5365_v34 }
 0xb73   : > { %v3651_v9 = vpop.f32.mrb[84].mxu1 }
 0xb74   : > { %v3665_v12 = vmul.f32 0.35355338, %v3651_v9  ;;  %v5031_v14 = vpop.f32.mrb[85].mxu1 }
 0xb76   : > { %v3769_v48 = vsel %vm1048_vm6, %v3665_v12, -inf }
 0xb77   : > { %3770 = vmax.xlane.f32.xlu1 %v3769_v48  ;;  %v3656_v50 = vpop.f32.mrb[86].mxu1  ;;  %5043 = vmatpush3.xpose.msk.msra.mxu0 %vm845_vm3, %v3471_v57 }
 0xb78   : > { %v3666_v32 = vmul.f32 0.35355338, %v3656_v50  ;;  %v5034_v40 = vpop.f32.mrb[87].mxu1 }
 0xb7a   : > { %5045 = vmatmul.mubr.msk.f32.vlgmr.msra.gmra.mrb[90].mxu0 %vm845_vm3, %v3275_v31  ;;  %v3772_v29 = vsel %vm1048_vm6, %v3666_v32, -inf }
 0xb7b   : > { %3773 = vmax.xlane.f32.xlu1 %v3772_v29  ;;  %v3661_v61 = vpop.f32.mrb[88].mxu1  ;;  %5047 = vmatprep.mubr.msk.f32.mxu0 %vm5364_vm2, %v5365_v34  ;;  %v1216_v29 = vsel %vm845_vm3, %v5876_v54, 0.0 }
 0xb7c   : > { %v3667_v22 = vmul.f32 0.35355338, %v3661_v61  ;;  %v5037_v6 = vpop.f32.mrb[89].mxu1  ;;  %v2121_v61 = vsel %vm845_vm3, %v6145_v20, 0.0 }
 0xb7e   : > { %5048 = vmatmul.mubr.msk.f32.gmra.mrb[92].mxu0 %vm845_vm3, %v3280_v53  ;;  %v3775_v56 = vsel %vm1055_vm7, %v3667_v22, -inf  ;;  %v3027_v53 = vsel %vm845_vm3, %v6413_v43, 0.0 }
 0xb7f   : > { %3776 = vmax.xlane.f32.xlu1 %v3775_v56  ;;  %5050 = vmatprep.mubr.msk.f32.mxu0 %vm5364_vm2, %v5365_v34 }
 0xb82   : > { %5051 = vmatmul.mubr.msk.f32.gmra.mrb[94].mxu0 %vm845_vm3, %v3285_v58 }
 0xc04   : > { %v3771_v59 = vpop.xlane.xlu1 %3770 }
 0xc05   : > { %v3778_v60 = vsub.f32 %v3665_v12, %v3771_v59 }
 0xc07   : > { %v3781_v62 = vmul.f32 1.442695, %v3778_v60 }
 0xc08   : > { %v3774_v7 = vpop.xlane.xlu1 %3773 }
 0xc09   : > { %5323 = vpow2.f32 %v3781_v62  ;;  %v3779_v8 = vsub.f32 %v3666_v32, %v3774_v7 }
 0xc0b   : > { %v3783_v10 = vmul.f32 1.442695, %v3779_v8 }
 0xc0c   : > { %v3777_v16 = vpop.xlane.xlu1 %3776 }
 0xc0d   : > { %5325 = vpow2.f32 %v3783_v10  ;;  %v3780_v13 = vsub.f32 %v3667_v22, %v3777_v16  ;;  %v1223_v22 = vsel %vm1222_vm8, %v5880_v11, 0.0 }
 0xc0f   : > { %v3785_v17 = vmul.f32 1.442695, %v3780_v13 }
 0xc11   : > { %5327 = vpow2.f32 %v3785_v17 }
 0xc13   : > { %v6439_v21 = vpop.eup %5323 }
 0xc14   : > { %v3787_v23 = vsel %vm1048_vm6, %v6439_v21, 0.0 }
 0xc15   : > { %3788 = vadd.xlane.f32.xlu1 %v3787_v23 }
 0xc17   : > { %v6443_v55 = vpop.eup %5325 }
 0xc18   : > { %v3790_v24 = vsel %vm1048_vm6, %v6443_v55, 0.0 }
 0xc19   : > { %3791 = vadd.xlane.f32.xlu1 %v3790_v24 }
 0xc1b   : > { %v6447_v3 = vpop.eup %5327 }
 0xc1c   : > { %v3793_v5 = vsel %vm1055_vm7, %v6447_v3, 0.0 }
 0xc1d   : > { %3794 = vadd.xlane.f32.xlu1 %v3793_v5 }
 0xc21   : > { %1220 = vadd.xlane.f32.xlu1 %v1219_v49 }
 0xc25   : > { %2125 = vadd.xlane.f32.xlu1 %v2124_v26 }
 0xc29   : > { %3031 = vadd.xlane.f32.xlu1 %v3030_v0 }
 0xc2d   : > { %2128 = vadd.xlane.f32.xlu1 %v2127_v51 }
 0xc4d   : > { %v3752_v46 = vpop.f32.mrb[90].mxu0 }
 0xc4e   : > { %v3766_v27 = vmul.f32 0.35355338, %v3752_v46  ;;  %v5046_v18 = vpop.f32.mrb[91].mxu0 }
 0xc50   : > { %v3802_v35 = vsel %vm1048_vm6, %v3766_v27, -inf }
 0xc51   : > { %3803 = vmax.xlane.f32.xlu0 %v3802_v35  ;;  %v3757_v38 = vpop.f32.mrb[92].mxu0 }
 0xc52   : > { %v3767_v63 = vmul.f32 0.35355338, %v3757_v38  ;;  %v5049_v2 = vpop.f32.mrb[93].mxu0 }
 0xc54   : > { %v3805_v19 = vsel %vm1048_vm6, %v3767_v63, -inf }
 0xc55   : > { %3806 = vmax.xlane.f32.xlu0 %v3805_v19  ;;  %v3762_v30 = vpop.f32.mrb[94].mxu0 }
 0xc56   : > { %v3768_v25 = vmul.f32 0.35355338, %v3762_v30  ;;  %v5052_v33 = vpop.f32.mrb[95].mxu0 }
 0xc58   : > { %v3808_v39 = vsel %vm1055_vm7, %v3768_v25, -inf }
 0xc59   : > { %3809 = vmax.xlane.f32.xlu0 %v3808_v39 }
 0xca2   : > { %v3789_v6 = vpop.xlane.xlu1 %3788 }
 0xca6   : > { %v3792_v56 = vpop.xlane.xlu1 %3791 }
 0xcaa   : > { %v3795_v58 = vpop.xlane.xlu1 %3794 }
 0xcae   : > { %v1221_v59 = vpop.xlane.xlu1 %1220 }
 0xcb2   : > { %v2126_v62 = vpop.xlane.xlu1 %2125 }
 0xcb6   : > { %v6473_v10 = vpop.xlane.xlu1 %3031 }
 0xcba   : > { %v2129_v0 = vpop.xlane.xlu1 %2128 }
 0xcbb   : > { %v2131_v38 = vsel %vm1132_vm5, %v2129_v0, 0.0 }
 0xcde   : > { %v3804_v41 = vpop.xlane.xlu0 %3803 }
 0xcdf   : > { %v3811_v28 = vsub.f32 %v3766_v27, %v3804_v41 }
 0xce1   : > { %v3814_v42 = vmul.f32 1.442695, %v3811_v28 }
 0xce2   : > { %v3807_v47 = vpop.xlane.xlu0 %3806 }
 0xce3   : > { %5329 = vpow2.f32 %v3814_v42  ;;  %v3812_v52 = vsub.f32 %v3767_v63, %v3807_v47 }
 0xce5   : > { %v3816_v9 = vmul.f32 1.442695, %v3812_v52 }
 0xce6   : > { %v3810_v12 = vpop.xlane.xlu0 %3809 }
 0xce7   : > { %5331 = vpow2.f32 %v3816_v9  ;;  %v3813_v14 = vsub.f32 %v3768_v25, %v3810_v12 }
 0xce9   : > { %v3818_v15 = vmul.f32 1.442695, %v3813_v14 }
 0xceb   : > { %5333 = vpow2.f32 %v3818_v15 }
 0xcec   : > { %5335 = vrcp.f32 %v3789_v6 }
 0xced   : > { %v5330_v57 = vpop.eup %5329 }
 0xcee   : > { %v3820_v48 = vsel %vm1048_vm6, %v5330_v57, 0.0 }
 0xcef   : > { %3821 = vadd.xlane.f32.xlu0 %v3820_v48 }
 0xcf1   : > { %v5332_v50 = vpop.eup %5331 }
 0xcf2   : > { %v3823_v31 = vsel %vm1048_vm6, %v5332_v50, 0.0 }
 0xcf3   : > { %3824 = vadd.xlane.f32.xlu0 %v3823_v31 }
 0xcf5   : > { %v5334_v32 = vpop.eup %5333 }
 0xcf6   : > { %v3826_v40 = vsel %vm1055_vm7, %v5334_v32, 0.0  ;;  %v5336_v16 = vpop.eup %5335 }
 0xcf7   : > { %3827 = vadd.xlane.f32.xlu0 %v3826_v40  ;;  %v3797_v5 = vmul.f32 %v5336_v16, %v6439_v21 }
 0xcfb   : > { %1217 = vadd.xlane.f32.xlu0 %v1216_v29 }
 0xcff   : > { %2122 = vadd.xlane.f32.xlu0 %v2121_v61 }
 0xd03   : > { %3028 = vadd.xlane.f32.xlu0 %v3027_v53 }
 0xd07   : > { %1224 = vadd.xlane.f32.xlu0 %v1223_v22 }
 0xd7c   : > { %v3822_v60 = vpop.xlane.xlu0 %3821 }
 0xd7d   : > { %5337 = vrcp.f32 %v3822_v60 }
 0xd7e   : > { %5339 = vrcp.f32 %v3792_v56 }
 0xd80   : > { %v3825_v7 = vpop.xlane.xlu0 %3824 }
 0xd81   : > { %5341 = vrcp.f32 %v3825_v7 }
 0xd82   : > { %5343 = vrcp.f32 %v3795_v58 }
 0xd84   : > { %v3828_v8 = vpop.xlane.xlu0 %3827 }
 0xd85   : > { %5345 = vrcp.f32 %v3828_v8 }
 0xd87   : > { %v5338_v13 = vpop.eup %5337 }
 0xd88   : > { %v3830_v17 = vmul.f32 %v5338_v13, %v5330_v57  ;;  %v1218_v23 = vpop.xlane.xlu0 %1217  ;;  %v5340_v24 = vpop.eup %5339 }
 0xd89   : > { %v3799_v63 = vmul.f32 %v5340_v24, %v6443_v55  ;;  %v1226_v55 = vadd.f32 %v1221_v59, %v1218_v23 }
 0xd8a   : > { %v3835_v49 = vmul.f32 %v3830_v17, %v5777_v1 }
 0xd8b   : > { %v5342_v26 = vpop.eup %5341 }
 0xd8c   : > { %v3838_v51 = vsub.f32 %v3797_v5, %v3835_v49  ;;  %v2123_v46 = vpop.xlane.xlu0 %2122  ;;  %v3832_v27 = vmul.f32 %v5342_v26, %v5332_v50  ;;  %v5344_v35 = vpop.eup %5343 }
 0xd8d   : > { %v2130_v18 = vadd.f32 %v2126_v62, %v2123_v46  ;;  %v3801_v41 = vmul.f32 %v5344_v35, %v6447_v3 }
 0xd8e   : > { %5060 = vmatmul.mubr.msk.f32.vlgmr.msra.gmra.mrb[90].mxu1 %vm1048_vm6, %v3838_v51  ;;  %v3836_v2 = vmul.f32 %v3832_v27, %v5777_v1 }
 0xd8f   : > { %v5346_v19 = vpop.eup %5345  ;;  %v2132_v30 = vadd.f32 %v2131_v38, %v2130_v18  ;;  %5062 = vmatprep.mubr.msk.f32.mxu1 %vm5364_vm2, %v5365_v34 }
 0xd90   : > { %v3029_v21 = vpop.xlane.xlu0 %3028  ;;  %v3839_v25 = vsub.f32 %v3799_v63, %v3836_v2  ;;  %v3834_v33 = vmul.f32 %v5346_v19, %v5334_v32 }
 0xd91   : > { %v2133_v39 = vrot.slane %v2132_v30, 4  ;;  %v3036_v0 = vadd.f32 %v6473_v10, %v3029_v21 }
 0xd92   : > { %5063 = vmatmul.mubr.msk.f32.gmra.mrb[92].mxu1 %vm1048_vm6, %v3839_v25  ;;  %v3837_v28 = vmul.f32 %v3834_v33, %v5777_v1 }
 0xd93   : > { %v2134_v42 = vadd.f32 %v2133_v39, %v2132_v30  ;;  %5065 = vmatprep.mubr.msk.f32.mxu1 %vm5364_vm2, %v5365_v34 }
 0xd94   : > { %v1225_v47 = vpop.xlane.xlu0 %1224  ;;  %v3840_v52 = vsub.f32 %v3801_v41, %v3837_v28 }
 0xd95   : > { %v2135_v9 = vrot.slane %v2134_v42, 2  ;;  %v1227_v12 = vsel %vm1132_vm5, %v1225_v47, 0.0 }
 0xd96   : > { %v1228_v14 = vadd.f32 %v1227_v12, %v1226_v55  ;;  %5066 = vmatmul.mubr.msk.f32.gmra.mrb[94].mxu1 %vm1048_vm6, %v3840_v52 }
 0xd97   : > { %v2136_v15 = vadd.f32 %v2135_v9, %v2134_v42 }
 0xd98   : > { %v1229_v57 = vrot.slane %v1228_v14, 4 }
 0xd99   : > { %v2137_v48 = vrot.slane %v2136_v15, 1 }
 0xd9a   : > { %v1230_v50 = vadd.f32 %v1229_v57, %v1228_v14 }
 0xd9b   : > { %v2138_v3 = vadd.f32 %v2137_v48, %v2136_v15 }
 0xd9c   : > { %v1231_v31 = vrot.slane %v1230_v50, 2 }
 0xd9d   : > { %v2139_v1 = vmul.f32 0.007352941, %v2138_v3 }
 0xd9e   : > { %v1232_v32 = vadd.f32 %v1231_v31, %v1230_v50 }
 0xd9f   : > { %v6491_v40 = vsub.f32 %v6149_v37, %v2139_v1  ;;  %v3033_v37 = vsel %vm1222_vm8, %v6417_v45, 0.0  ;;  %v6512_v8 = vsub.f32 %v6145_v20, %v2139_v1  ;;  %v6515_v16 = vsub.f32 %v6147_v36, %v2139_v1 }
 0xda0   : > { %v1233_v34 = vrot.slane %v1232_v32, 1 }
 0xda1   : > { %v2144_v36 = vmul.f32 %v6515_v16, %v6515_v16  ;;  %v2145_v50 = vmul.f32 %v6491_v40, %v6491_v40 }
 0xda2   : > { %v1234_v29 = vadd.f32 %v1233_v34, %v1232_v32 }
 0xda3   : > { %v2149_v49 = vsel %vm845_vm3, %v2144_v36, 0.0  ;;  %v2152_v1 = vsel %vm1222_vm8, %v2145_v50, 0.0 }
 0xda4   : > { %v1236_v61 = vmul.f32 0.007352941, %v1234_v29 }
 0xda6   : > { %v6494_v53 = vsub.f32 %v5880_v11, %v1236_v61  ;;  %v6501_v58 = vsub.f32 %v5876_v54, %v1236_v61  ;;  %v6509_v7 = vsub.f32 %v5878_v4, %v1236_v61  ;;  %v2143_v4 = vmul.f32 %v6512_v8, %v6512_v8 }
 0xda8   : > { %v1240_v11 = vmul.f32 %v6501_v58, %v6501_v58  ;;  %v1241_v24 = vmul.f32 %v6509_v7, %v6509_v7  ;;  %v2146_v5 = vsel %vm845_vm3, %v2143_v4, 0.0 }
 0xdaa   : > { %v1243_v23 = vsel %vm845_vm3, %v1240_v11, 0.0  ;;  %v1246_v20 = vsel %vm845_vm3, %v1241_v24, 0.0 }
 0xe61   : > { %v6496_v22 = vpop.f32.mrb[90].mxu1 }
 0xe62   : > { %v5061_v6 = vpop.f32.mrb[91].mxu1  ;;  %v3933_v56 = vsel %vm845_vm3, %v6496_v22, 0.0 }
 0xe63   : > { %3934 = vadd.xlane.f32.xlu0 %v3933_v56 }
 0xe65   : > { %v3924_v59 = vpop.f32.mrb[92].mxu1 }
 0xe66   : > { %v5064_v60 = vpop.f32.mrb[93].mxu1  ;;  %v3936_v62 = vsel %vm845_vm3, %v3924_v59, 0.0 }
 0xe67   : > { %3034 = vadd.xlane.f32.xlu0 %v3033_v37  ;;  %3937 = vadd.xlane.f32.xlu1 %v3936_v62 }
 0xe69   : > { %v3929_v54 = vpop.f32.mrb[94].mxu1 }
 0xe6a   : > { %v5067_v13 = vpop.f32.mrb[95].mxu1  ;;  %v3939_v17 = vsel %vm1222_vm8, %v3929_v54, 0.0 }
 0xe6b   : > { %3940 = vadd.xlane.f32.xlu1 %v3939_v17  ;;  %1244 = vadd.xlane.f32.xlu0 %v1243_v23 }
 0xe6f   : > { %1247 = vadd.xlane.f32.xlu1 %v1246_v20  ;;  %2147 = vadd.xlane.f32.xlu0 %v2146_v5 }
 0xe73   : > { %2150 = vadd.xlane.f32.xlu1 %v2149_v49 }
 0xef0   : > { %v3935_v26 = vpop.xlane.xlu0 %3934 }
 0xef4   : > { %v3938_v51 = vpop.xlane.xlu1 %3937  ;;  %v3035_v46 = vpop.xlane.xlu0 %3034 }
 0xef5   : > { %v3037_v27 = vsel %vm1132_vm5, %v3035_v46, 0.0  ;;  %v3942_v35 = vadd.f32 %v3938_v51, %v3935_v26 }
 0xef6   : > { %v3038_v18 = vadd.f32 %v3037_v27, %v3036_v0 }
 0xef8   : > { %v3039_v38 = vrot.slane %v3038_v18, 4  ;;  %v3941_v63 = vpop.xlane.xlu1 %3940  ;;  %v1245_v62 = vpop.xlane.xlu0 %1244 }
 0xef9   : > { %v3943_v2 = vsel %vm1132_vm5, %v3941_v63, 0.0 }
 0xefa   : > { %v3040_v19 = vadd.f32 %v3039_v38, %v3038_v18  ;;  %v3944_v30 = vadd.f32 %v3943_v2, %v3942_v35 }
 0xefc   : > { %v3041_v25 = vrot.slane %v3040_v19, 2  ;;  %v3945_v33 = vrot.slane %v3944_v30, 4  ;;  %v1248_v11 = vpop.xlane.xlu1 %1247 }
 0xefd   : > { %v1252_v24 = vadd.f32 %v1248_v11, %v1245_v62 }
 0xefe   : > { %v3042_v39 = vadd.f32 %v3041_v25, %v3040_v19  ;;  %v3946_v41 = vadd.f32 %v3945_v33, %v3944_v30 }
 0xf00   : > { %v3043_v28 = vrot.slane %v3042_v39, 1  ;;  %v3947_v42 = vrot.slane %v3946_v41, 2  ;;  %v2151_v13 = vpop.xlane.xlu1 %2150 }
 0xf02   : > { %v3044_v55 = vadd.f32 %v3043_v28, %v3042_v39  ;;  %v3948_v10 = vadd.f32 %v3947_v42, %v3946_v41 }
 0xf04   : > { %v3045_v21 = vmul.f32 0.007352941, %v3044_v55  ;;  %v3949_v47 = vrot.slane %v3948_v10, 1 }
 0xf06   : > { %v3950_v52 = vadd.f32 %v3949_v47, %v3948_v10  ;;  %v6532_v9 = vsub.f32 %v6415_v44, %v3045_v21  ;;  %v6535_v12 = vsub.f32 %v6413_v43, %v3045_v21  ;;  %v6538_v14 = vsub.f32 %v6417_v45, %v3045_v21 }
 0xf07   : > { %v1242_v44 = vmul.f32 %v6494_v53, %v6494_v53 }
 0xf08   : > { %v3951_v15 = vmul.f32 0.007352941, %v3950_v52  ;;  %v3050_v57 = vmul.f32 %v6532_v9, %v6532_v9  ;;  %v3049_v48 = vmul.f32 %v6535_v12, %v6535_v12 }
 0xf09   : > { %v1249_v32 = vsel %vm1222_vm8, %v1242_v44, 0.0 }
 0xf0a   : > { %v3055_v3 = vsel %vm845_vm3, %v3050_v57, 0.0  ;;  %v3052_v43 = vsel %vm845_vm3, %v3049_v48, 0.0  ;;  %v6550_v31 = vsub.f32 %v3924_v59, %v3951_v15  ;;  %v6553_v45 = vsub.f32 %v6496_v22, %v3951_v15 }
 0xf0b   : > { %3056 = vadd.xlane.f32.xlu1 %v3055_v3  ;;  %3053 = vadd.xlane.f32.xlu0 %v3052_v43  ;;  %v6561_v61 = vsub.f32 %v3929_v54, %v3951_v15  ;;  %v3051_v59 = vmul.f32 %v6538_v14, %v6538_v14  ;;  %v2148_v54 = vpop.xlane.xlu0 %2147 }
 0xf0c   : > { %v3956_v34 = vmul.f32 %v6550_v31, %v6550_v31  ;;  %v3955_v29 = vmul.f32 %v6553_v45, %v6553_v45  ;;  %v2155_v4 = vadd.f32 %v2151_v13, %v2148_v54 }
 0xf0d   : > { %v3957_v56 = vmul.f32 %v6561_v61, %v6561_v61  ;;  %v3058_v60 = vsel %vm1222_vm8, %v3051_v59, 0.0 }
 0xf0e   : > { %v3961_v6 = vsel %vm845_vm3, %v3956_v34, 0.0  ;;  %v3958_v22 = vsel %vm845_vm3, %v3955_v29, 0.0 }
 0xf0f   : > { %2153 = vadd.xlane.f32.xlu1 %v2152_v1  ;;  %1250 = vadd.xlane.f32.xlu0 %v1249_v32  ;;  %v3964_v37 = vsel %vm1222_vm8, %v3957_v56, 0.0 }
 0xf13   : > { %3962 = vadd.xlane.f32.xlu1 %v3961_v6  ;;  %3959 = vadd.xlane.f32.xlu0 %v3958_v22 }
 0xf17   : > { %3965 = vadd.xlane.f32.xlu1 %v3964_v37  ;;  %3059 = vadd.xlane.f32.xlu0 %v3058_v60 }
 0xf98   : > { %v3057_v17 = vpop.xlane.xlu1 %3056  ;;  %v3054_v23 = vpop.xlane.xlu0 %3053 }
 0xf99   : > { %v3061_v63 = vadd.f32 %v3057_v17, %v3054_v23  ;;  %v4192_v23 = vld [vmem:[%s6650_s6 + $0x1] ss:$0 sm:$0xff] }
 0xf9c   : > { %v2154_v20 = vpop.xlane.xlu1 %2153  ;;  %v1251_v5 = vpop.xlane.xlu0 %1250 }
 0xf9d   : > { %v2156_v36 = vsel %vm1132_vm5, %v2154_v20, 0.0  ;;  %v1253_v49 = vsel %vm1132_vm5, %v1251_v5, 0.0 }
 0xf9e   : > { %v2157_v26 = vadd.f32 %v2156_v36, %v2155_v4  ;;  %v1254_v0 = vadd.f32 %v1253_v49, %v1252_v24  ;;  %v4128_v36 = vld [vmem:[%s6650_s6] ss:$0 sm:$0xff]  ;;  %v4194_v49 = vld [vmem:[%s6651_s7 + $0x1] ss:$0 sm:$0xff] }
 0xfa0   : > { %v2158_v51 = vrot.slane %v2157_v26, 4  ;;  %v1255_v46 = vrot.slane %v1254_v0, 4  ;;  %v3963_v27 = vpop.xlane.xlu1 %3962  ;;  %v3960_v18 = vpop.xlane.xlu0 %3959 }
 0xfa1   : > { %v3967_v30 = vadd.f32 %v3963_v27, %v3960_v18 }
 0xfa2   : > { %v2159_v35 = vadd.f32 %v2158_v51, %v2157_v26  ;;  %v1256_v38 = vadd.f32 %v1255_v46, %v1254_v0 }
 0xfa4   : > { %v2160_v2 = vrot.slane %v2159_v35, 2  ;;  %v1257_v19 = vrot.slane %v1256_v38, 2  ;;  %v3966_v25 = vpop.xlane.xlu1 %3965  ;;  %v3060_v33 = vpop.xlane.xlu0 %3059 }
 0xfa5   : > { %v3968_v39 = vsel %vm1132_vm5, %v3966_v25, 0.0  ;;  %v3062_v41 = vsel %vm1132_vm5, %v3060_v33, 0.0 }
 0xfa6   : > { %v2161_v28 = vadd.f32 %v2160_v2, %v2159_v35  ;;  %v1258_v42 = vadd.f32 %v1257_v19, %v1256_v38  ;;  %v3969_v55 = vadd.f32 %v3968_v39, %v3967_v30  ;;  %v3063_v10 = vadd.f32 %v3062_v41, %v3061_v63  ;;  %v4328_v30 = vld [vmem:[%s6650_s6 + $0x3] ss:$0 sm:$0xff] }
 0xfa8   : > { %v2162_v21 = vrot.slane %v2161_v28, 1  ;;  %v1259_v47 = vrot.slane %v1258_v42, 1  ;;  %v3970_v52 = vrot.slane %v3969_v55, 4  ;;  %v3064_v15 = vrot.slane %v3063_v10, 4 }
 0xfaa   : > { %v2163_v57 = vadd.f32 %v2162_v21, %v2161_v28  ;;  %v1260_v48 = vadd.f32 %v1259_v47, %v1258_v42  ;;  %v3971_v50 = vadd.f32 %v3970_v52, %v3969_v55  ;;  %v3065_v44 = vadd.f32 %v3064_v15, %v3063_v10  ;;  %v4260_v28 = vld [vmem:[%s6650_s6 + $0x2] ss:$0 sm:$0xff]  ;;  %v4330_v42 = vld [vmem:[%s6651_s7 + $0x3] ss:$0 sm:$0xff] }
 0xfab   : > { %v4262_v47 = vld [vmem:[%s6651_s7 + $0x2] ss:$0 sm:$0xff] }
 0xfac   : > { %v2164_v3 = vmul.f32 0.007352941, %v2163_v57  ;;  %v1261_v43 = vmul.f32 0.007352941, %v1260_v48  ;;  %v3972_v1 = vrot.slane %v3971_v50, 2  ;;  %v3066_v32 = vrot.slane %v3065_v44, 2 }
 0xfae   : > { %v2165_v34 = vadd.f32 1e-05, %v2164_v3  ;;  %v1262_v29 = vadd.f32 1e-05, %v1261_v43  ;;  %v3973_v6 = vadd.f32 %v3972_v1, %v3971_v50  ;;  %v3067_v22 = vadd.f32 %v3066_v32, %v3065_v44 }
 0xfb0   : > { %5347 = vrsqrt.f32 %v2165_v34  ;;  %v3974_v56 = vrot.slane %v3973_v6, 1  ;;  %v3068_v59 = vrot.slane %v3067_v22, 1 }
 0xfb1   : > { %5349 = vrsqrt.f32 %v1262_v29 }
 0xfb2   : > { %v3975_v37 = vadd.f32 %v3974_v56, %v3973_v6  ;;  %v3069_v60 = vadd.f32 %v3068_v59, %v3067_v22 }
 0xfb4   : > { %v3976_v62 = vmul.f32 0.007352941, %v3975_v37  ;;  %v3070_v11 = vmul.f32 0.007352941, %v3069_v60 }
 0xfb6   : > { %v3977_v54 = vadd.f32 1e-05, %v3976_v62  ;;  %v3071_v13 = vadd.f32 1e-05, %v3070_v11 }
 0xfb8   : > { %5351 = vrsqrt.f32 %v3977_v54 }
 0xfb9   : > { %5353 = vrsqrt.f32 %v3071_v13 }
 0xfba   : > { %v5348_v17 = vpop.eup %5347 }
 0xfbb   : > { %v5350_v24 = vpop.eup %5349  ;;  %v2167_v4 = vmul.f32 %v5348_v17, %v6512_v8  ;;  %v2168_v20 = vmul.f32 %v5348_v17, %v6515_v16  ;;  %v2169_v5 = vmul.f32 %v5348_v17, %v6491_v40  ;;  %v4129_v40 = vld [vmem:[%s6651_s7] ss:$0 sm:$0xff] }
 0xfbc   : > { %v1264_v26 = vmul.f32 %v5350_v24, %v6501_v58  ;;  %v1265_v0 = vmul.f32 %v5350_v24, %v6509_v7  ;;  %v1266_v51 = vmul.f32 %v5350_v24, %v6494_v53 }
 0xfbd   : > { %v2178_v46 = vmul.f32 %v4192_v23, %v2167_v4  ;;  %v2179_v8 = vmul.f32 %v4192_v23, %v2168_v20  ;;  %v2180_v27 = vmul.f32 %v4192_v23, %v2169_v5 }
 0xfbe   : > { %v1274_v58 = vmul.f32 %v4128_v36, %v1264_v26  ;;  %v1275_v53 = vmul.f32 %v4128_v36, %v1265_v0  ;;  %v1276_v7 = vmul.f32 %v4128_v36, %v1266_v51 }
 0xfbf   : > { %v2189_v16 = vadd.f32 %v4194_v49, %v2178_v46  ;;  %v2190_v18 = vadd.f32 %v4194_v49, %v2179_v8  ;;  %v2191_v35 = vadd.f32 %v4194_v49, %v2180_v27 }
 0xfc0   : > { %v1284_v38 = vadd.f32 %v4129_v40, %v1274_v58  ;;  %v1285_v63 = vadd.f32 %v4129_v40, %v1275_v53  ;;  %v1286_v2 = vadd.f32 %v4129_v40, %v1276_v7 }
 0xfc1   : > { %4195 = vst.msk [vmem:[%s6597_s17 + $0x18] sm:$0xff] %vm845_vm3, %v2189_v16  ;;  %4196 = vst.msk [vmem:[%s6597_s17 + $0x20] sm:$0xff] %vm845_vm3, %v2190_v18 }
 0xfc2   : > { %4197 = vst.msk [vmem:[%s6597_s17 + $0x28] sm:$0x1] %vm1222_vm8, %v2191_v35  ;;  %v5352_v19 = vpop.eup %5351  ;;  %1289 = vst.msk [vmem:[%s6597_s17 + $0x10] sm:$0x1] %vm1222_vm8, %v1286_v2 }
 0xfc3   : > { %1287 = vst.msk [vmem:[%s6597_s17] sm:$0xff] %vm845_vm3, %v1284_v38  ;;  %1288 = vst.msk [vmem:[%s6597_s17 + $0x8] sm:$0xff] %vm845_vm3, %v1285_v63  ;;  %v5354_v25 = vpop.eup %5353  ;;  %v3979_v33 = vmul.f32 %v5352_v19, %v6553_v45  ;;  %v3980_v39 = vmul.f32 %v5352_v19, %v6550_v31  ;;  %v3981_v41 = vmul.f32 %v5352_v19, %v6561_v61 }
 0xfc4   : > { %v3073_v55 = vmul.f32 %v5354_v25, %v6535_v12  ;;  %v3074_v10 = vmul.f32 %v5354_v25, %v6532_v9  ;;  %v3075_v45 = vmul.f32 %v5354_v25, %v6538_v14 }
 0xfc5   : > { %v3990_v31 = vmul.f32 %v4328_v30, %v3979_v33  ;;  %v3991_v61 = vmul.f32 %v4328_v30, %v3980_v39  ;;  %v3992_v21 = vmul.f32 %v4328_v30, %v3981_v41 }
 0xfc6   : > { %v3084_v52 = vmul.f32 %v4260_v28, %v3073_v55  ;;  %v3085_v15 = vmul.f32 %v4260_v28, %v3074_v10  ;;  %v3086_v12 = vmul.f32 %v4260_v28, %v3075_v45 }
 0xfc7   : > { %v4001_v57 = vadd.f32 %v4330_v42, %v3990_v31  ;;  %v4002_v48 = vadd.f32 %v4330_v42, %v3991_v61  ;;  %v4003_v9 = vadd.f32 %v4330_v42, %v3992_v21 }
 0xfc8   : > { %v3095_v50 = vadd.f32 %v4262_v47, %v3084_v52  ;;  %v3096_v44 = vadd.f32 %v4262_v47, %v3085_v15  ;;  %v3097_v14 = vadd.f32 %v4262_v47, %v3086_v12 }
 0xfc9   : > { %4331 = vst.msk [vmem:[%s6597_s17 + $0x48] sm:$0xff] %vm845_vm3, %v4001_v57  ;;  %4332 = vst.msk [vmem:[%s6597_s17 + $0x50] sm:$0xff] %vm845_vm3, %v4002_v48 }
 0xfca   : > { %4333 = vst.msk [vmem:[%s6597_s17 + $0x58] sm:$0x1] %vm1222_vm8, %v4003_v9  ;;  %4265 = vst.msk [vmem:[%s6597_s17 + $0x40] sm:$0x1] %vm1222_vm8, %v3097_v14 }
 0xfcb   : > { %4263 = vst.msk [vmem:[%s6597_s17 + $0x30] sm:$0xff] %vm845_vm3, %v3095_v50  ;;  %4264 = vst.msk [vmem:[%s6597_s17 + $0x38] sm:$0xff] %vm845_vm3, %v3096_v44 }
 0xfcc PF: > { %s19_s29 = sadd.s32 1, %s5361_s29  }
 0xfcd   : > { %p16_p4 = scmp.ge.s32.totalorder %s19_s29, 4  }
 0xfcf   :  { %18 = sbr.rel (!%p16_p4) target bundleno = 2 (0x2), region = 129 }

</bundles_post_ra>
